<compile_context>
chip_gen: v7x
topology: tpu7x:2x2x1
jax: 0.10.0
libtpu: 0.0.40
codegen_flags: <defaults>
</compile_context>

<pallas_src>
import functools

import jax
import jax.numpy as jnp
from jax.experimental import pallas as pl
from jax.experimental.pallas import tpu as pltpu

NEG_SLOPE = 0.2
H1, H2 = 512, 256
LANE = 128            # TPU lane width
OUT_PAD = 128         # lane-dense padded output width (real output = column 0)
K_ALIGN = 512         # feature-dim padding / K-tile size for the large-D path
TK = K_ALIGN


def _round_up(x, m):
    return (x + m - 1) // m * m


def _leaky_relu(x):
    return jnp.where(x > 0, x, NEG_SLOPE * x)


def _sigmoid(x):
    # exp and the reciprocal both go to the EUP slot, keeping the VALUs free.
    return pl.reciprocal(1.0 + jnp.exp(-x), approx=True)


def _tpu_target():
    """Return (generation tag, physical VMEM bytes per core)."""
    try:
        kind = jax.devices()[0].device_kind.lower()
    except Exception:
        kind = ""
    if "v7" in kind:
        return "v7x", 64 << 20
    if "v6" in kind:
        return "v6e", 128 << 20
    if "v5p" in kind:
        return "v5p", 128 << 20
    if "v5" in kind:
        return "v5e", 128 << 20
    return "unknown", 64 << 20        # conservative default


def _pick_batch_tile(batch, gen):
    if gen == "v5e":
        if batch >= 128:
            return 128                # native 4x128x128 MXU M-tile
    elif gen == "v7x":
        if batch >= 1024:
            return 256
        if batch >= 256:
            return 128
        if batch >= 16:
            # keep >= 2 grid steps so both TensorCores get work
            return _round_up(-(-batch // 2), 8)
    else:  # v6e / v5p / unknown
        if batch >= 512:
            return 256
        if batch >= 128:
            return 128
    return _round_up(max(batch, 1), 8)


def _spec(block_shape, index_map, buffer_count=None):
    """BlockSpec with an optional pipeline-depth hint (graceful fallback)."""
    if buffer_count is not None:
        try:
            return pl.BlockSpec(block_shape, index_map,
                                pipeline_mode=pl.Buffered(buffer_count))
        except Exception:
            pass
    return pl.BlockSpec(block_shape, index_map)


def _clamp_vmem(need_bytes, phys_bytes):
    return int(max(16 << 20, min(need_bytes, int(phys_bytes * 0.9))))


def _disc_kernel_resident(x_ref, w1_ref, b1_ref, w2_ref, b2_ref, w3_ref,
                          b3_ref, out_ref):
    # x tile (tb, Dp) bf16, weights bf16, accumulation f32.
    h1 = jnp.dot(x_ref[...], w1_ref[...],
                 preferred_element_type=jnp.float32) + b1_ref[...]
    h1 = _leaky_relu(h1).astype(jnp.bfloat16)

    h2 = jnp.dot(h1, w2_ref[...],
                 preferred_element_type=jnp.float32) + b2_ref[...]
    h2 = _leaky_relu(h2).astype(jnp.bfloat16)

    h3 = jnp.dot(h2, w3_ref[...],
                 preferred_element_type=jnp.float32) + b3_ref[...]
    out_ref[...] = _sigmoid(h3)


def _disc_kernel_ktiled(x_ref, w1_ref, b1_ref, w2_ref, b2_ref, w3_ref,
                        b3_ref, out_ref, h1_acc):
    # First matmul is K-tiled and accumulated in f32 VMEM scratch; layers 2/3
    # and the lane-dense store run on the last K step.
    k = pl.program_id(1)

    @pl.when(k == 0)
    def _():
        h1_acc[...] = jnp.zeros_like(h1_acc)

    h1_acc[...] += jnp.dot(x_ref[...], w1_ref[...],
                           preferred_element_type=jnp.float32)

    @pl.when(k == pl.num_programs(1) - 1)
    def _():
        h1 = _leaky_relu(h1_acc[...] + b1_ref[...]).astype(jnp.bfloat16)
        h2 = jnp.dot(h1, w2_ref[...],
                     preferred_element_type=jnp.float32) + b2_ref[...]
        h2 = _leaky_relu(h2).astype(jnp.bfloat16)
        h3 = jnp.dot(h2, w3_ref[...],
                     preferred_element_type=jnp.float32) + b3_ref[...]
        out_ref[...] = _sigmoid(h3)


def prepare_params(params):
    """Pack natural f32 (in, out) params into the kernel's storage layout:
    bf16 matmul weights, W1 rows zero-padded to a multiple of K_ALIGN,
    W3/b3 zero-padded to 128 output lanes, biases kept f32."""
    w1, b1, w2, b2, w3, b3 = params
    d = w1.shape[0]
    dp = _round_up(d, K_ALIGN)
    w1p = jnp.zeros((dp, H1), jnp.bfloat16).at[:d].set(w1.astype(jnp.bfloat16))
    w3p = jnp.zeros((H2, OUT_PAD), jnp.bfloat16).at[:, :1].set(
        w3.astype(jnp.bfloat16))
    b3p = jnp.zeros((1, OUT_PAD), jnp.float32).at[:, :1].set(
        b3.astype(jnp.float32))
    return (w1p, b1.astype(jnp.float32), w2.astype(jnp.bfloat16),
            b2.astype(jnp.float32), w3p, b3p)


@functools.partial(jax.jit, static_argnames=("pipeline_hints", "force_k_tiled"))
def discriminator_forward(img, kernel_params, pipeline_hints=True,
                          force_k_tiled=False):
    """img: (B, C, H, W) float32. kernel_params: output of prepare_params.
    Returns validity (B, 1) float32."""
    w1p, b1, w2, b2, w3p, b3p = kernel_params
    B = img.shape[0]
    d = img.size // B                    # == C * H * W  (torch img.view(B, -1))
    dp = w1p.shape[0]

    gen, vmem_phys = _tpu_target()
    tb = _pick_batch_tile(B, gen)
    bp = _round_up(B, tb)
    n_btiles = bp // tb

    # Stream x as bf16: cast fused into the pad (single materialized copy).
    # Zero-padded batch rows are sliced off below; zero-padded feature columns
    # multiply zero-padded W1 rows (exact).
    x = img.reshape(B, -1).astype(jnp.bfloat16)
    x = jnp.pad(x, ((0, bp - B), (0, dp - d)))

    w_buf = 1 if pipeline_hints else None            # single-buffer resident weights
    x_buf = 3 if (pipeline_hints and gen == "v6e" and n_btiles >= 3) else None

    bias_bytes = (b1.size + b2.size + b3p.size) * 4
    w_count = 1 if w_buf == 1 else 2
    x_count = x_buf or 2

    flops = 2 * bp * (dp * H1 + H1 * H2 + H2 * OUT_PAD)

    resident_need = (
        w_count * ((w1p.size + w2.size + w3p.size) * 2 + bias_bytes)
        + x_count * tb * dp * 2          # streamed x tiles (bf16)
        + 2 * tb * OUT_PAD * 4           # output tiles
        + tb * (H1 + H2) * 4             # live h1/h2 values
        + (4 << 20))                     # MXU staging / compiler scratch slack

    use_k_tiled = force_k_tiled or resident_need > int(vmem_phys * 0.6)

    if not use_k_tiled:
        cost = pl.CostEstimate(
            flops=flops,
            transcendentals=2 * bp * OUT_PAD,
            bytes_accessed=(x.size * 2 + (w1p.size + w2.size + w3p.size) * 2
                            + bias_bytes + bp * OUT_PAD * 4))
        out = pl.pallas_call(
            _disc_kernel_resident,
            out_shape=jax.ShapeDtypeStruct((bp, OUT_PAD), jnp.float32),
            grid_spec=pltpu.PrefetchScalarGridSpec(
                num_scalar_prefetch=0,
                grid=(n_btiles,),
                in_specs=[
                    _spec((tb, dp), lambda i: (i, 0), x_buf),       # x (streamed)
                    _spec((dp, H1), lambda i: (0, 0), w_buf),       # W1 (resident)
                    _spec((1, H1), lambda i: (0, 0), w_buf),        # b1
                    _spec((H1, H2), lambda i: (0, 0), w_buf),       # W2
                    _spec((1, H2), lambda i: (0, 0), w_buf),        # b2
                    _spec((H2, OUT_PAD), lambda i: (0, 0), w_buf),  # W3 (lane-padded)
                    _spec((1, OUT_PAD), lambda i: (0, 0), w_buf),   # b3
                ],
                out_specs=pl.BlockSpec((tb, OUT_PAD), lambda i: (i, 0)),
            ),
            compiler_params=pltpu.CompilerParams(
                dimension_semantics=("parallel",),
                vmem_limit_bytes=_clamp_vmem(resident_need, vmem_phys),
            ),
            cost_estimate=cost,
        )(x, w1p, b1, w2, b2, w3p, b3p)
    else:
        # K-tiled first matmul: bounds resident VMEM independent of image size.
        n_ktiles = dp // TK
        ktiled_need = (
            2 * TK * H1 * 2                  # streamed W1 tiles (bf16)
            + x_count * tb * TK * 2          # streamed x tiles (bf16)
            + w_count * ((w2.size + w3p.size) * 2 + bias_bytes)
            + tb * H1 * 4                    # h1 accumulator scratch
            + 2 * tb * OUT_PAD * 4           # output tiles
            + tb * H2 * 4                    # live h2 values
            + (4 << 20))
        cost = pl.CostEstimate(
            flops=flops,
            transcendentals=2 * bp * OUT_PAD,
            bytes_accessed=(x.size * 2 + n_btiles * w1p.size * 2
                            + (w2.size + w3p.size) * 2 + bias_bytes
                            + bp * OUT_PAD * 4))
        out = pl.pallas_call(
            _disc_kernel_ktiled,
            out_shape=jax.ShapeDtypeStruct((bp, OUT_PAD), jnp.float32),
            grid_spec=pltpu.PrefetchScalarGridSpec(
                num_scalar_prefetch=0,
                grid=(n_btiles, n_ktiles),
                in_specs=[
                    _spec((tb, TK), lambda i, k: (i, k), x_buf),       # x
                    _spec((TK, H1), lambda i, k: (k, 0), None),        # W1 (streamed)
                    _spec((1, H1), lambda i, k: (0, 0), w_buf),        # b1
                    _spec((H1, H2), lambda i, k: (0, 0), w_buf),       # W2
                    _spec((1, H2), lambda i, k: (0, 0), w_buf),        # b2
                    _spec((H2, OUT_PAD), lambda i, k: (0, 0), w_buf),  # W3
                    _spec((1, OUT_PAD), lambda i, k: (0, 0), w_buf),   # b3
                ],
                out_specs=pl.BlockSpec((tb, OUT_PAD), lambda i, k: (i, 0)),
                scratch_shapes=[pltpu.VMEM((tb, H1), jnp.float32)],
            ),
            compiler_params=pltpu.CompilerParams(
                dimension_semantics=("parallel", "arbitrary"),
                vmem_limit_bytes=_clamp_vmem(ktiled_need, vmem_phys),
            ),
            cost_estimate=cost,
        )(x, w1p, b1, w2, b2, w3p, b3p)

    return out[:B, :1]


def init_params(key, in_dim):
    """Deterministic init; weights stored as (in, out) = torch W.T, f32."""
    k1, k2, k3 = jax.random.split(key, 3)

    def linear(k, fan_in, fan_out):
        # torch.nn.Linear default init scale: U(-1/sqrt(fan_in), 1/sqrt(fan_in))
        bound = 1.0 / jnp.sqrt(jnp.float32(fan_in))
        kw, kb = jax.random.split(k)
        w = jax.random.uniform(kw, (fan_in, fan_out), jnp.float32, -bound, bound)
        b = jax.random.uniform(kb, (1, fan_out), jnp.float32, -bound, bound)
        return w, b

    w1, b1 = linear(k1, in_dim, H1)
    w2, b2 = linear(k2, H1, H2)
    w3, b3 = linear(k3, H2, 1)
    return (w1, b1, w2, b2, w3, b3)


def _run(img, kparams, **kw):
    try:
        return jax.block_until_ready(discriminator_forward(img, kparams, **kw))
    except Exception:
        # Older JAX without BlockSpec pipeline_mode support: retry with
        # default double-buffering everywhere.
        return jax.block_until_ready(
            discriminator_forward(img, kparams, pipeline_hints=False, **kw))


if __name__ == "__main__":
    # Small shapes consistent with the module: img_shape = (channels, img_size, img_size)
    B, C, Himg, Wimg = 2, 4, 16, 16
    key = jax.random.PRNGKey(0)
    k_img, k_par = jax.random.split(key)

    img = jax.random.normal(k_img, (B, C, Himg, Wimg), dtype=jnp.float32)
    params = init_params(k_par, C * Himg * Wimg)
    kparams = prepare_params(params)

    # Resident-weights path (the one small images take).
    validity = _run(img, kparams)
    assert validity.shape == (B, 1)

    # Also exercise the K-tiled (large-image) path at small scale.
    validity_k = _run(img, kparams, force_k_tiled=True)
    assert validity_k.shape == (B, 1)

    # Reference 1: same bf16-matmul / f32-accumulate recipe (tight tolerance).
    xf = img.reshape(B, -1)
    w1, b1, w2, b2, w3, b3 = params

    def lrelu(v):
        return jnp.where(v > 0, v, NEG_SLOPE * v)

    r1 = lrelu(jnp.dot(xf.astype(jnp.bfloat16), w1.astype(jnp.bfloat16),
                       preferred_element_type=jnp.float32) + b1)
    r2 = lrelu(jnp.dot(r1.astype(jnp.bfloat16), w2.astype(jnp.bfloat16),
                       preferred_element_type=jnp.float32) + b2)
    ref_bf16 = jax.nn.sigmoid(
        jnp.dot(r2.astype(jnp.bfloat16), w3.astype(jnp.bfloat16),
                preferred_element_type=jnp.float32) + b3)
    assert jnp.allclose(validity, ref_bf16, atol=1e-2, rtol=1e-2)
    assert jnp.allclose(validity_k, ref_bf16, atol=1e-2, rtol=1e-2)

    # Reference 2: pure f32 PyTorch-equivalent math (looser tolerance for bf16).
    f1 = lrelu(xf @ w1 + b1)
    f2 = lrelu(f1 @ w2 + b2)
    ref_f32 = jax.nn.sigmoid(f2 @ w3 + b3)
    assert jnp.allclose(validity, ref_f32, atol=3e-2, rtol=3e-2)
    assert jnp.allclose(validity_k, ref_f32, atol=3e-2, rtol=3e-2)

    print("KERNEL_OK")
</pallas_src>

<mosaic_0001>
module attributes {stable_mosaic.version = 11 : i64} {
  func.func @_disc_kernel_resident(%arg0: i32, %arg1: memref<8x1024xbf16, #tpu.memory_space<vmem>>, %arg2: memref<1024x512xbf16, #tpu.memory_space<vmem>>, %arg3: memref<1x512xf32, #tpu.memory_space<vmem>>, %arg4: memref<512x256xbf16, #tpu.memory_space<vmem>>, %arg5: memref<1x256xf32, #tpu.memory_space<vmem>>, %arg6: memref<256x128xbf16, #tpu.memory_space<vmem>>, %arg7: memref<1x128xf32, #tpu.memory_space<vmem>>, %arg8: memref<8x128xf32, #tpu.memory_space<vmem>>) attributes {dimension_semantics = [#tpu.dimension_semantics<parallel>], iteration_bounds = array<i64: 1>, scalar_prefetch = 0 : i64, scratch_operands = 0 : i64, tpu.core_type = #tpu.core_type<tc>, window_params = [{transform_indices = @transform_0, window_bounds = array<i64: 8, 1024>}, {pipeline_mode = #tpu.pipeline_mode<synchronous>, transform_indices = @transform_1, window_bounds = array<i64: 1024, 512>}, {pipeline_mode = #tpu.pipeline_mode<synchronous>, transform_indices = @transform_2, window_bounds = array<i64: 1, 512>}, {pipeline_mode = #tpu.pipeline_mode<synchronous>, transform_indices = @transform_3, window_bounds = array<i64: 512, 256>}, {pipeline_mode = #tpu.pipeline_mode<synchronous>, transform_indices = @transform_4, window_bounds = array<i64: 1, 256>}, {pipeline_mode = #tpu.pipeline_mode<synchronous>, transform_indices = @transform_5, window_bounds = array<i64: 256, 128>}, {pipeline_mode = #tpu.pipeline_mode<synchronous>, transform_indices = @transform_6, window_bounds = array<i64: 1, 128>}, {transform_indices = @transform_7, window_bounds = array<i64: 8, 128>}]} {
    %c0 = arith.constant 0 : index
    %c0_0 = arith.constant 0 : index
    %0 = vector.load %arg1[%c0, %c0_0] : memref<8x1024xbf16, #tpu.memory_space<vmem>>, vector<8x1024xbf16>
    %c0_1 = arith.constant 0 : index
    %c0_2 = arith.constant 0 : index
    %1 = vector.load %arg2[%c0_1, %c0_2] : memref<1024x512xbf16, #tpu.memory_space<vmem>>, vector<1024x512xbf16>
    %cst = arith.constant dense<0.000000e+00> : vector<8x512xf32>
    %2 = tpu.matmul %0, %1, %cst {dimension_numbers = #tpu.dot_dimension_numbers<[1], [0], [0], [1], [0, 0, 1, 1], [], []>} : vector<8x1024xbf16>, vector<1024x512xbf16>, vector<8x512xf32> -> vector<8x512xf32>
    %c0_3 = arith.constant 0 : index
    %c0_4 = arith.constant 0 : index
    %3 = vector.load %arg3[%c0_3, %c0_4] : memref<1x512xf32, #tpu.memory_space<vmem>>, vector<1x512xf32>
    %4 = vector.broadcast %3 : vector<1x512xf32> to vector<8x512xf32>
    %5 = arith.addf %2, %4 : vector<8x512xf32>
    %cst_5 = arith.constant 0.000000e+00 : f32
    %6 = vector.broadcast %cst_5 : f32 to vector<8x512xf32>
    %7 = arith.cmpf ogt, %5, %6 : vector<8x512xf32>
    %cst_6 = arith.constant 2.000000e-01 : f32
    %8 = vector.broadcast %cst_6 : f32 to vector<8x512xf32>
    %9 = arith.mulf %8, %5 : vector<8x512xf32>
    %10 = arith.select %7, %5, %9 : vector<8x512xi1>, vector<8x512xf32>
    %11 = arith.truncf %10 : vector<8x512xf32> to vector<8x512xbf16>
    %c0_7 = arith.constant 0 : index
    %c0_8 = arith.constant 0 : index
    %12 = vector.load %arg4[%c0_7, %c0_8] : memref<512x256xbf16, #tpu.memory_space<vmem>>, vector<512x256xbf16>
    %cst_9 = arith.constant dense<0.000000e+00> : vector<8x256xf32>
    %13 = tpu.matmul %11, %12, %cst_9 {dimension_numbers = #tpu.dot_dimension_numbers<[1], [0], [0], [1], [0, 0, 1, 1], [], []>} : vector<8x512xbf16>, vector<512x256xbf16>, vector<8x256xf32> -> vector<8x256xf32>
    %c0_10 = arith.constant 0 : index
    %c0_11 = arith.constant 0 : index
    %14 = vector.load %arg5[%c0_10, %c0_11] : memref<1x256xf32, #tpu.memory_space<vmem>>, vector<1x256xf32>
    %15 = vector.broadcast %14 : vector<1x256xf32> to vector<8x256xf32>
    %16 = arith.addf %13, %15 : vector<8x256xf32>
    %cst_12 = arith.constant 0.000000e+00 : f32
    %17 = vector.broadcast %cst_12 : f32 to vector<8x256xf32>
    %18 = arith.cmpf ogt, %16, %17 : vector<8x256xf32>
    %cst_13 = arith.constant 2.000000e-01 : f32
    %19 = vector.broadcast %cst_13 : f32 to vector<8x256xf32>
    %20 = arith.mulf %19, %16 : vector<8x256xf32>
    %21 = arith.select %18, %16, %20 : vector<8x256xi1>, vector<8x256xf32>
    %22 = arith.truncf %21 : vector<8x256xf32> to vector<8x256xbf16>
    %c0_14 = arith.constant 0 : index
    %c0_15 = arith.constant 0 : index
    %23 = vector.load %arg6[%c0_14, %c0_15] : memref<256x128xbf16, #tpu.memory_space<vmem>>, vector<256x128xbf16>
    %cst_16 = arith.constant dense<0.000000e+00> : vector<8x128xf32>
    %24 = tpu.matmul %22, %23, %cst_16 {dimension_numbers = #tpu.dot_dimension_numbers<[1], [0], [0], [1], [0, 0, 1, 1], [], []>} : vector<8x256xbf16>, vector<256x128xbf16>, vector<8x128xf32> -> vector<8x128xf32>
    %c0_17 = arith.constant 0 : index
    %c0_18 = arith.constant 0 : index
    %25 = vector.load %arg7[%c0_17, %c0_18] : memref<1x128xf32, #tpu.memory_space<vmem>>, vector<1x128xf32>
    %26 = vector.broadcast %25 : vector<1x128xf32> to vector<8x128xf32>
    %27 = arith.addf %24, %26 : vector<8x128xf32>
    %cst_19 = arith.constant 0.000000e+00 : f32
    %28 = vector.broadcast %cst_19 : f32 to vector<8x128xf32>
    %29 = arith.subf %28, %27 : vector<8x128xf32>
    %30 = math.exp %29 : vector<8x128xf32>
    %cst_20 = arith.constant 1.000000e+00 : f32
    %31 = vector.broadcast %cst_20 : f32 to vector<8x128xf32>
    %32 = arith.addf %31, %30 : vector<8x128xf32>
    %33 = tpu.reciprocal %32 {approx = true} : vector<8x128xf32> -> vector<8x128xf32>
    %c0_21 = arith.constant 0 : index
    %c0_22 = arith.constant 0 : index
    %34 = vector.load %arg8[%c0_21, %c0_22] : memref<8x128xf32, #tpu.memory_space<vmem>>, vector<8x128xf32>
    tpu.vector_store %arg8[%c0_21, %c0_22], %33 {strides = array<i32>} : memref<8x128xf32, #tpu.memory_space<vmem>>, vector<8x128xf32>,
    return
  }
  func.func @transform_0(%arg0: i32) -> (i32, i32) {
    %c0_i32 = arith.constant 0 : i32
    %c0_i32_0 = arith.constant 0 : i32
    return %arg0, %c0_i32 : i32, i32
  }
  func.func @transform_1(%arg0: i32) -> (i32, i32) {
    %c0_i32 = arith.constant 0 : i32
    %c0_i32_0 = arith.constant 0 : i32
    %c0_i32_1 = arith.constant 0 : i32
    return %c0_i32, %c0_i32_0 : i32, i32
  }
  func.func @transform_2(%arg0: i32) -> (i32, i32) {
    %c0_i32 = arith.constant 0 : i32
    %c0_i32_0 = arith.constant 0 : i32
    %c0_i32_1 = arith.constant 0 : i32
    return %c0_i32, %c0_i32_0 : i32, i32
  }
  func.func @transform_3(%arg0: i32) -> (i32, i32) {
    %c0_i32 = arith.constant 0 : i32
    %c0_i32_0 = arith.constant 0 : i32
    %c0_i32_1 = arith.constant 0 : i32
    return %c0_i32, %c0_i32_0 : i32, i32
  }
  func.func @transform_4(%arg0: i32) -> (i32, i32) {
    %c0_i32 = arith.constant 0 : i32
    %c0_i32_0 = arith.constant 0 : i32
    %c0_i32_1 = arith.constant 0 : i32
    return %c0_i32, %c0_i32_0 : i32, i32
  }
  func.func @transform_5(%arg0: i32) -> (i32, i32) {
    %c0_i32 = arith.constant 0 : i32
    %c0_i32_0 = arith.constant 0 : i32
    %c0_i32_1 = arith.constant 0 : i32
    return %c0_i32, %c0_i32_0 : i32, i32
  }
  func.func @transform_6(%arg0: i32) -> (i32, i32) {
    %c0_i32 = arith.constant 0 : i32
    %c0_i32_0 = arith.constant 0 : i32
    %c0_i32_1 = arith.constant 0 : i32
    return %c0_i32, %c0_i32_0 : i32, i32
  }
  func.func @transform_7(%arg0: i32) -> (i32, i32) {
    %c0_i32 = arith.constant 0 : i32
    %c0_i32_0 = arith.constant 0 : i32
    return %arg0, %c0_i32 : i32, i32
  }
}

module attributes {stable_mosaic.version = 11 : i64} {
  func.func @_disc_kernel_resident(%arg0: i32, %arg1: memref<8x1024xbf16, #tpu.memory_space<vmem>>, %arg2: memref<1024x512xbf16, #tpu.memory_space<vmem>>, %arg3: memref<1x512xf32, #tpu.memory_space<vmem>>, %arg4: memref<512x256xbf16, #tpu.memory_space<vmem>>, %arg5: memref<1x256xf32, #tpu.memory_space<vmem>>, %arg6: memref<256x128xbf16, #tpu.memory_space<vmem>>, %arg7: memref<1x128xf32, #tpu.memory_space<vmem>>, %arg8: memref<8x128xf32, #tpu.memory_space<vmem>>) attributes {dimension_semantics = [#tpu.dimension_semantics<parallel>], iteration_bounds = array<i64: 1>, scalar_prefetch = 0 : i64, scratch_operands = 0 : i64, tpu.core_type = #tpu.core_type<tc>, window_params = [{transform_indices = @transform_0, window_bounds = array<i64: 8, 1024>}, {pipeline_mode = #tpu.pipeline_mode<synchronous>, transform_indices = @transform_1, window_bounds = array<i64: 1024, 512>}, {pipeline_mode = #tpu.pipeline_mode<synchronous>, transform_indices = @transform_2, window_bounds = array<i64: 1, 512>}, {pipeline_mode = #tpu.pipeline_mode<synchronous>, transform_indices = @transform_3, window_bounds = array<i64: 512, 256>}, {pipeline_mode = #tpu.pipeline_mode<synchronous>, transform_indices = @transform_4, window_bounds = array<i64: 1, 256>}, {pipeline_mode = #tpu.pipeline_mode<synchronous>, transform_indices = @transform_5, window_bounds = array<i64: 256, 128>}, {pipeline_mode = #tpu.pipeline_mode<synchronous>, transform_indices = @transform_6, window_bounds = array<i64: 1, 128>}, {transform_indices = @transform_7, window_bounds = array<i64: 8, 128>}]} {
    %c0 = arith.constant 0 : index
    %c0_0 = arith.constant 0 : index
    %0 = vector.load %arg1[%c0, %c0_0] : memref<8x1024xbf16, #tpu.memory_space<vmem>>, vector<8x1024xbf16>
    %c0_1 = arith.constant 0 : index
    %c0_2 = arith.constant 0 : index
    %1 = vector.load %arg2[%c0_1, %c0_2] : memref<1024x512xbf16, #tpu.memory_space<vmem>>, vector<1024x512xbf16>
    %cst = arith.constant dense<0.000000e+00> : vector<8x512xf32>
    %2 = tpu.matmul %0, %1, %cst {dimension_numbers = #tpu.dot_dimension_numbers<[1], [0], [0], [1], [0, 0, 1, 1], [], []>} : vector<8x1024xbf16>, vector<1024x512xbf16>, vector<8x512xf32> -> vector<8x512xf32>
    %c0_3 = arith.constant 0 : index
    %c0_4 = arith.constant 0 : index
    %3 = vector.load %arg3[%c0_3, %c0_4] : memref<1x512xf32, #tpu.memory_space<vmem>>, vector<1x512xf32>
    %4 = vector.broadcast %3 : vector<1x512xf32> to vector<8x512xf32>
    %5 = arith.addf %2, %4 : vector<8x512xf32>
    %cst_5 = arith.constant 0.000000e+00 : f32
    %6 = vector.broadcast %cst_5 : f32 to vector<8x512xf32>
    %7 = arith.cmpf ogt, %5, %6 : vector<8x512xf32>
    %cst_6 = arith.constant 2.000000e-01 : f32
    %8 = vector.broadcast %cst_6 : f32 to vector<8x512xf32>
    %9 = arith.mulf %8, %5 : vector<8x512xf32>
    %10 = arith.select %7, %5, %9 : vector<8x512xi1>, vector<8x512xf32>
    %11 = arith.truncf %10 : vector<8x512xf32> to vector<8x512xbf16>
    %c0_7 = arith.constant 0 : index
    %c0_8 = arith.constant 0 : index
    %12 = vector.load %arg4[%c0_7, %c0_8] : memref<512x256xbf16, #tpu.memory_space<vmem>>, vector<512x256xbf16>
    %cst_9 = arith.constant dense<0.000000e+00> : vector<8x256xf32>
    %13 = tpu.matmul %11, %12, %cst_9 {dimension_numbers = #tpu.dot_dimension_numbers<[1], [0], [0], [1], [0, 0, 1, 1], [], []>} : vector<8x512xbf16>, vector<512x256xbf16>, vector<8x256xf32> -> vector<8x256xf32>
    %c0_10 = arith.constant 0 : index
    %c0_11 = arith.constant 0 : index
    %14 = vector.load %arg5[%c0_10, %c0_11] : memref<1x256xf32, #tpu.memory_space<vmem>>, vector<1x256xf32>
    %15 = vector.broadcast %14 : vector<1x256xf32> to vector<8x256xf32>
    %16 = arith.addf %13, %15 : vector<8x256xf32>
    %cst_12 = arith.constant 0.000000e+00 : f32
    %17 = vector.broadcast %cst_12 : f32 to vector<8x256xf32>
    %18 = arith.cmpf ogt, %16, %17 : vector<8x256xf32>
    %cst_13 = arith.constant 2.000000e-01 : f32
    %19 = vector.broadcast %cst_13 : f32 to vector<8x256xf32>
    %20 = arith.mulf %19, %16 : vector<8x256xf32>
    %21 = arith.select %18, %16, %20 : vector<8x256xi1>, vector<8x256xf32>
    %22 = arith.truncf %21 : vector<8x256xf32> to vector<8x256xbf16>
    %c0_14 = arith.constant 0 : index
    %c0_15 = arith.constant 0 : index
    %23 = vector.load %arg6[%c0_14, %c0_15] : memref<256x128xbf16, #tpu.memory_space<vmem>>, vector<256x128xbf16>
    %cst_16 = arith.constant dense<0.000000e+00> : vector<8x128xf32>
    %24 = tpu.matmul %22, %23, %cst_16 {dimension_numbers = #tpu.dot_dimension_numbers<[1], [0], [0], [1], [0, 0, 1, 1], [], []>} : vector<8x256xbf16>, vector<256x128xbf16>, vector<8x128xf32> -> vector<8x128xf32>
    %c0_17 = arith.constant 0 : index
    %c0_18 = arith.constant 0 : index
    %25 = vector.load %arg7[%c0_17, %c0_18] : memref<1x128xf32, #tpu.memory_space<vmem>>, vector<1x128xf32>
    %26 = vector.broadcast %25 : vector<1x128xf32> to vector<8x128xf32>
    %27 = arith.addf %24, %26 : vector<8x128xf32>
    %cst_19 = arith.constant 0.000000e+00 : f32
    %28 = vector.broadcast %cst_19 : f32 to vector<8x128xf32>
    %29 = arith.subf %28, %27 : vector<8x128xf32>
    %30 = math.exp %29 : vector<8x128xf32>
    %cst_20 = arith.constant 1.000000e+00 : f32
    %31 = vector.broadcast %cst_20 : f32 to vector<8x128xf32>
    %32 = arith.addf %31, %30 : vector<8x128xf32>
    %33 = tpu.reciprocal %32 {approx = true} : vector<8x128xf32> -> vector<8x128xf32>
    %c0_21 = arith.constant 0 : index
    %c0_22 = arith.constant 0 : index
    %34 = vector.load %arg8[%c0_21, %c0_22] : memref<8x128xf32, #tpu.memory_space<vmem>>, vector<8x128xf32>
    tpu.vector_store %arg8[%c0_21, %c0_22], %33 {strides = array<i32>} : memref<8x128xf32, #tpu.memory_space<vmem>>, vector<8x128xf32>,
    return
  }
  func.func @transform_0(%arg0: i32) -> (i32, i32) {
    %c0_i32 = arith.constant 0 : i32
    %c0_i32_0 = arith.constant 0 : i32
    return %arg0, %c0_i32 : i32, i32
  }
  func.func @transform_1(%arg0: i32) -> (i32, i32) {
    %c0_i32 = arith.constant 0 : i32
    %c0_i32_0 = arith.constant 0 : i32
    %c0_i32_1 = arith.constant 0 : i32
    return %c0_i32, %c0_i32_0 : i32, i32
  }
  func.func @transform_2(%arg0: i32) -> (i32, i32) {
    %c0_i32 = arith.constant 0 : i32
    %c0_i32_0 = arith.constant 0 : i32
    %c0_i32_1 = arith.constant 0 : i32
    return %c0_i32, %c0_i32_0 : i32, i32
  }
  func.func @transform_3(%arg0: i32) -> (i32, i32) {
    %c0_i32 = arith.constant 0 : i32
    %c0_i32_0 = arith.constant 0 : i32
    %c0_i32_1 = arith.constant 0 : i32
    return %c0_i32, %c0_i32_0 : i32, i32
  }
  func.func @transform_4(%arg0: i32) -> (i32, i32) {
    %c0_i32 = arith.constant 0 : i32
    %c0_i32_0 = arith.constant 0 : i32
    %c0_i32_1 = arith.constant 0 : i32
    return %c0_i32, %c0_i32_0 : i32, i32
  }
  func.func @transform_5(%arg0: i32) -> (i32, i32) {
    %c0_i32 = arith.constant 0 : i32
    %c0_i32_0 = arith.constant 0 : i32
    %c0_i32_1 = arith.constant 0 : i32
    return %c0_i32, %c0_i32_0 : i32, i32
  }
  func.func @transform_6(%arg0: i32) -> (i32, i32) {
    %c0_i32 = arith.constant 0 : i32
    %c0_i32_0 = arith.constant 0 : i32
    %c0_i32_1 = arith.constant 0 : i32
    return %c0_i32, %c0_i32_0 : i32, i32
  }
  func.func @transform_7(%arg0: i32) -> (i32, i32) {
    %c0_i32 = arith.constant 0 : i32
    %c0_i32_0 = arith.constant 0 : i32
    return %arg0, %c0_i32 : i32, i32
  }
}

</mosaic_0001>

<bundles_post_ra>
// kernel: discriminator_forward.1
= control target key start
LH: loop header
LB: loop body
LE: loop exit
PB: predicated region body
PF: predicated region fallthrough
CT: control target
= control target key end

     0   :  { %12 = vsyncpa [#allocation3], 0  ;;  %s3829_s0 = inlined_call_operand.vmem [shape: bf16[8,1024], index: 0, kind: input, shape index: {}]   ;;  %s3830_s1 = inlined_call_operand.hbm [shape: bf16[1024,512], index: 1, kind: input, shape index: {}]   ;;  %s3831_s2 = inlined_call_operand.vmem [shape: f32[1,512], index: 2, kind: input, shape index: {}]   ;;  %s3832_s3 = inlined_call_operand.hbm [shape: bf16[512,256], index: 3, kind: input, shape index: {}]   ;;  %s3833_s4 = inlined_call_operand.vmem [shape: f32[1,256], index: 4, kind: input, shape index: {}]   ;;  %s3834_s5 = inlined_call_operand.vmem [shape: bf16[256,128], index: 5, kind: input, shape index: {}]   ;;  %s3835_s6 = inlined_call_operand.vmem [shape: f32[1,128], index: 6, kind: input, shape index: {}]   ;;  %s3836_s7 = inlined_call_operand.vmem [shape: f32[8,128], index: 7, kind: output, shape index: {}]  }
   0x1   :  { %13 = vsyncpa [#allocation5], 0  ;;  %s3623_s24 = smov [#allocation2]   ;;  %s3575_s28 = scalar_lea.hbm %s3830_s1, 32768 }
   0x2   :  { %s21_s25 = sshll.u32 %s3623_s24, 4  ;;  %p3576_p0 = scmp.ne.s32.totalorder %s3830_s1, %s3575_s28  ;;  %s22_s25 = int_to_ptr.vmem [resolvable:$true] %s21_s25 }
   0x3   :  { %p3579_p1 = scmp.lt.u32.totalorder %s3575_s28, %s3830_s1 }
   0x5   :  { %p3581_p2 = pnand %p3579_p1, %p3576_p0 }
   0x7   :  { %3584 = shalt.err (!%p3581_p2)
}
   0x8   :  { %s3585_s10 = scalar_lea.vmem %s22_s25, 32768  ;;  %p3590_p4 = scmp.lt.s32.totalorder %s22_s25, %s22_s25 }
   0x9   :  { %p3586_p3 = scmp.ne.s32.totalorder %s22_s25, %s3585_s10  ;;  %p3591_p5 = scmp.lt.s32.totalorder %s3585_s10, %s3585_s10 }
   0xb   :  { %p3592_p6 = por %p3591_p5, %p3590_p4 }
   0xd   :  { %p3593_p7 = pnand %p3592_p6, %p3586_p3 }
   0xf   :  { %3596 = shalt.err (!%p3593_p7)
}
  0x10   :  { %s3624_s11 = smov 256   ;;  %s3625_s12 = smov 16  }
  0x11   :  { %27 = dma.hbm_to_vmem [thread:$0]  %s3830_s1, 32768, %s22_s25, [#allocation3], %s3624_s11, %s3624_s11, %s3625_s12  }
  0x12   :  { %s3626_s15 = smov [#allocation4]   ;;  %s3597_s19 = scalar_lea.hbm %s3832_s3, 8192 }
  0x13   :  { %s35_s16 = sshll.u32 %s3626_s15, 4  ;;  %p3598_p8 = scmp.ne.s32.totalorder %s3832_s3, %s3597_s19  ;;  %s36_s16 = int_to_ptr.vmem [resolvable:$true] %s35_s16 }
  0x14   :  { %p3601_p9 = scmp.lt.u32.totalorder %s3597_s19, %s3832_s3 }
  0x16   :  { %p3603_p10 = pnand %p3601_p9, %p3598_p8 }
  0x18   :  { %3606 = shalt.err (!%p3603_p10)
}
  0x19   :  { %s3607_s24 = scalar_lea.vmem %s36_s16, 8192  ;;  %p3612_p12 = scmp.lt.s32.totalorder %s36_s16, %s36_s16 }
  0x1a   :  { %p3608_p11 = scmp.ne.s32.totalorder %s36_s16, %s3607_s24  ;;  %p3613_p13 = scmp.lt.s32.totalorder %s3607_s24, %s3607_s24 }
  0x1c   :  { %p3614_p0 = por %p3613_p13, %p3612_p12 }
  0x1e   :  { %p3615_p1 = pnand %p3614_p0, %p3608_p11 }
  0x20   :  { %3618 = shalt.err (!%p3615_p1)
}
  0x21   :  { %s3627_s1 = smov 128   ;;  %s3628_s25 = smov 8  }
  0x22   :  { %41 = dma.hbm_to_vmem [thread:$0]  %s3832_s3, 8192, %s36_s16, [#allocation5], %s3627_s1, %s3627_s1, %s3628_s25  }
  0x23   :  { %3619 = dma.done.wait [#allocation3], 32768  }
  0x24   :  { %3620 = vsyncadd [#allocation3], 4294934528 }
  0x25   :  { %3621 = dma.done.wait [#allocation5], 8192  }
  0x26   :  { %3622 = vsyncadd [#allocation5], 4294959104  ;;  %v3067_v0 = vld [vmem:[#allocation2 + $0x4] ss:$16 sps:$4 sm:$0xff]   ;;  %v3071_v2 = vld [vmem:[#allocation2] ss:$16 sps:$4 sm:$0xff]  }
  0x27   :  { %v3069_v1 = vld [vmem:[#allocation2 + $0x204] ss:$16 sps:$4 sm:$0xff]   ;;  %1645 = vmatprep.subr.bf16.mxu1 %v3067_v0  ;;  %v3072_v3 = vld [vmem:[#allocation2 + $0x200] ss:$16 sps:$4 sm:$0xff]   ;;  %v56_v48 = vld [vmem:[%s3829_s0 + $0x8] sm:$0xff] }
  0x28   :  { %1686 = vmatprep.subr.bf16.mxu0 %v3069_v1  ;;  %v3073_v4 = vld [vmem:[#allocation2 + $0x24] ss:$16 sps:$4 sm:$0xff]   ;;  %1646 = vmatpush1.bf16.msra.mxu1 %v3071_v2  ;;  %v3077_v6 = vld [vmem:[#allocation2 + $0x20] ss:$16 sps:$4 sm:$0xff]   ;;  %v3701_v51 = vcombine.high %v56_v48, %v56_v48 }
  0x29   :  { %1687 = vmatpush1.bf16.msra.mxu0 %v3072_v3  ;;  %v3075_v5 = vld [vmem:[#allocation2 + $0x224] ss:$16 sps:$4 sm:$0xff]   ;;  %1647 = vmatprep.subr.bf16.mxu1 %v3073_v4  ;;  %v3078_v7 = vld [vmem:[#allocation2 + $0x220] ss:$16 sps:$4 sm:$0xff]  }
  0x2a   :  { %1688 = vmatprep.subr.bf16.mxu0 %v3075_v5  ;;  %v3079_v8 = vld [vmem:[#allocation2 + $0x44] ss:$16 sps:$4 sm:$0xff]   ;;  %v3083_v10 = vld [vmem:[#allocation2 + $0x40] ss:$16 sps:$4 sm:$0xff]   ;;  %1718 = vmatprep.mubr.bf16.mxu0 %v3701_v51  ;;  %v3172_v5 = vld [vmem:[#allocation2 + $0xc] ss:$16 sps:$4 sm:$0xff]  }
  0x2b   :  { %v3081_v9 = vld [vmem:[#allocation2 + $0x244] ss:$16 sps:$4 sm:$0xff]   ;;  %v3084_v11 = vld [vmem:[#allocation2 + $0x240] ss:$16 sps:$4 sm:$0xff]  }
  0x2c   :  { %1648 = vmatpush1.bf16.msra.mxu1 %v3077_v6  ;;  %v3085_v12 = vld [vmem:[#allocation2 + $0x64] ss:$16 sps:$4 sm:$0xff]   ;;  %v3089_v14 = vld [vmem:[#allocation2 + $0x60] ss:$16 sps:$4 sm:$0xff]  }
  0x2d   :  { %1689 = vmatpush1.bf16.msra.mxu0 %v3078_v7  ;;  %1649 = vmatprep.subr.bf16.mxu1 %v3079_v8  ;;  %v3087_v13 = vld [vmem:[#allocation2 + $0x264] ss:$16 sps:$4 sm:$0xff]   ;;  %v3090_v15 = vld [vmem:[#allocation2 + $0x260] ss:$16 sps:$4 sm:$0xff]   ;;  %v3707_v7 = vcombine.low %v56_v48, %v56_v48 }
  0x2e   :  { %1690 = vmatprep.subr.bf16.mxu0 %v3081_v9  ;;  %v3091_v16 = vld [vmem:[#allocation2 + $0x84] ss:$16 sps:$4 sm:$0xff]   ;;  %v3095_v18 = vld [vmem:[#allocation2 + $0x80] ss:$16 sps:$4 sm:$0xff]   ;;  %v3170_v9 = vld [vmem:[#allocation2 + $0x8] ss:$16 sps:$4 sm:$0xff]  }
  0x2f   :  { %v3093_v17 = vld [vmem:[#allocation2 + $0x284] ss:$16 sps:$4 sm:$0xff]   ;;  %v3096_v19 = vld [vmem:[#allocation2 + $0x280] ss:$16 sps:$4 sm:$0xff]  }
  0x30   :  { %1650 = vmatpush1.bf16.msra.mxu1 %v3083_v10  ;;  %v3097_v20 = vld [vmem:[#allocation2 + $0xa4] ss:$16 sps:$4 sm:$0xff]   ;;  %v3101_v22 = vld [vmem:[#allocation2 + $0xa0] ss:$16 sps:$4 sm:$0xff]  }
  0x31   :  { %1691 = vmatpush1.bf16.msra.mxu0 %v3084_v11  ;;  %1651 = vmatprep.subr.bf16.mxu1 %v3085_v12  ;;  %v3099_v21 = vld [vmem:[#allocation2 + $0x2a4] ss:$16 sps:$4 sm:$0xff]   ;;  %v3102_v23 = vld [vmem:[#allocation2 + $0x2a0] ss:$16 sps:$4 sm:$0xff]   ;;  %v3178_v11 = vld [vmem:[#allocation2 + $0x2c] ss:$16 sps:$4 sm:$0xff]  }
  0x32   :  { %1692 = vmatprep.subr.bf16.mxu0 %v3087_v13  ;;  %v3103_v24 = vld [vmem:[#allocation2 + $0xc4] ss:$16 sps:$4 sm:$0xff]   ;;  %v3107_v26 = vld [vmem:[#allocation2 + $0xc0] ss:$16 sps:$4 sm:$0xff]   ;;  %v3176_v13 = vld [vmem:[#allocation2 + $0x28] ss:$16 sps:$4 sm:$0xff]  }
  0x33   :  { %v3105_v25 = vld [vmem:[#allocation2 + $0x2c4] ss:$16 sps:$4 sm:$0xff]   ;;  %v3108_v27 = vld [vmem:[#allocation2 + $0x2c0] ss:$16 sps:$4 sm:$0xff]  }
  0x34   :  { %1652 = vmatpush1.bf16.msra.mxu1 %v3089_v14  ;;  %v3109_v28 = vld [vmem:[#allocation2 + $0xe4] ss:$16 sps:$4 sm:$0xff]   ;;  %v3113_v30 = vld [vmem:[#allocation2 + $0xe0] ss:$16 sps:$4 sm:$0xff]  }
  0x35   :  { %1693 = vmatpush1.bf16.msra.mxu0 %v3090_v15  ;;  %1653 = vmatprep.subr.bf16.mxu1 %v3091_v16  ;;  %v3111_v29 = vld [vmem:[#allocation2 + $0x2e4] ss:$16 sps:$4 sm:$0xff]   ;;  %v3114_v31 = vld [vmem:[#allocation2 + $0x2e0] ss:$16 sps:$4 sm:$0xff]   ;;  %v3184_v15 = vld [vmem:[#allocation2 + $0x4c] ss:$16 sps:$4 sm:$0xff]  }
  0x36   :  { %1694 = vmatprep.subr.bf16.mxu0 %v3093_v17  ;;  %v3115_v32 = vld [vmem:[#allocation2 + $0x104] ss:$16 sps:$4 sm:$0xff]   ;;  %v3119_v34 = vld [vmem:[#allocation2 + $0x100] ss:$16 sps:$4 sm:$0xff]   ;;  %v3182_v17 = vld [vmem:[#allocation2 + $0x48] ss:$16 sps:$4 sm:$0xff]  }
  0x37   :  { %v3117_v33 = vld [vmem:[#allocation2 + $0x304] ss:$16 sps:$4 sm:$0xff]   ;;  %v3120_v35 = vld [vmem:[#allocation2 + $0x300] ss:$16 sps:$4 sm:$0xff]  }
  0x38   :  { %1654 = vmatpush1.bf16.msra.mxu1 %v3095_v18  ;;  %v3121_v36 = vld [vmem:[#allocation2 + $0x124] ss:$16 sps:$4 sm:$0xff]   ;;  %v3125_v38 = vld [vmem:[#allocation2 + $0x120] ss:$16 sps:$4 sm:$0xff]  }
  0x39   :  { %1695 = vmatpush1.bf16.msra.mxu0 %v3096_v19  ;;  %1655 = vmatprep.subr.bf16.mxu1 %v3097_v20  ;;  %v3123_v37 = vld [vmem:[#allocation2 + $0x324] ss:$16 sps:$4 sm:$0xff]   ;;  %v3126_v39 = vld [vmem:[#allocation2 + $0x320] ss:$16 sps:$4 sm:$0xff]   ;;  %v3190_v19 = vld [vmem:[#allocation2 + $0x6c] ss:$16 sps:$4 sm:$0xff]  }
  0x3a   :  { %1696 = vmatprep.subr.bf16.mxu0 %v3099_v21  ;;  %v3127_v40 = vld [vmem:[#allocation2 + $0x144] ss:$16 sps:$4 sm:$0xff]   ;;  %v3131_v42 = vld [vmem:[#allocation2 + $0x140] ss:$16 sps:$4 sm:$0xff]   ;;  %v3188_v21 = vld [vmem:[#allocation2 + $0x68] ss:$16 sps:$4 sm:$0xff]  }
  0x3b   :  { %v3129_v41 = vld [vmem:[#allocation2 + $0x344] ss:$16 sps:$4 sm:$0xff]   ;;  %v3132_v43 = vld [vmem:[#allocation2 + $0x340] ss:$16 sps:$4 sm:$0xff]  }
  0x3c   :  { %1656 = vmatpush1.bf16.msra.mxu1 %v3101_v22  ;;  %v3133_v44 = vld [vmem:[#allocation2 + $0x164] ss:$16 sps:$4 sm:$0xff]   ;;  %v3137_v49 = vld [vmem:[#allocation2 + $0x160] ss:$16 sps:$4 sm:$0xff]  }
  0x3d   :  { %1697 = vmatpush1.bf16.msra.mxu0 %v3102_v23  ;;  %1657 = vmatprep.subr.bf16.mxu1 %v3103_v24  ;;  %v3135_v45 = vld [vmem:[#allocation2 + $0x364] ss:$16 sps:$4 sm:$0xff]   ;;  %v3138_v50 = vld [vmem:[#allocation2 + $0x360] ss:$16 sps:$4 sm:$0xff]   ;;  %v3196_v23 = vld [vmem:[#allocation2 + $0x8c] ss:$16 sps:$4 sm:$0xff]  }
  0x3e   :  { %1698 = vmatprep.subr.bf16.mxu0 %v3105_v25  ;;  %v55_v46 = vld [vmem:[%s3829_s0] sm:$0xff]  ;;  %v3194_v25 = vld [vmem:[#allocation2 + $0x88] ss:$16 sps:$4 sm:$0xff]  }
  0x3f   :  { %v3696_v47 = vcombine.high %v55_v46, %v55_v46  ;;  %v3139_v52 = vld [vmem:[#allocation2 + $0x184] ss:$16 sps:$4 sm:$0xff]   ;;  %v3143_v54 = vld [vmem:[#allocation2 + $0x180] ss:$16 sps:$4 sm:$0xff]   ;;  %v3705_v6 = vcombine.low %v55_v46, %v55_v46 }
  0x40   :  { %1658 = vmatpush1.bf16.msra.mxu1 %v3107_v26  ;;  %v3141_v53 = vld [vmem:[#allocation2 + $0x384] ss:$16 sps:$4 sm:$0xff]   ;;  %v3144_v55 = vld [vmem:[#allocation2 + $0x380] ss:$16 sps:$4 sm:$0xff]  }
  0x41   :  { %1699 = vmatpush1.bf16.msra.mxu0 %v3108_v27  ;;  %1659 = vmatprep.subr.bf16.mxu1 %v3109_v28  ;;  %v3145_v56 = vld [vmem:[#allocation2 + $0x1a4] ss:$16 sps:$4 sm:$0xff]   ;;  %v3149_v58 = vld [vmem:[#allocation2 + $0x1a0] ss:$16 sps:$4 sm:$0xff]   ;;  %v3202_v27 = vld [vmem:[#allocation2 + $0xac] ss:$16 sps:$4 sm:$0xff]  }
  0x42   :  { %1700 = vmatprep.subr.bf16.mxu0 %v3111_v29  ;;  %1677 = vmatprep.mubr.bf16.mxu1 %v3696_v47  ;;  %v3147_v57 = vld [vmem:[#allocation2 + $0x3a4] ss:$16 sps:$4 sm:$0xff]   ;;  %v3150_v59 = vld [vmem:[#allocation2 + $0x3a0] ss:$16 sps:$4 sm:$0xff]   ;;  %v3200_v29 = vld [vmem:[#allocation2 + $0xa8] ss:$16 sps:$4 sm:$0xff]  }
  0x43   :  { %v3151_v60 = vld [vmem:[#allocation2 + $0x1c4] ss:$16 sps:$4 sm:$0xff]   ;;  %v3155_v62 = vld [vmem:[#allocation2 + $0x1c0] ss:$16 sps:$4 sm:$0xff]  }
  0x44   :  { %1660 = vmatpush1.bf16.msra.mxu1 %v3113_v30  ;;  %v3153_v61 = vld [vmem:[#allocation2 + $0x3c4] ss:$16 sps:$4 sm:$0xff]   ;;  %v3156_v63 = vld [vmem:[#allocation2 + $0x3c0] ss:$16 sps:$4 sm:$0xff]  }
  0x45   :  { %1701 = vmatpush1.bf16.msra.mxu0 %v3114_v31  ;;  %1661 = vmatprep.subr.bf16.mxu1 %v3115_v32  ;;  %v3157_v0 = vld [vmem:[#allocation2 + $0x1e4] ss:$16 sps:$4 sm:$0xff]   ;;  %v3161_v2 = vld [vmem:[#allocation2 + $0x1e0] ss:$16 sps:$4 sm:$0xff]   ;;  %v3208_v31 = vld [vmem:[#allocation2 + $0xcc] ss:$16 sps:$4 sm:$0xff]  }
  0x46   :  { %1702 = vmatprep.subr.bf16.mxu0 %v3117_v33  ;;  %v3159_v1 = vld [vmem:[#allocation2 + $0x3e4] ss:$16 sps:$4 sm:$0xff]   ;;  %v3162_v3 = vld [vmem:[#allocation2 + $0x3e0] ss:$16 sps:$4 sm:$0xff]  }
  0x47   :  { %v3169_v4 = vld [vmem:[#allocation2 + $0x404] ss:$16 sps:$4 sm:$0xff]   ;;  %v3167_v8 = vld [vmem:[#allocation2 + $0x400] ss:$16 sps:$4 sm:$0xff]  }
  0x48   :  { %1662 = vmatpush1.bf16.msra.mxu1 %v3119_v34  ;;  %v3175_v10 = vld [vmem:[#allocation2 + $0x424] ss:$16 sps:$4 sm:$0xff]   ;;  %v3173_v12 = vld [vmem:[#allocation2 + $0x420] ss:$16 sps:$4 sm:$0xff]  }
  0x49   :  { %1703 = vmatpush1.bf16.msra.mxu0 %v3120_v35  ;;  %1663 = vmatprep.subr.bf16.mxu1 %v3121_v36  ;;  %v3181_v14 = vld [vmem:[#allocation2 + $0x444] ss:$16 sps:$4 sm:$0xff]   ;;  %v3179_v16 = vld [vmem:[#allocation2 + $0x440] ss:$16 sps:$4 sm:$0xff]   ;;  %v3206_v35 = vld [vmem:[#allocation2 + $0xc8] ss:$16 sps:$4 sm:$0xff]  }
  0x4a   :  { %1704 = vmatprep.subr.bf16.mxu0 %v3123_v37  ;;  %v3187_v18 = vld [vmem:[#allocation2 + $0x464] ss:$16 sps:$4 sm:$0xff]   ;;  %v3185_v20 = vld [vmem:[#allocation2 + $0x460] ss:$16 sps:$4 sm:$0xff]   ;;  %v3214_v37 = vld [vmem:[#allocation2 + $0xec] ss:$16 sps:$4 sm:$0xff]  }
  0x4b   :  { %v3193_v22 = vld [vmem:[#allocation2 + $0x484] ss:$16 sps:$4 sm:$0xff]   ;;  %v3191_v24 = vld [vmem:[#allocation2 + $0x480] ss:$16 sps:$4 sm:$0xff]  }
  0x4c   :  { %1664 = vmatpush1.bf16.msra.mxu1 %v3125_v38  ;;  %v3199_v26 = vld [vmem:[#allocation2 + $0x4a4] ss:$16 sps:$4 sm:$0xff]   ;;  %v3197_v28 = vld [vmem:[#allocation2 + $0x4a0] ss:$16 sps:$4 sm:$0xff]  }
  0x4d   :  { %1705 = vmatpush1.bf16.msra.mxu0 %v3126_v39  ;;  %1665 = vmatprep.subr.bf16.mxu1 %v3127_v40  ;;  %v3205_v30 = vld [vmem:[#allocation2 + $0x4c4] ss:$16 sps:$4 sm:$0xff]   ;;  %v3203_v33 = vld [vmem:[#allocation2 + $0x4c0] ss:$16 sps:$4 sm:$0xff]   ;;  %v3212_v39 = vld [vmem:[#allocation2 + $0xe8] ss:$16 sps:$4 sm:$0xff]  }
  0x4e   :  { %1706 = vmatprep.subr.bf16.mxu0 %v3129_v41  ;;  %v3715_v32 = vld [vmem:[%s3829_s0 + $0x10] sm:$0xff]  ;;  %v3220_v41 = vld [vmem:[#allocation2 + $0x10c] ss:$16 sps:$4 sm:$0xff]  }
  0x4f   :  { %v3719_v34 = vcombine.high %v3715_v32, %v3715_v32  ;;  %v3211_v36 = vld [vmem:[#allocation2 + $0x4e4] ss:$16 sps:$4 sm:$0xff]   ;;  %v3209_v38 = vld [vmem:[#allocation2 + $0x4e0] ss:$16 sps:$4 sm:$0xff]  }
  0x50   :  { %1666 = vmatpush1.bf16.msra.mxu1 %v3131_v42  ;;  %v3217_v40 = vld [vmem:[#allocation2 + $0x504] ss:$16 sps:$4 sm:$0xff]   ;;  %v3215_v42 = vld [vmem:[#allocation2 + $0x500] ss:$16 sps:$4 sm:$0xff]  }
  0x51   :  { %1707 = vmatpush1.bf16.msra.mxu0 %v3132_v43  ;;  %1667 = vmatprep.subr.bf16.mxu1 %v3133_v44  ;;  %v3218_v43 = vld [vmem:[#allocation2 + $0x108] ss:$16 sps:$4 sm:$0xff]   ;;  %v3223_v44 = vld [vmem:[#allocation2 + $0x524] ss:$16 sps:$4 sm:$0xff]   ;;  %v3221_v46 = vld [vmem:[#allocation2 + $0x520] ss:$16 sps:$4 sm:$0xff]  }
  0x52   :  { %1708 = vmatprep.subr.bf16.mxu0 %v3135_v45  ;;  %v3226_v45 = vld [vmem:[#allocation2 + $0x12c] ss:$16 sps:$4 sm:$0xff]   ;;  %v3229_v48 = vld [vmem:[#allocation2 + $0x544] ss:$16 sps:$4 sm:$0xff]  }
  0x54   :  { %1668 = vmatpush1.bf16.msra.mxu1 %v3137_v49  ;;  %v3232_v49 = vld [vmem:[#allocation2 + $0x14c] ss:$16 sps:$4 sm:$0xff]  }
  0x55   :  { %1709 = vmatpush1.bf16.msra.mxu0 %v3138_v50  ;;  %1669 = vmatprep.subr.bf16.mxu1 %v3139_v52  ;;  %v3227_v50 = vld [vmem:[#allocation2 + $0x540] ss:$16 sps:$4 sm:$0xff]   ;;  %v3230_v52 = vld [vmem:[#allocation2 + $0x148] ss:$16 sps:$4 sm:$0xff]  }
  0x56   :  { %1710 = vmatprep.subr.bf16.mxu0 %v3141_v53  ;;  %v3235_v53 = vld [vmem:[#allocation2 + $0x564] ss:$16 sps:$4 sm:$0xff]  }
  0x58   :  { %1670 = vmatpush1.bf16.msra.mxu1 %v3143_v54  ;;  %v3238_v54 = vld [vmem:[#allocation2 + $0x16c] ss:$16 sps:$4 sm:$0xff]  }
  0x59   :  { %1711 = vmatpush1.bf16.msra.mxu0 %v3144_v55  ;;  %1671 = vmatprep.subr.bf16.mxu1 %v3145_v56  ;;  %v3233_v55 = vld [vmem:[#allocation2 + $0x560] ss:$16 sps:$4 sm:$0xff]   ;;  %v3236_v56 = vld [vmem:[#allocation2 + $0x168] ss:$16 sps:$4 sm:$0xff]  }
  0x5a   :  { %1712 = vmatprep.subr.bf16.mxu0 %v3147_v57  ;;  %v3241_v57 = vld [vmem:[#allocation2 + $0x584] ss:$16 sps:$4 sm:$0xff]  }
  0x5c   :  { %1672 = vmatpush1.bf16.msra.mxu1 %v3149_v58  ;;  %v3244_v58 = vld [vmem:[#allocation2 + $0x18c] ss:$16 sps:$4 sm:$0xff]  }
  0x5d   :  { %1713 = vmatpush1.bf16.msra.mxu0 %v3150_v59  ;;  %1673 = vmatprep.subr.bf16.mxu1 %v3151_v60  ;;  %v3239_v59 = vld [vmem:[#allocation2 + $0x580] ss:$16 sps:$4 sm:$0xff]   ;;  %v3242_v60 = vld [vmem:[#allocation2 + $0x188] ss:$16 sps:$4 sm:$0xff]  }
  0x5e   :  { %1714 = vmatprep.subr.bf16.mxu0 %v3153_v61  ;;  %v3247_v61 = vld [vmem:[#allocation2 + $0x5a4] ss:$16 sps:$4 sm:$0xff]  }
  0x60   :  { %1674 = vmatpush1.bf16.msra.mxu1 %v3155_v62  ;;  %v3250_v62 = vld [vmem:[#allocation2 + $0x1ac] ss:$16 sps:$4 sm:$0xff]  }
  0x61   :  { %1715 = vmatpush1.bf16.msra.mxu0 %v3156_v63  ;;  %1675 = vmatprep.subr.bf16.mxu1 %v3157_v0  ;;  %v3245_v63 = vld [vmem:[#allocation2 + $0x5a0] ss:$16 sps:$4 sm:$0xff]   ;;  %v3248_v0 = vld [vmem:[#allocation2 + $0x1a8] ss:$16 sps:$4 sm:$0xff]  }
  0x62   :  { %1716 = vmatprep.subr.bf16.mxu0 %v3159_v1  ;;  %v3253_v1 = vld [vmem:[#allocation2 + $0x5c4] ss:$16 sps:$4 sm:$0xff]  }
  0x64   :  { %1676 = vmatpush1.bf16.msra.mxu1 %v3161_v2  ;;  %v3256_v2 = vld [vmem:[#allocation2 + $0x1cc] ss:$16 sps:$4 sm:$0xff]  }
  0x65   :  { %1717 = vmatpush1.bf16.msra.mxu0 %v3162_v3  ;;  %1809 = vmatprep.subr.bf16.mxu1 %v3172_v5  ;;  %v3251_v3 = vld [vmem:[#allocation2 + $0x5c0] ss:$16 sps:$4 sm:$0xff]   ;;  %v3259_v5 = vld [vmem:[#allocation2 + $0x5e4] ss:$16 sps:$4 sm:$0xff]  }
  0x66   :  { %1727 = vmatprep.subr.bf16.mxu0 %v3169_v4  ;;  %v3254_v4 = vld [vmem:[#allocation2 + $0x1c8] ss:$16 sps:$4 sm:$0xff]  }
  0x67   :  { %1678 = vmatmul.mubr.bf16.vlgmr.msra.gmra.mrb[0].mxu1 %v3705_v6 }
  0x68   :  { %1719 = vmatmul.mubr.bf16.vlgmr.msra.gmra.mrb[0].mxu0 %v3707_v7  ;;  %1810 = vmatpush1.bf16.msra.mxu1 %v3170_v9  ;;  %v3257_v9 = vld [vmem:[#allocation2 + $0x5e0] ss:$16 sps:$4 sm:$0xff]  }
  0x69   :  { %1728 = vmatpush1.bf16.msra.mxu0 %v3167_v8  ;;  %1811 = vmatprep.subr.bf16.mxu1 %v3178_v11  ;;  %v3262_v8 = vld [vmem:[#allocation2 + $0x1ec] ss:$16 sps:$4 sm:$0xff]   ;;  %v3267_v11 = vld [vmem:[#allocation2 + $0x604] ss:$16 sps:$4 sm:$0xff]  }
  0x6a   :  { %1729 = vmatprep.subr.bf16.mxu0 %v3175_v10  ;;  %1841 = vmatprep.mubr.bf16.mxu1 %v3696_v47  ;;  %v3224_v47 = vld [vmem:[#allocation2 + $0x128] ss:$16 sps:$4 sm:$0xff]  }
  0x6b   :  { %1759 = vmatprep.mubr.bf16.mxu0 %v3719_v34  ;;  %v3260_v10 = vld [vmem:[#allocation2 + $0x1e8] ss:$16 sps:$4 sm:$0xff]  }
  0x6c   :  { %1812 = vmatpush1.bf16.msra.mxu1 %v3176_v13  ;;  %v3724_v13 = vcombine.low %v3715_v32, %v3715_v32  ;;  %v3292_v32 = vld [vmem:[#allocation2 + $0x288] ss:$16 sps:$4 sm:$0xff]  }
  0x6d   :  { %1730 = vmatpush1.bf16.msra.mxu0 %v3173_v12  ;;  %1813 = vmatprep.subr.bf16.mxu1 %v3184_v15  ;;  %v3270_v12 = vld [vmem:[#allocation2 + $0x20c] ss:$16 sps:$4 sm:$0xff]   ;;  %v3268_v15 = vld [vmem:[#allocation2 + $0x208] ss:$16 sps:$4 sm:$0xff]  }
  0x6e   :  { %1731 = vmatprep.subr.bf16.mxu0 %v3181_v14  ;;  %v3265_v14 = vld [vmem:[#allocation2 + $0x600] ss:$16 sps:$4 sm:$0xff]  }
  0x70   :  { %1814 = vmatpush1.bf16.msra.mxu1 %v3182_v17  ;;  %v3276_v17 = vld [vmem:[#allocation2 + $0x22c] ss:$16 sps:$4 sm:$0xff]  }
  0x71   :  { %1732 = vmatpush1.bf16.msra.mxu0 %v3179_v16  ;;  %1815 = vmatprep.subr.bf16.mxu1 %v3190_v19  ;;  %v3273_v16 = vld [vmem:[#allocation2 + $0x624] ss:$16 sps:$4 sm:$0xff]  }
  0x72   :  { %1733 = vmatprep.subr.bf16.mxu0 %v3187_v18  ;;  %v3729_v18 = vld [vmem:[%s3829_s0 + $0x18] sm:$0xff] }
  0x73   :  { %v3733_v19 = vcombine.high %v3729_v18, %v3729_v18 }
  0x74   :  { %1816 = vmatpush1.bf16.msra.mxu1 %v3188_v21  ;;  %v3274_v21 = vld [vmem:[#allocation2 + $0x228] ss:$16 sps:$4 sm:$0xff]  }
  0x75   :  { %1734 = vmatpush1.bf16.msra.mxu0 %v3185_v20  ;;  %1817 = vmatprep.subr.bf16.mxu1 %v3196_v23  ;;  %v3271_v20 = vld [vmem:[#allocation2 + $0x620] ss:$16 sps:$4 sm:$0xff]   ;;  %v3282_v23 = vld [vmem:[#allocation2 + $0x24c] ss:$16 sps:$4 sm:$0xff]  }
  0x76   :  { %1735 = vmatprep.subr.bf16.mxu0 %v3193_v22  ;;  %v3279_v22 = vld [vmem:[#allocation2 + $0x644] ss:$16 sps:$4 sm:$0xff]  }
  0x78   :  { %1818 = vmatpush1.bf16.msra.mxu1 %v3194_v25  ;;  %v3280_v25 = vld [vmem:[#allocation2 + $0x248] ss:$16 sps:$4 sm:$0xff]  }
  0x79   :  { %1736 = vmatpush1.bf16.msra.mxu0 %v3191_v24  ;;  %1819 = vmatprep.subr.bf16.mxu1 %v3202_v27  ;;  %v3277_v24 = vld [vmem:[#allocation2 + $0x640] ss:$16 sps:$4 sm:$0xff]  }
  0x7a   :  { %1737 = vmatprep.subr.bf16.mxu0 %v3199_v26  ;;  %v3285_v26 = vld [vmem:[#allocation2 + $0x664] ss:$16 sps:$4 sm:$0xff]   ;;  %v3283_v27 = vld [vmem:[#allocation2 + $0x660] ss:$16 sps:$4 sm:$0xff]  }
  0x7c   :  { %1820 = vmatpush1.bf16.msra.mxu1 %v3200_v29  ;;  %v3291_v29 = vld [vmem:[#allocation2 + $0x684] ss:$16 sps:$4 sm:$0xff]  }
  0x7d   :  { %1738 = vmatpush1.bf16.msra.mxu0 %v3197_v28  ;;  %1821 = vmatprep.subr.bf16.mxu1 %v3208_v31  ;;  %v3286_v28 = vld [vmem:[#allocation2 + $0x268] ss:$16 sps:$4 sm:$0xff]   ;;  %v3289_v31 = vld [vmem:[#allocation2 + $0x680] ss:$16 sps:$4 sm:$0xff]  }
  0x7e   :  { %1739 = vmatprep.subr.bf16.mxu0 %v3205_v30  ;;  %v3294_v30 = vld [vmem:[#allocation2 + $0x28c] ss:$16 sps:$4 sm:$0xff]  }
  0x80   :  { %1822 = vmatpush1.bf16.msra.mxu1 %v3206_v35  ;;  %v3295_v35 = vld [vmem:[#allocation2 + $0x6a0] ss:$16 sps:$4 sm:$0xff]  }
  0x81   :  { %1740 = vmatpush1.bf16.msra.mxu0 %v3203_v33  ;;  %1823 = vmatprep.subr.bf16.mxu1 %v3214_v37  ;;  %v3300_v33 = vld [vmem:[#allocation2 + $0x2ac] ss:$16 sps:$4 sm:$0xff]   ;;  %v3303_v37 = vld [vmem:[#allocation2 + $0x6c4] ss:$16 sps:$4 sm:$0xff]  }
  0x82   :  { %1741 = vmatprep.subr.bf16.mxu0 %v3211_v36  ;;  %v3298_v36 = vld [vmem:[#allocation2 + $0x2a8] ss:$16 sps:$4 sm:$0xff]  }
  0x84   :  { %1824 = vmatpush1.bf16.msra.mxu1 %v3212_v39  ;;  %v3301_v39 = vld [vmem:[#allocation2 + $0x6c0] ss:$16 sps:$4 sm:$0xff]  }
  0x85   :  { %1742 = vmatpush1.bf16.msra.mxu0 %v3209_v38  ;;  %1825 = vmatprep.subr.bf16.mxu1 %v3220_v41  ;;  %v3306_v38 = vld [vmem:[#allocation2 + $0x2cc] ss:$16 sps:$4 sm:$0xff]   ;;  %v3309_v41 = vld [vmem:[#allocation2 + $0x6e4] ss:$16 sps:$4 sm:$0xff]  }
  0x86   :  { %1743 = vmatprep.subr.bf16.mxu0 %v3217_v40  ;;  %v3304_v40 = vld [vmem:[#allocation2 + $0x2c8] ss:$16 sps:$4 sm:$0xff]  }
  0x88   :  { %1826 = vmatpush1.bf16.msra.mxu1 %v3218_v43  ;;  %v3307_v43 = vld [vmem:[#allocation2 + $0x6e0] ss:$16 sps:$4 sm:$0xff]  }
  0x89   :  { %1744 = vmatpush1.bf16.msra.mxu0 %v3215_v42  ;;  %1827 = vmatprep.subr.bf16.mxu1 %v3226_v45  ;;  %v3312_v42 = vld [vmem:[#allocation2 + $0x2ec] ss:$16 sps:$4 sm:$0xff]   ;;  %v3315_v45 = vld [vmem:[#allocation2 + $0x704] ss:$16 sps:$4 sm:$0xff]  }
  0x8a   :  { %1745 = vmatprep.subr.bf16.mxu0 %v3223_v44  ;;  %v3310_v44 = vld [vmem:[#allocation2 + $0x2e8] ss:$16 sps:$4 sm:$0xff]  }
  0x8c   :  { %1828 = vmatpush1.bf16.msra.mxu1 %v3224_v47  ;;  %v3313_v47 = vld [vmem:[#allocation2 + $0x700] ss:$16 sps:$4 sm:$0xff]  }
  0x8d   :  { %1746 = vmatpush1.bf16.msra.mxu0 %v3221_v46  ;;  %1829 = vmatprep.subr.bf16.mxu1 %v3232_v49  ;;  %v3318_v46 = vld [vmem:[#allocation2 + $0x30c] ss:$16 sps:$4 sm:$0xff]   ;;  %v3321_v49 = vld [vmem:[#allocation2 + $0x724] ss:$16 sps:$4 sm:$0xff]  }
  0x8e   :  { %1747 = vmatprep.subr.bf16.mxu0 %v3229_v48  ;;  %v3316_v48 = vld [vmem:[#allocation2 + $0x308] ss:$16 sps:$4 sm:$0xff]  }
  0x90   :  { %1830 = vmatpush1.bf16.msra.mxu1 %v3230_v52  ;;  %v3319_v52 = vld [vmem:[#allocation2 + $0x720] ss:$16 sps:$4 sm:$0xff]  }
  0x91   :  { %1748 = vmatpush1.bf16.msra.mxu0 %v3227_v50  ;;  %1831 = vmatprep.subr.bf16.mxu1 %v3238_v54  ;;  %v3324_v50 = vld [vmem:[#allocation2 + $0x32c] ss:$16 sps:$4 sm:$0xff]   ;;  %v3327_v54 = vld [vmem:[#allocation2 + $0x744] ss:$16 sps:$4 sm:$0xff]  }
  0x92   :  { %1749 = vmatprep.subr.bf16.mxu0 %v3235_v53  ;;  %v3322_v53 = vld [vmem:[#allocation2 + $0x328] ss:$16 sps:$4 sm:$0xff]  }
  0x94   :  { %1832 = vmatpush1.bf16.msra.mxu1 %v3236_v56  ;;  %v3325_v56 = vld [vmem:[#allocation2 + $0x740] ss:$16 sps:$4 sm:$0xff]  }
  0x95   :  { %1750 = vmatpush1.bf16.msra.mxu0 %v3233_v55  ;;  %1833 = vmatprep.subr.bf16.mxu1 %v3244_v58  ;;  %v3330_v55 = vld [vmem:[#allocation2 + $0x34c] ss:$16 sps:$4 sm:$0xff]   ;;  %v3333_v58 = vld [vmem:[#allocation2 + $0x764] ss:$16 sps:$4 sm:$0xff]  }
  0x96   :  { %1751 = vmatprep.subr.bf16.mxu0 %v3241_v57  ;;  %v3328_v57 = vld [vmem:[#allocation2 + $0x348] ss:$16 sps:$4 sm:$0xff]  }
  0x98   :  { %1834 = vmatpush1.bf16.msra.mxu1 %v3242_v60  ;;  %v3331_v60 = vld [vmem:[#allocation2 + $0x760] ss:$16 sps:$4 sm:$0xff]  }
  0x99   :  { %1752 = vmatpush1.bf16.msra.mxu0 %v3239_v59  ;;  %1835 = vmatprep.subr.bf16.mxu1 %v3250_v62  ;;  %v3336_v59 = vld [vmem:[#allocation2 + $0x36c] ss:$16 sps:$4 sm:$0xff]   ;;  %v3339_v62 = vld [vmem:[#allocation2 + $0x784] ss:$16 sps:$4 sm:$0xff]  }
  0x9a   :  { %1753 = vmatprep.subr.bf16.mxu0 %v3247_v61  ;;  %v3334_v61 = vld [vmem:[#allocation2 + $0x368] ss:$16 sps:$4 sm:$0xff]  }
  0x9c   :  { %1836 = vmatpush1.bf16.msra.mxu1 %v3248_v0  ;;  %v3337_v0 = vld [vmem:[#allocation2 + $0x780] ss:$16 sps:$4 sm:$0xff]  }
  0x9d   :  { %1754 = vmatpush1.bf16.msra.mxu0 %v3245_v63  ;;  %1837 = vmatprep.subr.bf16.mxu1 %v3256_v2  ;;  %v3342_v63 = vld [vmem:[#allocation2 + $0x38c] ss:$16 sps:$4 sm:$0xff]   ;;  %v3345_v2 = vld [vmem:[#allocation2 + $0x7a4] ss:$16 sps:$4 sm:$0xff]  }
  0x9e   :  { %1755 = vmatprep.subr.bf16.mxu0 %v3253_v1  ;;  %v3340_v1 = vld [vmem:[#allocation2 + $0x388] ss:$16 sps:$4 sm:$0xff]  }
  0xa0   :  { %1838 = vmatpush1.bf16.msra.mxu1 %v3254_v4  ;;  %v3343_v4 = vld [vmem:[#allocation2 + $0x7a0] ss:$16 sps:$4 sm:$0xff]  }
  0xa1   :  { %1756 = vmatpush1.bf16.msra.mxu0 %v3251_v3  ;;  %1839 = vmatprep.subr.bf16.mxu1 %v3262_v8  ;;  %v3348_v3 = vld [vmem:[#allocation2 + $0x3ac] ss:$16 sps:$4 sm:$0xff]   ;;  %v3351_v8 = vld [vmem:[#allocation2 + $0x7c4] ss:$16 sps:$4 sm:$0xff]  }
  0xa2   :  { %1757 = vmatprep.subr.bf16.mxu0 %v3259_v5  ;;  %v3346_v5 = vld [vmem:[#allocation2 + $0x3a8] ss:$16 sps:$4 sm:$0xff]  }
  0xa4   :  { %1840 = vmatpush1.bf16.msra.mxu1 %v3260_v10  ;;  %v3349_v10 = vld [vmem:[#allocation2 + $0x7c0] ss:$16 sps:$4 sm:$0xff]  }
  0xa5   :  { %1758 = vmatpush1.bf16.msra.mxu0 %v3257_v9  ;;  %1850 = vmatprep.subr.bf16.mxu1 %v3270_v12  ;;  %v3354_v9 = vld [vmem:[#allocation2 + $0x3cc] ss:$16 sps:$4 sm:$0xff]   ;;  %v3357_v12 = vld [vmem:[#allocation2 + $0x7e4] ss:$16 sps:$4 sm:$0xff]  }
  0xa6   :  { %1768 = vmatprep.subr.bf16.mxu0 %v3267_v11  ;;  %v3352_v11 = vld [vmem:[#allocation2 + $0x3c8] ss:$16 sps:$4 sm:$0xff]  }
  0xa7   :  { %1842 = vmatmul.mubr.bf16.vlgmr.msra.gmra.mrb[4].mxu1 %v3705_v6  ;;  %v3288_v6 = vld [vmem:[#allocation2 + $0x26c] ss:$16 sps:$4 sm:$0xff]  }
  0xa8   :  { %1760 = vmatmul.mubr.bf16.vlgmr.msra.gmra.mrb[0].mxu0 %v3724_v13  ;;  %1851 = vmatpush1.bf16.msra.mxu1 %v3268_v15  ;;  %v3355_v15 = vld [vmem:[#allocation2 + $0x7e0] ss:$16 sps:$4 sm:$0xff]  }
  0xa9   :  { %1769 = vmatpush1.bf16.msra.mxu0 %v3265_v14  ;;  %1852 = vmatprep.subr.bf16.mxu1 %v3276_v17  ;;  %v3360_v14 = vld [vmem:[#allocation2 + $0x3ec] ss:$16 sps:$4 sm:$0xff]  }
  0xaa   :  { %1770 = vmatprep.subr.bf16.mxu0 %v3273_v16  ;;  %1800 = vmatprep.mubr.bf16.mxu0 %v3733_v19  ;;  %v3358_v16 = vld [vmem:[#allocation2 + $0x3e8] ss:$16 sps:$4 sm:$0xff]   ;;  %v3365_v17 = vld [vmem:[#allocation2 + $0x40c] ss:$16 sps:$4 sm:$0xff]  }
  0xab   :  { %1882 = vmatprep.mubr.bf16.mxu1 %v3701_v51  ;;  %v3297_v51 = vld [vmem:[#allocation2 + $0x6a4] ss:$16 sps:$4 sm:$0xff]  }
  0xac   :  { %1853 = vmatpush1.bf16.msra.mxu1 %v3274_v21  ;;  %v3741_v21 = vcombine.low %v3729_v18, %v3729_v18  ;;  %v3462_v18 = vld [vmem:[#allocation4 + $0x10] ss:$8 sps:$4 sm:$0xff]  }
  0xad   :  { %1771 = vmatpush1.bf16.msra.mxu0 %v3271_v20  ;;  %1854 = vmatprep.subr.bf16.mxu1 %v3282_v23  ;;  %v3363_v20 = vld [vmem:[#allocation2 + $0x408] ss:$16 sps:$4 sm:$0xff]  }
  0xae   :  { %1772 = vmatprep.subr.bf16.mxu0 %v3279_v22  ;;  %v3368_v22 = vld [vmem:[#allocation2 + $0x42c] ss:$16 sps:$4 sm:$0xff]   ;;  %v3459_v23 = vld [vmem:[#allocation4] ss:$8 sps:$4 sm:$0xff]  }
  0xb0   :  { %1855 = vmatpush1.bf16.msra.mxu1 %v3280_v25  ;;  %v3366_v25 = vld [vmem:[#allocation2 + $0x428] ss:$16 sps:$4 sm:$0xff]  }
  0xb1   :  { %1773 = vmatpush1.bf16.msra.mxu0 %v3277_v24  ;;  %1856 = vmatprep.subr.bf16.mxu1 %v3288_v6  ;;  %v3461_v24 = vld [vmem:[#allocation4 + $0x4] ss:$8 sps:$4 sm:$0xff]  }
  0xb2   :  { %1774 = vmatprep.subr.bf16.mxu0 %v3285_v26  ;;  %v3464_v26 = vld [vmem:[#allocation4 + $0x14] ss:$8 sps:$4 sm:$0xff]  }
  0xb3   :  { %v3371_v6 = vld [vmem:[#allocation2 + $0x44c] ss:$16 sps:$4 sm:$0xff]  }
  0xb4   :  { %1857 = vmatpush1.bf16.msra.mxu1 %v3286_v28  ;;  %v3369_v28 = vld [vmem:[#allocation2 + $0x448] ss:$16 sps:$4 sm:$0xff]  }
  0xb5   :  { %1775 = vmatpush1.bf16.msra.mxu0 %v3283_v27  ;;  %1858 = vmatprep.subr.bf16.mxu1 %v3294_v30  ;;  %v3467_v27 = vld [vmem:[#allocation4 + $0x24] ss:$8 sps:$4 sm:$0xff]   ;;  %v3372_v30 = vld [vmem:[#allocation2 + $0x468] ss:$16 sps:$4 sm:$0xff]  }
  0xb6   :  { %1776 = vmatprep.subr.bf16.mxu0 %v3291_v29  ;;  %v3374_v29 = vld [vmem:[#allocation2 + $0x46c] ss:$16 sps:$4 sm:$0xff]  }
  0xb8   :  { %1859 = vmatpush1.bf16.msra.mxu1 %v3292_v32  ;;  %v3470_v32 = vld [vmem:[#allocation4 + $0x34] ss:$8 sps:$4 sm:$0xff]  }
  0xb9   :  { %1777 = vmatpush1.bf16.msra.mxu0 %v3289_v31  ;;  %1860 = vmatprep.subr.bf16.mxu1 %v3300_v33  ;;  %v3377_v31 = vld [vmem:[#allocation2 + $0x48c] ss:$16 sps:$4 sm:$0xff]   ;;  %v3375_v33 = vld [vmem:[#allocation2 + $0x488] ss:$16 sps:$4 sm:$0xff]  }
  0xba   :  { %1778 = vmatprep.subr.bf16.mxu0 %v3297_v51  ;;  %v3473_v51 = vld [vmem:[#allocation4 + $0x44] ss:$8 sps:$4 sm:$0xff]  }
  0xbc   :  { %1861 = vmatpush1.bf16.msra.mxu1 %v3298_v36  ;;  %v3471_v36 = vld [vmem:[#allocation4 + $0x40] ss:$8 sps:$4 sm:$0xff]  }
  0xbd   :  { %1779 = vmatpush1.bf16.msra.mxu0 %v3295_v35  ;;  %1862 = vmatprep.subr.bf16.mxu1 %v3306_v38  ;;  %v3380_v35 = vld [vmem:[#allocation2 + $0x4ac] ss:$16 sps:$4 sm:$0xff]   ;;  %v3378_v38 = vld [vmem:[#allocation2 + $0x4a8] ss:$16 sps:$4 sm:$0xff]  }
  0xbe   :  { %1780 = vmatprep.subr.bf16.mxu0 %v3303_v37  ;;  %v3476_v37 = vld [vmem:[#allocation4 + $0x54] ss:$8 sps:$4 sm:$0xff]  }
  0xc0   :  { %1863 = vmatpush1.bf16.msra.mxu1 %v3304_v40  ;;  %v3474_v40 = vld [vmem:[#allocation4 + $0x50] ss:$8 sps:$4 sm:$0xff]  }
  0xc1   :  { %1781 = vmatpush1.bf16.msra.mxu0 %v3301_v39  ;;  %1864 = vmatprep.subr.bf16.mxu1 %v3312_v42  ;;  %v3383_v39 = vld [vmem:[#allocation2 + $0x4cc] ss:$16 sps:$4 sm:$0xff]   ;;  %v3381_v42 = vld [vmem:[#allocation2 + $0x4c8] ss:$16 sps:$4 sm:$0xff]  }
  0xc2   :  { %1782 = vmatprep.subr.bf16.mxu0 %v3309_v41  ;;  %v3479_v41 = vld [vmem:[#allocation4 + $0x64] ss:$8 sps:$4 sm:$0xff]  }
  0xc4   :  { %1865 = vmatpush1.bf16.msra.mxu1 %v3310_v44  ;;  %v3477_v44 = vld [vmem:[#allocation4 + $0x60] ss:$8 sps:$4 sm:$0xff]  }
  0xc5   :  { %1783 = vmatpush1.bf16.msra.mxu0 %v3307_v43  ;;  %1866 = vmatprep.subr.bf16.mxu1 %v3318_v46  ;;  %v3386_v43 = vld [vmem:[#allocation2 + $0x4ec] ss:$16 sps:$4 sm:$0xff]   ;;  %v3384_v46 = vld [vmem:[#allocation2 + $0x4e8] ss:$16 sps:$4 sm:$0xff]  }
  0xc6   :  { %1784 = vmatprep.subr.bf16.mxu0 %v3315_v45  ;;  %v3482_v45 = vld [vmem:[#allocation4 + $0x74] ss:$8 sps:$4 sm:$0xff]  }
  0xc8   :  { %1867 = vmatpush1.bf16.msra.mxu1 %v3316_v48  ;;  %v3480_v48 = vld [vmem:[#allocation4 + $0x70] ss:$8 sps:$4 sm:$0xff]  }
  0xc9   :  { %1785 = vmatpush1.bf16.msra.mxu0 %v3313_v47  ;;  %1868 = vmatprep.subr.bf16.mxu1 %v3324_v50  ;;  %v3389_v47 = vld [vmem:[#allocation2 + $0x50c] ss:$16 sps:$4 sm:$0xff]   ;;  %v3387_v50 = vld [vmem:[#allocation2 + $0x508] ss:$16 sps:$4 sm:$0xff]  }
  0xca   :  { %1786 = vmatprep.subr.bf16.mxu0 %v3321_v49  ;;  %v3485_v49 = vld [vmem:[#allocation4 + $0x84] ss:$8 sps:$4 sm:$0xff]  }
  0xcc   :  { %1869 = vmatpush1.bf16.msra.mxu1 %v3322_v53  ;;  %v3483_v53 = vld [vmem:[#allocation4 + $0x80] ss:$8 sps:$4 sm:$0xff]  }
  0xcd   :  { %1787 = vmatpush1.bf16.msra.mxu0 %v3319_v52  ;;  %1870 = vmatprep.subr.bf16.mxu1 %v3330_v55  ;;  %v3392_v52 = vld [vmem:[#allocation2 + $0x52c] ss:$16 sps:$4 sm:$0xff]   ;;  %v3390_v55 = vld [vmem:[#allocation2 + $0x528] ss:$16 sps:$4 sm:$0xff]  }
  0xce   :  { %1788 = vmatprep.subr.bf16.mxu0 %v3327_v54  ;;  %v3488_v54 = vld [vmem:[#allocation4 + $0x94] ss:$8 sps:$4 sm:$0xff]  }
  0xd0   :  { %1871 = vmatpush1.bf16.msra.mxu1 %v3328_v57  ;;  %v3486_v57 = vld [vmem:[#allocation4 + $0x90] ss:$8 sps:$4 sm:$0xff]  }
  0xd1   :  { %1789 = vmatpush1.bf16.msra.mxu0 %v3325_v56  ;;  %1872 = vmatprep.subr.bf16.mxu1 %v3336_v59  ;;  %v3395_v56 = vld [vmem:[#allocation2 + $0x54c] ss:$16 sps:$4 sm:$0xff]   ;;  %v3393_v59 = vld [vmem:[#allocation2 + $0x548] ss:$16 sps:$4 sm:$0xff]  }
  0xd2   :  { %1790 = vmatprep.subr.bf16.mxu0 %v3333_v58  ;;  %v3491_v58 = vld [vmem:[#allocation4 + $0xa4] ss:$8 sps:$4 sm:$0xff]  }
  0xd4   :  { %1873 = vmatpush1.bf16.msra.mxu1 %v3334_v61  ;;  %v3489_v61 = vld [vmem:[#allocation4 + $0xa0] ss:$8 sps:$4 sm:$0xff]  }
  0xd5   :  { %1791 = vmatpush1.bf16.msra.mxu0 %v3331_v60  ;;  %1874 = vmatprep.subr.bf16.mxu1 %v3342_v63  ;;  %v3398_v60 = vld [vmem:[#allocation2 + $0x56c] ss:$16 sps:$4 sm:$0xff]   ;;  %v3396_v63 = vld [vmem:[#allocation2 + $0x568] ss:$16 sps:$4 sm:$0xff]  }
  0xd6   :  { %1792 = vmatprep.subr.bf16.mxu0 %v3339_v62  ;;  %v3494_v62 = vld [vmem:[#allocation4 + $0xb4] ss:$8 sps:$4 sm:$0xff]  }
  0xd8   :  { %1875 = vmatpush1.bf16.msra.mxu1 %v3340_v1  ;;  %v3492_v1 = vld [vmem:[#allocation4 + $0xb0] ss:$8 sps:$4 sm:$0xff]  }
  0xd9   :  { %1793 = vmatpush1.bf16.msra.mxu0 %v3337_v0  ;;  %1876 = vmatprep.subr.bf16.mxu1 %v3348_v3  ;;  %v3401_v0 = vld [vmem:[#allocation2 + $0x58c] ss:$16 sps:$4 sm:$0xff]   ;;  %v3399_v3 = vld [vmem:[#allocation2 + $0x588] ss:$16 sps:$4 sm:$0xff]  }
  0xda   :  { %1794 = vmatprep.subr.bf16.mxu0 %v3345_v2  ;;  %v3497_v2 = vld [vmem:[#allocation4 + $0xc4] ss:$8 sps:$4 sm:$0xff]  }
  0xdc   :  { %1877 = vmatpush1.bf16.msra.mxu1 %v3346_v5  ;;  %v3495_v5 = vld [vmem:[#allocation4 + $0xc0] ss:$8 sps:$4 sm:$0xff]  }
  0xdd   :  { %1795 = vmatpush1.bf16.msra.mxu0 %v3343_v4  ;;  %1878 = vmatprep.subr.bf16.mxu1 %v3354_v9  ;;  %v3404_v4 = vld [vmem:[#allocation2 + $0x5ac] ss:$16 sps:$4 sm:$0xff]   ;;  %v3402_v9 = vld [vmem:[#allocation2 + $0x5a8] ss:$16 sps:$4 sm:$0xff]  }
  0xde   :  { %1796 = vmatprep.subr.bf16.mxu0 %v3351_v8  ;;  %v3500_v8 = vld [vmem:[#allocation4 + $0xd4] ss:$8 sps:$4 sm:$0xff]  }
  0xe0   :  { %1879 = vmatpush1.bf16.msra.mxu1 %v3352_v11  ;;  %v3498_v11 = vld [vmem:[#allocation4 + $0xd0] ss:$8 sps:$4 sm:$0xff]  }
  0xe1   :  { %1797 = vmatpush1.bf16.msra.mxu0 %v3349_v10  ;;  %1880 = vmatprep.subr.bf16.mxu1 %v3360_v14  ;;  %v3407_v10 = vld [vmem:[#allocation2 + $0x5cc] ss:$16 sps:$4 sm:$0xff]  }
  0xe2   :  { %1798 = vmatprep.subr.bf16.mxu0 %v3357_v12  ;;  %v3405_v12 = vld [vmem:[#allocation2 + $0x5c8] ss:$16 sps:$4 sm:$0xff]   ;;  %v3410_v14 = vld [vmem:[#allocation2 + $0x5ec] ss:$16 sps:$4 sm:$0xff]  }
  0xe4   :  { %1881 = vmatpush1.bf16.msra.mxu1 %v3358_v16  ;;  %v3413_v16 = vld [vmem:[#allocation2 + $0x60c] ss:$16 sps:$4 sm:$0xff]  }
  0xe5   :  { %1799 = vmatpush1.bf16.msra.mxu0 %v3355_v15  ;;  %1891 = vmatprep.subr.bf16.mxu1 %v3365_v17  ;;  %v3408_v15 = vld [vmem:[#allocation2 + $0x5e8] ss:$16 sps:$4 sm:$0xff]  }
  0xe6   :  { %2385 = vmatprep.subr.bf16.mxu0 %v3461_v24  ;;  %v3411_v17 = vld [vmem:[#allocation2 + $0x608] ss:$16 sps:$4 sm:$0xff]  }
  0xe7   :  { %1883 = vmatmul.mubr.bf16.vlgmr.msra.gmra.mrb[4].mxu1 %v3707_v7  ;;  %v3465_v7 = vld [vmem:[#allocation4 + $0x20] ss:$8 sps:$4 sm:$0xff]  }
  0xe8   :  { %1801 = vmatmul.mubr.bf16.vlgmr.msra.gmra.mrb[0].mxu0 %v3741_v21  ;;  %1892 = vmatpush1.bf16.msra.mxu1 %v3363_v20  ;;  %v3416_v20 = vld [vmem:[#allocation2 + $0x62c] ss:$16 sps:$4 sm:$0xff]   ;;  %v3417_v24 = vld [vmem:[#allocation2 + $0x648] ss:$16 sps:$4 sm:$0xff]  }
  0xe9   :  { %1923 = vmatprep.mubr.bf16.mxu1 %v3719_v34  ;;  %1893 = vmatprep.subr.bf16.mxu1 %v3368_v22  ;;  %v3468_v34 = vld [vmem:[#allocation4 + $0x30] ss:$8 sps:$4 sm:$0xff]  }
  0xea   :  { %2386 = vmatpush1.bf16.msra.mxu0 %v3459_v23  ;;  %v3414_v22 = vld [vmem:[#allocation2 + $0x628] ss:$16 sps:$4 sm:$0xff]   ;;  %v3419_v23 = vld [vmem:[#allocation2 + $0x64c] ss:$16 sps:$4 sm:$0xff]  }
  0xeb   :  { %2387 = vmatprep.subr.bf16.mxu0 %v3464_v26  ;;  %v3420_v26 = vld [vmem:[#allocation2 + $0x668] ss:$16 sps:$4 sm:$0xff]  }
  0xec   :  { %1894 = vmatpush1.bf16.msra.mxu1 %v3366_v25  ;;  %v3422_v25 = vld [vmem:[#allocation2 + $0x66c] ss:$16 sps:$4 sm:$0xff]  }
  0xed   :  { %1895 = vmatprep.subr.bf16.mxu1 %v3371_v6  ;;  %v3425_v6 = vld [vmem:[#allocation2 + $0x68c] ss:$16 sps:$4 sm:$0xff]  }
  0xee   :  { %2388 = vmatpush1.bf16.msra.mxu0 %v3462_v18  ;;  %v3423_v18 = vld [vmem:[#allocation2 + $0x688] ss:$16 sps:$4 sm:$0xff]  }
  0xef   :  { %2389 = vmatprep.subr.bf16.mxu0 %v3467_v27  ;;  %v3428_v27 = vld [vmem:[#allocation2 + $0x6ac] ss:$16 sps:$4 sm:$0xff]  }
  0xf0   :  { %1896 = vmatpush1.bf16.msra.mxu1 %v3369_v28  ;;  %v3431_v28 = vld [vmem:[#allocation2 + $0x6cc] ss:$16 sps:$4 sm:$0xff]  }
  0xf1   :  { %1897 = vmatprep.subr.bf16.mxu1 %v3374_v29 }
  0xf2   :  { %2390 = vmatpush1.bf16.msra.mxu0 %v3465_v7 }
  0xf3   :  { %2391 = vmatprep.subr.bf16.mxu0 %v3470_v32  ;;  %v3429_v32 = vld [vmem:[#allocation2 + $0x6c8] ss:$16 sps:$4 sm:$0xff]  }
  0xf4   :  { %1898 = vmatpush1.bf16.msra.mxu1 %v3372_v30  ;;  %v3501_v30 = vld [vmem:[#allocation4 + $0xe0] ss:$8 sps:$4 sm:$0xff]  }
  0xf5   :  { %1899 = vmatprep.subr.bf16.mxu1 %v3377_v31 }
  0xf6   :  { %2392 = vmatpush1.bf16.msra.mxu0 %v3468_v34 }
  0xf7   :  { %2393 = vmatprep.subr.bf16.mxu0 %v3473_v51  ;;  %v3434_v51 = vld [vmem:[#allocation2 + $0x6ec] ss:$16 sps:$4 sm:$0xff]  }
  0xf8   :  { %1900 = vmatpush1.bf16.msra.mxu1 %v3375_v33  ;;  %v3506_v33 = vld [vmem:[#allocation4 + $0xf4] ss:$8 sps:$4 sm:$0xff]  }
  0xf9   :  { %1901 = vmatprep.subr.bf16.mxu1 %v3380_v35  ;;  %v3504_v35 = vld [vmem:[#allocation4 + $0xf0] ss:$8 sps:$4 sm:$0xff]  }
  0xfa   :  { %2394 = vmatpush1.bf16.msra.mxu0 %v3471_v36  ;;  %v3432_v36 = vld [vmem:[#allocation2 + $0x6e8] ss:$16 sps:$4 sm:$0xff]  }
  0xfb   :  { %2395 = vmatprep.subr.bf16.mxu0 %v3476_v37  ;;  %v3437_v37 = vld [vmem:[#allocation2 + $0x70c] ss:$16 sps:$4 sm:$0xff]  }
  0xfc   :  { %1902 = vmatpush1.bf16.msra.mxu1 %v3378_v38  ;;  %v3435_v38 = vld [vmem:[#allocation2 + $0x708] ss:$16 sps:$4 sm:$0xff]  }
  0xfd   :  { %1903 = vmatprep.subr.bf16.mxu1 %v3383_v39  ;;  %v3509_v39 = vld [vmem:[#allocation4 + $0x104] ss:$8 sps:$4 sm:$0xff]  }
  0xfe   :  { %2396 = vmatpush1.bf16.msra.mxu0 %v3474_v40  ;;  %v3440_v40 = vld [vmem:[#allocation2 + $0x72c] ss:$16 sps:$4 sm:$0xff]  }
  0xff   :  { %2397 = vmatprep.subr.bf16.mxu0 %v3479_v41  ;;  %v3438_v41 = vld [vmem:[#allocation2 + $0x728] ss:$16 sps:$4 sm:$0xff]  }
 0x100   :  { %1904 = vmatpush1.bf16.msra.mxu1 %v3381_v42  ;;  %v3443_v42 = vld [vmem:[#allocation2 + $0x74c] ss:$16 sps:$4 sm:$0xff]  }
 0x101   :  { %1905 = vmatprep.subr.bf16.mxu1 %v3386_v43  ;;  %v3441_v43 = vld [vmem:[#allocation2 + $0x748] ss:$16 sps:$4 sm:$0xff]  }
 0x102   :  { %2398 = vmatpush1.bf16.msra.mxu0 %v3477_v44  ;;  %v3446_v44 = vld [vmem:[#allocation2 + $0x76c] ss:$16 sps:$4 sm:$0xff]  }
 0x103   :  { %2399 = vmatprep.subr.bf16.mxu0 %v3482_v45  ;;  %v3444_v45 = vld [vmem:[#allocation2 + $0x768] ss:$16 sps:$4 sm:$0xff]  }
 0x104   :  { %1906 = vmatpush1.bf16.msra.mxu1 %v3384_v46  ;;  %v3449_v46 = vld [vmem:[#allocation2 + $0x78c] ss:$16 sps:$4 sm:$0xff]  }
 0x105   :  { %1907 = vmatprep.subr.bf16.mxu1 %v3389_v47  ;;  %v3447_v47 = vld [vmem:[#allocation2 + $0x788] ss:$16 sps:$4 sm:$0xff]  }
 0x106   :  { %2400 = vmatpush1.bf16.msra.mxu0 %v3480_v48  ;;  %v3452_v48 = vld [vmem:[#allocation2 + $0x7ac] ss:$16 sps:$4 sm:$0xff]  }
 0x107   :  { %2401 = vmatprep.subr.bf16.mxu0 %v3485_v49  ;;  %v3450_v49 = vld [vmem:[#allocation2 + $0x7a8] ss:$16 sps:$4 sm:$0xff]  }
 0x108   :  { %1908 = vmatpush1.bf16.msra.mxu1 %v3387_v50  ;;  %v3455_v50 = vld [vmem:[#allocation2 + $0x7cc] ss:$16 sps:$4 sm:$0xff]  }
 0x109   :  { %1909 = vmatprep.subr.bf16.mxu1 %v3392_v52  ;;  %v3453_v52 = vld [vmem:[#allocation2 + $0x7c8] ss:$16 sps:$4 sm:$0xff]  }
 0x10a   :  { %2402 = vmatpush1.bf16.msra.mxu0 %v3483_v53  ;;  %v3458_v53 = vld [vmem:[#allocation2 + $0x7ec] ss:$16 sps:$4 sm:$0xff]  }
 0x10b   :  { %2403 = vmatprep.subr.bf16.mxu0 %v3488_v54  ;;  %v3456_v54 = vld [vmem:[#allocation2 + $0x7e8] ss:$16 sps:$4 sm:$0xff]  }
 0x10c   :  { %1910 = vmatpush1.bf16.msra.mxu1 %v3390_v55  ;;  %v317_v55 = vlaneseq }
 0x10d   :  { %1911 = vmatprep.subr.bf16.mxu1 %v3395_v56 }
 0x10e   :  { %2404 = vmatpush1.bf16.msra.mxu0 %v3486_v57  ;;  %v3749_v56 = vshrl.u32 %v317_v55, 7 }
 0x10f   :  { %2405 = vmatprep.subr.bf16.mxu0 %v3491_v58  ;;  %v3755_v58 = vld [vmem:[%s3831_s2] sm:$0xf] }
 0x110   :  { %1912 = vmatpush1.bf16.msra.mxu1 %v3393_v59  ;;  %v319_v57 = vsub.s32 0, %v3749_v56  ;;  %v323_v59 = vsub.s32 1, %v3749_v56  ;;  %v327_v55 = vsub.s32 2, %v3749_v56 }
 0x111   :  { %1913 = vmatprep.subr.bf16.mxu1 %v3398_v60 }
 0x112   :  { %2406 = vmatpush1.bf16.msra.mxu0 %v3489_v61  ;;  %v320_v60 = vrot.slane %v3755_v58, %v319_v57 }
 0x113   :  { %2407 = vmatprep.subr.bf16.mxu0 %v3494_v62 }
 0x114   :  { %1914 = vmatpush1.bf16.msra.mxu1 %v3396_v63 }
 0x115   :  { %1915 = vmatprep.subr.bf16.mxu1 %v3401_v0 }
 0x116   :  { %2408 = vmatpush1.bf16.msra.mxu0 %v3492_v1 }
 0x117   :  { %2409 = vmatprep.subr.bf16.mxu0 %v3497_v2 }
 0x118   :  { %1916 = vmatpush1.bf16.msra.mxu1 %v3399_v3 }
 0x119   :  { %1917 = vmatprep.subr.bf16.mxu1 %v3404_v4 }
 0x11a   :  { %2410 = vmatpush1.bf16.msra.mxu0 %v3495_v5 }
 0x11b   :  { %2411 = vmatprep.subr.bf16.mxu0 %v3500_v8 }
 0x11c   :  { %1918 = vmatpush1.bf16.msra.mxu1 %v3402_v9 }
 0x11d   :  { %1919 = vmatprep.subr.bf16.mxu1 %v3407_v10 }
 0x11e   :  { %2412 = vmatpush1.bf16.msra.mxu0 %v3498_v11 }
 0x120   :  { %1920 = vmatpush1.bf16.msra.mxu1 %v3405_v12  ;;  %v3507_v12 = vld [vmem:[#allocation4 + $0x100] ss:$8 sps:$4 sm:$0xff]  }
 0x121   :  { %1921 = vmatprep.subr.bf16.mxu1 %v3410_v14 }
 0x124   :  { %1922 = vmatpush1.bf16.msra.mxu1 %v3408_v15  ;;  %v3512_v15 = vld [vmem:[#allocation4 + $0x114] ss:$8 sps:$4 sm:$0xff]  }
 0x125   :  { %1932 = vmatprep.subr.bf16.mxu1 %v3413_v16  ;;  %v3555_v16 = vld [vmem:[%s3834_s5 + $0x40] sm:$0xff]  }
 0x127   :  { %1924 = vmatmul.mubr.bf16.vlgmr.msra.gmra.mrb[4].mxu1 %v3724_v13  ;;  %v3426_v13 = vld [vmem:[#allocation2 + $0x6a8] ss:$16 sps:$4 sm:$0xff]  }
 0x128   :  { %1933 = vmatpush1.bf16.msra.mxu1 %v3411_v17  ;;  %1964 = vmatprep.mubr.bf16.mxu1 %v3733_v19  ;;  %v3503_v19 = vld [vmem:[#allocation4 + $0xe4] ss:$8 sps:$4 sm:$0xff]  }
 0x129   :  { %1934 = vmatprep.subr.bf16.mxu1 %v3416_v20  ;;  %2413 = vmatprep.subr.bf16.mxu0 %v3503_v19  ;;  %v3556_v17 = vld [vmem:[%s3834_s5] sm:$0xff]   ;;  %v3557_v20 = vld [vmem:[%s3834_s5 + $0x48] sm:$0xff]  }
 0x12a   :  { %2414 = vmatpush1.bf16.msra.mxu0 %v3501_v30  ;;  %v3563_v19 = vld [vmem:[%s3834_s5 + $0x60] sm:$0xff]   ;;  %v3524_v30 = vld [vmem:[#allocation4 + $0x154] ss:$8 sps:$4 sm:$0xff]  }
 0x12b   :  { %2415 = vmatprep.subr.bf16.mxu0 %v3506_v33  ;;  %v3566_v33 = vld [vmem:[%s3834_s5 + $0x28] sm:$0xff]  }
 0x12c   :  { %1935 = vmatpush1.bf16.msra.mxu1 %v3414_v22  ;;  %v3510_v22 = vld [vmem:[#allocation4 + $0x110] ss:$8 sps:$4 sm:$0xff]  }
 0x12d   :  { %1936 = vmatprep.subr.bf16.mxu1 %v3419_v23  ;;  %v3515_v23 = vld [vmem:[#allocation4 + $0x124] ss:$8 sps:$4 sm:$0xff]  }
 0x12e   :  { %2416 = vmatpush1.bf16.msra.mxu0 %v3504_v35  ;;  %v3525_v35 = vld [vmem:[#allocation4 + $0x160] ss:$8 sps:$4 sm:$0xff]  }
 0x12f   :  { %2426 = vmatprep.subr.bf16.mxu0 %v3509_v39  ;;  %v3531_v39 = vld [vmem:[#allocation4 + $0x180] ss:$8 sps:$4 sm:$0xff]  }
 0x130   :  { %1937 = vmatpush1.bf16.msra.mxu1 %v3417_v24  ;;  %v3558_v24 = vld [vmem:[%s3834_s5 + $0x8] sm:$0xff]  }
 0x131   :  { %1938 = vmatprep.subr.bf16.mxu1 %v3422_v25  ;;  %v3559_v25 = vld [vmem:[%s3834_s5 + $0x50] sm:$0xff]  }
 0x134   :  { %1939 = vmatpush1.bf16.msra.mxu1 %v3420_v26  ;;  %v3513_v26 = vld [vmem:[#allocation4 + $0x120] ss:$8 sps:$4 sm:$0xff]  }
 0x135   :  { %1940 = vmatprep.subr.bf16.mxu1 %v3425_v6  ;;  %v3518_v6 = vld [vmem:[#allocation4 + $0x134] ss:$8 sps:$4 sm:$0xff]  }
 0x138   :  { %1941 = vmatpush1.bf16.msra.mxu1 %v3423_v18  ;;  %v3560_v18 = vld [vmem:[%s3834_s5 + $0x10] sm:$0xff]  }
 0x139   :  { %1942 = vmatprep.subr.bf16.mxu1 %v3428_v27  ;;  %v3561_v27 = vld [vmem:[%s3834_s5 + $0x58] sm:$0xff]  }
 0x13a   :  { %v1679_v29 = vpop.f32.mrb[0].mxu1 }
 0x13b   :  { %v1681_v7 = vpop.f32.mrb[1].mxu1  ;;  %v1680_v61 = vadd.f32 %v1679_v29, %v320_v60  ;;  %v3562_v29 = vld [vmem:[%s3834_s5 + $0x18] sm:$0xff]   ;;  %v331_v60 = vsub.s32 3, %v3749_v56  ;;  %v2990_v56 = vld [vmem:[%s3835_s6] ss:$0 sm:$0xff] }
 0x13c   :  { %v1683_v31 = vpop.f32.mrb[2].mxu1  ;;  %1943 = vmatpush1.bf16.msra.mxu1 %v3426_v13  ;;  %v3516_v13 = vld [vmem:[#allocation4 + $0x130] ss:$8 sps:$4 sm:$0xff]  }
 0x13d   :  { %v1684_v34 = vpop.f32.mrb[3].mxu1  ;;  %1944 = vmatprep.subr.bf16.mxu1 %v3431_v28  ;;  %v3521_v28 = vld [vmem:[#allocation4 + $0x144] ss:$8 sps:$4 sm:$0xff]  }
 0x13e   :  { %v3564_v31 = vld [vmem:[%s3834_s5 + $0x20] sm:$0xff]   ;;  %v3522_v34 = vld [vmem:[#allocation4 + $0x150] ss:$8 sps:$4 sm:$0xff]  }
 0x140   :  { %1945 = vmatpush1.bf16.msra.mxu1 %v3429_v32  ;;  %v3565_v32 = vld [vmem:[%s3834_s5 + $0x68] sm:$0xff]  }
 0x141   :  { %1946 = vmatprep.subr.bf16.mxu1 %v3434_v51  ;;  %v3527_v51 = vld [vmem:[#allocation4 + $0x164] ss:$8 sps:$4 sm:$0xff]  }
 0x144   :  { %1947 = vmatpush1.bf16.msra.mxu1 %v3432_v36  ;;  %v3530_v36 = vld [vmem:[#allocation4 + $0x174] ss:$8 sps:$4 sm:$0xff]  }
 0x145   :  { %1948 = vmatprep.subr.bf16.mxu1 %v3437_v37  ;;  %v3528_v37 = vld [vmem:[#allocation4 + $0x170] ss:$8 sps:$4 sm:$0xff]  }
 0x148   :  { %1949 = vmatpush1.bf16.msra.mxu1 %v3435_v38  ;;  %v3533_v38 = vld [vmem:[#allocation4 + $0x184] ss:$8 sps:$4 sm:$0xff]  }
 0x149   :  { %1950 = vmatprep.subr.bf16.mxu1 %v3440_v40  ;;  %v3536_v40 = vld [vmem:[#allocation4 + $0x194] ss:$8 sps:$4 sm:$0xff]  }
 0x14c   :  { %1951 = vmatpush1.bf16.msra.mxu1 %v3438_v41  ;;  %v3534_v41 = vld [vmem:[#allocation4 + $0x190] ss:$8 sps:$4 sm:$0xff]  }
 0x14d   :  { %1952 = vmatprep.subr.bf16.mxu1 %v3443_v42  ;;  %v3539_v42 = vld [vmem:[#allocation4 + $0x1a4] ss:$8 sps:$4 sm:$0xff]  }
 0x150   :  { %1953 = vmatpush1.bf16.msra.mxu1 %v3441_v43  ;;  %v3537_v43 = vld [vmem:[#allocation4 + $0x1a0] ss:$8 sps:$4 sm:$0xff]  }
 0x151   :  { %1954 = vmatprep.subr.bf16.mxu1 %v3446_v44  ;;  %v3542_v44 = vld [vmem:[#allocation4 + $0x1b4] ss:$8 sps:$4 sm:$0xff]  }
 0x154   :  { %1955 = vmatpush1.bf16.msra.mxu1 %v3444_v45  ;;  %v3540_v45 = vld [vmem:[#allocation4 + $0x1b0] ss:$8 sps:$4 sm:$0xff]  }
 0x155   :  { %1956 = vmatprep.subr.bf16.mxu1 %v3449_v46  ;;  %v3545_v46 = vld [vmem:[#allocation4 + $0x1c4] ss:$8 sps:$4 sm:$0xff]  }
 0x158   :  { %1957 = vmatpush1.bf16.msra.mxu1 %v3447_v47  ;;  %v3543_v47 = vld [vmem:[#allocation4 + $0x1c0] ss:$8 sps:$4 sm:$0xff]  }
 0x159   :  { %1958 = vmatprep.subr.bf16.mxu1 %v3452_v48  ;;  %v3548_v48 = vld [vmem:[#allocation4 + $0x1d4] ss:$8 sps:$4 sm:$0xff]  }
 0x15c   :  { %1959 = vmatpush1.bf16.msra.mxu1 %v3450_v49  ;;  %v3546_v49 = vld [vmem:[#allocation4 + $0x1d0] ss:$8 sps:$4 sm:$0xff]  }
 0x15d   :  { %1960 = vmatprep.subr.bf16.mxu1 %v3455_v50  ;;  %v3551_v50 = vld [vmem:[#allocation4 + $0x1e4] ss:$8 sps:$4 sm:$0xff]  }
 0x160   :  { %1961 = vmatpush1.bf16.msra.mxu1 %v3453_v52  ;;  %v3549_v52 = vld [vmem:[#allocation4 + $0x1e0] ss:$8 sps:$4 sm:$0xff]  }
 0x161   :  { %1962 = vmatprep.subr.bf16.mxu1 %v3458_v53  ;;  %v3554_v53 = vld [vmem:[#allocation4 + $0x1f4] ss:$8 sps:$4 sm:$0xff]  }
 0x164   :  { %1963 = vmatpush1.bf16.msra.mxu1 %v3456_v54  ;;  %v3552_v54 = vld [vmem:[#allocation4 + $0x1f0] ss:$8 sps:$4 sm:$0xff]  }
 0x165   :  { %3007 = vmatprep.subr.bf16.mxu1 %v3555_v16  ;;  %v2053_v16 = vld [vmem:[%s3833_s4] sm:$0x3] }
 0x167   :  { %1965 = vmatmul.mubr.bf16.vlgmr.msra.gmra.mrb[4].mxu1 %v3741_v21  ;;  %v324_v21 = vrot.slane %v3755_v58, %v323_v59 }
 0x168   :  { %3008 = vmatpush3.bf16.msra.mxu1 %v3556_v17  ;;  %v2058_v17 = vrot.slane %v2053_v16, %v319_v57 }
 0x169   :  { %v1682_v62 = vadd.f32 %v1681_v7, %v324_v21  ;;  %3009 = vmatprep.subr.bf16.mxu1 %v3557_v20  ;;  %v3519_v7 = vld [vmem:[#allocation4 + $0x140] ss:$8 sps:$4 sm:$0xff]   ;;  %v328_v21 = vrot.slane %v3755_v58, %v327_v55  ;;  %v2062_v20 = vrot.slane %v2053_v16, %v323_v59 }
 0x16c   :  { %3010 = vmatpush3.bf16.msra.mxu1 %v3558_v24 }
 0x16d   :  { %3011 = vmatprep.subr.bf16.mxu1 %v3559_v25 }
 0x170   :  { %3012 = vmatpush3.bf16.msra.mxu1 %v3560_v18 }
 0x171   :  { %3013 = vmatprep.subr.bf16.mxu1 %v3561_v27 }
 0x174   :  { %3014 = vmatpush3.bf16.msra.mxu1 %v3562_v29 }
 0x175   :  { %3015 = vmatprep.subr.bf16.mxu1 %v3563_v19 }
 0x178   :  { %3016 = vmatpush3.bf16.msra.mxu1 %v3564_v31 }
 0x179   :  { %3017 = vmatprep.subr.bf16.mxu1 %v3565_v32 }
 0x17c   :  { %3018 = vmatpush3.bf16.msra.mxu1 %v3566_v33 }
 0x1bb   :  { %v1802_v63 = vpop.f32.mrb[0].mxu0 }
 0x1bc   :  { %v3030_v0 = vadd.f32 %v1802_v63, %v1680_v61  ;;  %v1804_v1 = vpop.f32.mrb[1].mxu0  ;;  %v332_v61 = vrot.slane %v3755_v58, %v331_v60  ;;  %v3567_v58 = vld [vmem:[%s3834_s5 + $0x70] sm:$0xff]  }
 0x1bd   :  { %v3032_v2 = vadd.f32 %v1804_v1, %v1682_v62  ;;  %v1806_v3 = vpop.f32.mrb[2].mxu0  ;;  %3019 = vmatprep.subr.bf16.mxu1 %v3567_v58 }
 0x1be   :  { %vm1973_vm0 = vcmp.gt.f32.partialorder %v3030_v0, 0.0  ;;  %v1977_v4 = vmul.f32 0.2, %v3030_v0  ;;  %v1807_v5 = vpop.f32.mrb[3].mxu0 }
 0x1bf   :  { %vm1974_vm1 = vcmp.gt.f32.partialorder %v3032_v2, 0.0  ;;  %v1978_v8 = vmul.f32 0.2, %v3032_v2 }
 0x1c0   :  { %v1981_v9 = vsel %vm1973_vm0, %v3030_v0, %v1977_v4 }
 0x1c1   :  { %v1982_v10 = vsel %vm1974_vm1, %v3032_v2, %v1978_v8  ;;  %v1985_v14 = vpack.c.bf16 %v1981_v9, %v1981_v9 }
 0x1c2   :  { %v1986_v11 = vpack.c.bf16 %v1982_v10, %v1982_v10 }
 0x1c4   :  { %2417 = vmatprep.mubr.bf16.mxu0 %v1986_v11 }
 0x1c5   :  { %2418 = vmatmul.mubr.bf16.vlgmr.msra.gmra.mrb[4].mxu0 %v1985_v14  ;;  %v3569_v14 = vld [vmem:[%s3834_s5 + $0x78] sm:$0xff]  }
 0x1c6   :  { %2427 = vmatpush1.bf16.msra.mxu0 %v3507_v12  ;;  %v3568_v12 = vld [vmem:[%s3834_s5 + $0x30] sm:$0xff]  }
 0x1c7   :  { %2428 = vmatprep.subr.bf16.mxu0 %v3512_v15  ;;  %3020 = vmatpush3.bf16.msra.mxu1 %v3568_v12  ;;  %v3570_v15 = vld [vmem:[%s3834_s5 + $0x38] sm:$0xff]  }
 0x1c8   :  { %3021 = vmatprep.subr.bf16.mxu1 %v3569_v14 }
 0x1ca   :  { %2429 = vmatpush1.bf16.msra.mxu0 %v3510_v22 }
 0x1cb   :  { %2430 = vmatprep.subr.bf16.mxu0 %v3515_v23  ;;  %3022 = vmatpush3.bf16.msra.mxu1 %v3570_v15 }
 0x1ce   :  { %2431 = vmatpush1.bf16.msra.mxu0 %v3513_v26 }
 0x1cf   :  { %2432 = vmatprep.subr.bf16.mxu0 %v3518_v6 }
 0x1d2   :  { %2433 = vmatpush1.bf16.msra.mxu0 %v3516_v13 }
 0x1d3   :  { %2434 = vmatprep.subr.bf16.mxu0 %v3521_v28 }
 0x1d6   :  { %2435 = vmatpush1.bf16.msra.mxu0 %v3519_v7 }
 0x1d7   :  { %2436 = vmatprep.subr.bf16.mxu0 %v3524_v30 }
 0x1da   :  { %2437 = vmatpush1.bf16.msra.mxu0 %v3522_v34 }
 0x1db   :  { %2438 = vmatprep.subr.bf16.mxu0 %v3527_v51 }
 0x1de   :  { %2439 = vmatpush1.bf16.msra.mxu0 %v3525_v35 }
 0x1df   :  { %2440 = vmatprep.subr.bf16.mxu0 %v3530_v36 }
 0x1e2   :  { %2441 = vmatpush1.bf16.msra.mxu0 %v3528_v37 }
 0x1e3   :  { %2442 = vmatprep.subr.bf16.mxu0 %v3533_v38 }
 0x1e6   :  { %2443 = vmatpush1.bf16.msra.mxu0 %v3531_v39 }
 0x1e7   :  { %2444 = vmatprep.subr.bf16.mxu0 %v3536_v40 }
 0x1ea   :  { %2445 = vmatpush1.bf16.msra.mxu0 %v3534_v41 }
 0x1eb   :  { %2446 = vmatprep.subr.bf16.mxu0 %v3539_v42 }
 0x1ee   :  { %2447 = vmatpush1.bf16.msra.mxu0 %v3537_v43 }
 0x1ef   :  { %2448 = vmatprep.subr.bf16.mxu0 %v3542_v44 }
 0x1f2   :  { %2449 = vmatpush1.bf16.msra.mxu0 %v3540_v45 }
 0x1f3   :  { %2450 = vmatprep.subr.bf16.mxu0 %v3545_v46 }
 0x1f6   :  { %2451 = vmatpush1.bf16.msra.mxu0 %v3543_v47 }
 0x1f7   :  { %2452 = vmatprep.subr.bf16.mxu0 %v3548_v48 }
 0x1fa   :  { %2453 = vmatpush1.bf16.msra.mxu0 %v3546_v49 }
 0x1fb   :  { %2454 = vmatprep.subr.bf16.mxu0 %v3551_v50 }
 0x1fe   :  { %2455 = vmatpush1.bf16.msra.mxu0 %v3549_v52 }
 0x1ff   :  { %2456 = vmatprep.subr.bf16.mxu0 %v3554_v53 }
 0x202   :  { %2457 = vmatpush1.bf16.msra.mxu0 %v3552_v54 }
 0x23a   :  { %v1966_v62 = vpop.f32.mrb[4].mxu1 }
 0x23b   :  { %v3033_v63 = vadd.f32 %v1966_v62, %v328_v21  ;;  %v1968_v0 = vpop.f32.mrb[5].mxu1 }
 0x23c   :  { %v3034_v1 = vadd.f32 %v1968_v0, %v332_v61  ;;  %v1970_v2 = vpop.f32.mrb[6].mxu1 }
 0x23d   :  { %vm1975_vm2 = vcmp.gt.f32.partialorder %v3033_v63, 0.0  ;;  %v1979_v3 = vmul.f32 0.2, %v3033_v63  ;;  %v1971_v4 = vpop.f32.mrb[7].mxu1 }
 0x23e   :  { %vm1976_vm3 = vcmp.gt.f32.partialorder %v3034_v1, 0.0  ;;  %v1980_v5 = vmul.f32 0.2, %v3034_v1 }
 0x23f   :  { %v1983_v8 = vsel %vm1975_vm2, %v3033_v63, %v1979_v3 }
 0x240   :  { %v1984_v9 = vsel %vm1976_vm3, %v3034_v1, %v1980_v5  ;;  %v1987_v11 = vpack.c.bf16 %v1983_v8, %v1983_v8 }
 0x241   :  { %v1988_v10 = vpack.c.bf16 %v1984_v9, %v1984_v9 }
 0x243   :  { %2458 = vmatprep.mubr.bf16.mxu0 %v1988_v10 }
 0x244   :  { %2459 = vmatmul.mubr.bf16.vlgmr.msra.gmra.mrb[4].mxu0 %v1987_v11 }
 0x317   :  { %v2460_v22 = vpop.f32.mrb[4].mxu0 }
 0x318   :  { %v3035_v23 = vadd.f32 %v2460_v22, %v2058_v17  ;;  %v2462_v24 = vpop.f32.mrb[5].mxu0 }
 0x319   :  { %v3036_v25 = vadd.f32 %v2462_v24, %v2062_v20  ;;  %v2464_v26 = vpop.f32.mrb[6].mxu0 }
 0x31a   :  { %vm2467_vm4 = vcmp.gt.f32.partialorder %v3035_v23, 0.0  ;;  %v2469_v6 = vmul.f32 0.2, %v3035_v23  ;;  %v2465_v18 = vpop.f32.mrb[7].mxu0 }
 0x31b   :  { %vm2468_vm5 = vcmp.gt.f32.partialorder %v3036_v25, 0.0  ;;  %v2470_v27 = vmul.f32 0.2, %v3036_v25 }
 0x31c   :  { %v2471_v13 = vsel %vm2467_vm4, %v3035_v23, %v2469_v6 }
 0x31d   :  { %v2472_v28 = vsel %vm2468_vm5, %v3036_v25, %v2470_v27  ;;  %v2473_v19 = vpack.c.bf16 %v2471_v13, %v2471_v13 }
 0x31e   :  { %v2474_v29 = vpack.c.bf16 %v2472_v28, %v2472_v28 }
 0x320   :  { %2642 = vmatprep.mubr.bf16.mxu1 %v2474_v29 }
 0x321   :  { %2643 = vmatmul.mubr.bf16.vlgmr.msra.gmra.mrb[8].mxu1 %v2473_v19 }
 0x3f4   :  { %v3023_v57 = vpop.f32.mrb[8].mxu1 }
 0x3f5   :  { %v3024_v59 = vpop.f32.mrb[9].mxu1 }
 0x3f6   :  { %v3025_v7 = vadd.f32 %v3024_v59, %v3023_v57  ;;  %v3026_v30 = vpop.f32.mrb[10].mxu1 }
 0x3f7   :  { %v3027_v31 = vpop.f32.mrb[11].mxu1 }
 0x3f8   :  { %v2645_v32 = vadd.f32 %v3025_v7, %v2990_v56 }
 0x3fa   :  { %v2650_v34 = vsub.f32 0.0, %v2645_v32 }
 0x3fc   :  { %v2651_v51 = vmul.f32 1.442695, %v2650_v34 }
 0x3fe   :  { %3571 = vpow2.f32 %v2651_v51 }
 0x408   :  { %v3572_v33 = vpop.eup %3571 }
 0x409   :  { %v2653_v35 = vadd.f32 1.0, %v3572_v33 }
 0x40b   :  { %3573 = vrcp.f32 %v2653_v35 }
 0x415   :  { %v3574_v36 = vpop.eup %3573 }
 0x416   :  { %2655 = vst [vmem:[%s3836_s7] sm:$0xff] %v3574_v36 }
 0x417   :  { %2660 = vsyncpa [#allocation3], 1 }
 0x418   :  { %2661 = vsyncpa [#allocation5], 1 }

// kernel: discriminator_forward.1
= control target key start
LH: loop header
LB: loop body
LE: loop exit
PB: predicated region body
PF: predicated region fallthrough
CT: control target
= control target key end

     0   :  { %12 = vsyncpa [#allocation3], 0  ;;  %s3829_s0 = inlined_call_operand.vmem [shape: bf16[8,1024], index: 0, kind: input, shape index: {}]   ;;  %s3830_s1 = inlined_call_operand.hbm [shape: bf16[1024,512], index: 1, kind: input, shape index: {}]   ;;  %s3831_s2 = inlined_call_operand.vmem [shape: f32[1,512], index: 2, kind: input, shape index: {}]   ;;  %s3832_s3 = inlined_call_operand.hbm [shape: bf16[512,256], index: 3, kind: input, shape index: {}]   ;;  %s3833_s4 = inlined_call_operand.vmem [shape: f32[1,256], index: 4, kind: input, shape index: {}]   ;;  %s3834_s5 = inlined_call_operand.vmem [shape: bf16[256,128], index: 5, kind: input, shape index: {}]   ;;  %s3835_s6 = inlined_call_operand.vmem [shape: f32[1,128], index: 6, kind: input, shape index: {}]   ;;  %s3836_s7 = inlined_call_operand.vmem [shape: f32[8,128], index: 7, kind: output, shape index: {}]  }
   0x1   :  { %13 = vsyncpa [#allocation5], 0  ;;  %s3623_s24 = smov [#allocation2]   ;;  %s3575_s28 = scalar_lea.hbm %s3830_s1, 32768 }
   0x2   :  { %s21_s25 = sshll.u32 %s3623_s24, 4  ;;  %p3576_p0 = scmp.ne.s32.totalorder %s3830_s1, %s3575_s28  ;;  %s22_s25 = int_to_ptr.vmem [resolvable:$true] %s21_s25 }
   0x3   :  { %p3579_p1 = scmp.lt.u32.totalorder %s3575_s28, %s3830_s1 }
   0x5   :  { %p3581_p2 = pnand %p3579_p1, %p3576_p0 }
   0x7   :  { %3584 = shalt.err (!%p3581_p2)
}
   0x8   :  { %s3585_s10 = scalar_lea.vmem %s22_s25, 32768  ;;  %p3590_p4 = scmp.lt.s32.totalorder %s22_s25, %s22_s25 }
   0x9   :  { %p3586_p3 = scmp.ne.s32.totalorder %s22_s25, %s3585_s10  ;;  %p3591_p5 = scmp.lt.s32.totalorder %s3585_s10, %s3585_s10 }
   0xb   :  { %p3592_p6 = por %p3591_p5, %p3590_p4 }
   0xd   :  { %p3593_p7 = pnand %p3592_p6, %p3586_p3 }
   0xf   :  { %3596 = shalt.err (!%p3593_p7)
}
  0x10   :  { %s3624_s11 = smov 256   ;;  %s3625_s12 = smov 16  }
  0x11   :  { %27 = dma.hbm_to_vmem [thread:$0]  %s3830_s1, 32768, %s22_s25, [#allocation3], %s3624_s11, %s3624_s11, %s3625_s12  }
  0x12   :  { %s3626_s15 = smov [#allocation4]   ;;  %s3597_s19 = scalar_lea.hbm %s3832_s3, 8192 }
  0x13   :  { %s35_s16 = sshll.u32 %s3626_s15, 4  ;;  %p3598_p8 = scmp.ne.s32.totalorder %s3832_s3, %s3597_s19  ;;  %s36_s16 = int_to_ptr.vmem [resolvable:$true] %s35_s16 }
  0x14   :  { %p3601_p9 = scmp.lt.u32.totalorder %s3597_s19, %s3832_s3 }
  0x16   :  { %p3603_p10 = pnand %p3601_p9, %p3598_p8 }
  0x18   :  { %3606 = shalt.err (!%p3603_p10)
}
  0x19   :  { %s3607_s24 = scalar_lea.vmem %s36_s16, 8192  ;;  %p3612_p12 = scmp.lt.s32.totalorder %s36_s16, %s36_s16 }
  0x1a   :  { %p3608_p11 = scmp.ne.s32.totalorder %s36_s16, %s3607_s24  ;;  %p3613_p13 = scmp.lt.s32.totalorder %s3607_s24, %s3607_s24 }
  0x1c   :  { %p3614_p0 = por %p3613_p13, %p3612_p12 }
  0x1e   :  { %p3615_p1 = pnand %p3614_p0, %p3608_p11 }
  0x20   :  { %3618 = shalt.err (!%p3615_p1)
}
  0x21   :  { %s3627_s1 = smov 128   ;;  %s3628_s25 = smov 8  }
  0x22   :  { %41 = dma.hbm_to_vmem [thread:$0]  %s3832_s3, 8192, %s36_s16, [#allocation5], %s3627_s1, %s3627_s1, %s3628_s25  }
  0x23   :  { %3619 = dma.done.wait [#allocation3], 32768  }
  0x24   :  { %3620 = vsyncadd [#allocation3], 4294934528 }
  0x25   :  { %3621 = dma.done.wait [#allocation5], 8192  }
  0x26   :  { %3622 = vsyncadd [#allocation5], 4294959104  ;;  %v3067_v0 = vld [vmem:[#allocation2 + $0x4] ss:$16 sps:$4 sm:$0xff]   ;;  %v3071_v2 = vld [vmem:[#allocation2] ss:$16 sps:$4 sm:$0xff]  }
  0x27   :  { %v3069_v1 = vld [vmem:[#allocation2 + $0x204] ss:$16 sps:$4 sm:$0xff]   ;;  %1645 = vmatprep.subr.bf16.mxu1 %v3067_v0  ;;  %v3072_v3 = vld [vmem:[#allocation2 + $0x200] ss:$16 sps:$4 sm:$0xff]   ;;  %v56_v48 = vld [vmem:[%s3829_s0 + $0x8] sm:$0xff] }
  0x28   :  { %1686 = vmatprep.subr.bf16.mxu0 %v3069_v1  ;;  %v3073_v4 = vld [vmem:[#allocation2 + $0x24] ss:$16 sps:$4 sm:$0xff]   ;;  %1646 = vmatpush1.bf16.msra.mxu1 %v3071_v2  ;;  %v3077_v6 = vld [vmem:[#allocation2 + $0x20] ss:$16 sps:$4 sm:$0xff]   ;;  %v3701_v51 = vcombine.high %v56_v48, %v56_v48 }
  0x29   :  { %1687 = vmatpush1.bf16.msra.mxu0 %v3072_v3  ;;  %v3075_v5 = vld [vmem:[#allocation2 + $0x224] ss:$16 sps:$4 sm:$0xff]   ;;  %1647 = vmatprep.subr.bf16.mxu1 %v3073_v4  ;;  %v3078_v7 = vld [vmem:[#allocation2 + $0x220] ss:$16 sps:$4 sm:$0xff]  }
  0x2a   :  { %1688 = vmatprep.subr.bf16.mxu0 %v3075_v5  ;;  %v3079_v8 = vld [vmem:[#allocation2 + $0x44] ss:$16 sps:$4 sm:$0xff]   ;;  %v3083_v10 = vld [vmem:[#allocation2 + $0x40] ss:$16 sps:$4 sm:$0xff]   ;;  %1718 = vmatprep.mubr.bf16.mxu0 %v3701_v51  ;;  %v3172_v5 = vld [vmem:[#allocation2 + $0xc] ss:$16 sps:$4 sm:$0xff]  }
  0x2b   :  { %v3081_v9 = vld [vmem:[#allocation2 + $0x244] ss:$16 sps:$4 sm:$0xff]   ;;  %v3084_v11 = vld [vmem:[#allocation2 + $0x240] ss:$16 sps:$4 sm:$0xff]  }
  0x2c   :  { %1648 = vmatpush1.bf16.msra.mxu1 %v3077_v6  ;;  %v3085_v12 = vld [vmem:[#allocation2 + $0x64] ss:$16 sps:$4 sm:$0xff]   ;;  %v3089_v14 = vld [vmem:[#allocation2 + $0x60] ss:$16 sps:$4 sm:$0xff]  }
  0x2d   :  { %1689 = vmatpush1.bf16.msra.mxu0 %v3078_v7  ;;  %1649 = vmatprep.subr.bf16.mxu1 %v3079_v8  ;;  %v3087_v13 = vld [vmem:[#allocation2 + $0x264] ss:$16 sps:$4 sm:$0xff]   ;;  %v3090_v15 = vld [vmem:[#allocation2 + $0x260] ss:$16 sps:$4 sm:$0xff]   ;;  %v3707_v7 = vcombine.low %v56_v48, %v56_v48 }
  0x2e   :  { %1690 = vmatprep.subr.bf16.mxu0 %v3081_v9  ;;  %v3091_v16 = vld [vmem:[#allocation2 + $0x84] ss:$16 sps:$4 sm:$0xff]   ;;  %v3095_v18 = vld [vmem:[#allocation2 + $0x80] ss:$16 sps:$4 sm:$0xff]   ;;  %v3170_v9 = vld [vmem:[#allocation2 + $0x8] ss:$16 sps:$4 sm:$0xff]  }
  0x2f   :  { %v3093_v17 = vld [vmem:[#allocation2 + $0x284] ss:$16 sps:$4 sm:$0xff]   ;;  %v3096_v19 = vld [vmem:[#allocation2 + $0x280] ss:$16 sps:$4 sm:$0xff]  }
  0x30   :  { %1650 = vmatpush1.bf16.msra.mxu1 %v3083_v10  ;;  %v3097_v20 = vld [vmem:[#allocation2 + $0xa4] ss:$16 sps:$4 sm:$0xff]   ;;  %v3101_v22 = vld [vmem:[#allocation2 + $0xa0] ss:$16 sps:$4 sm:$0xff]  }
  0x31   :  { %1691 = vmatpush1.bf16.msra.mxu0 %v3084_v11  ;;  %1651 = vmatprep.subr.bf16.mxu1 %v3085_v12  ;;  %v3099_v21 = vld [vmem:[#allocation2 + $0x2a4] ss:$16 sps:$4 sm:$0xff]   ;;  %v3102_v23 = vld [vmem:[#allocation2 + $0x2a0] ss:$16 sps:$4 sm:$0xff]   ;;  %v3178_v11 = vld [vmem:[#allocation2 + $0x2c] ss:$16 sps:$4 sm:$0xff]  }
  0x32   :  { %1692 = vmatprep.subr.bf16.mxu0 %v3087_v13  ;;  %v3103_v24 = vld [vmem:[#allocation2 + $0xc4] ss:$16 sps:$4 sm:$0xff]   ;;  %v3107_v26 = vld [vmem:[#allocation2 + $0xc0] ss:$16 sps:$4 sm:$0xff]   ;;  %v3176_v13 = vld [vmem:[#allocation2 + $0x28] ss:$16 sps:$4 sm:$0xff]  }
  0x33   :  { %v3105_v25 = vld [vmem:[#allocation2 + $0x2c4] ss:$16 sps:$4 sm:$0xff]   ;;  %v3108_v27 = vld [vmem:[#allocation2 + $0x2c0] ss:$16 sps:$4 sm:$0xff]  }
  0x34   :  { %1652 = vmatpush1.bf16.msra.mxu1 %v3089_v14  ;;  %v3109_v28 = vld [vmem:[#allocation2 + $0xe4] ss:$16 sps:$4 sm:$0xff]   ;;  %v3113_v30 = vld [vmem:[#allocation2 + $0xe0] ss:$16 sps:$4 sm:$0xff]  }
  0x35   :  { %1693 = vmatpush1.bf16.msra.mxu0 %v3090_v15  ;;  %1653 = vmatprep.subr.bf16.mxu1 %v3091_v16  ;;  %v3111_v29 = vld [vmem:[#allocation2 + $0x2e4] ss:$16 sps:$4 sm:$0xff]   ;;  %v3114_v31 = vld [vmem:[#allocation2 + $0x2e0] ss:$16 sps:$4 sm:$0xff]   ;;  %v3184_v15 = vld [vmem:[#allocation2 + $0x4c] ss:$16 sps:$4 sm:$0xff]  }
  0x36   :  { %1694 = vmatprep.subr.bf16.mxu0 %v3093_v17  ;;  %v3115_v32 = vld [vmem:[#allocation2 + $0x104] ss:$16 sps:$4 sm:$0xff]   ;;  %v3119_v34 = vld [vmem:[#allocation2 + $0x100] ss:$16 sps:$4 sm:$0xff]   ;;  %v3182_v17 = vld [vmem:[#allocation2 + $0x48] ss:$16 sps:$4 sm:$0xff]  }
  0x37   :  { %v3117_v33 = vld [vmem:[#allocation2 + $0x304] ss:$16 sps:$4 sm:$0xff]   ;;  %v3120_v35 = vld [vmem:[#allocation2 + $0x300] ss:$16 sps:$4 sm:$0xff]  }
  0x38   :  { %1654 = vmatpush1.bf16.msra.mxu1 %v3095_v18  ;;  %v3121_v36 = vld [vmem:[#allocation2 + $0x124] ss:$16 sps:$4 sm:$0xff]   ;;  %v3125_v38 = vld [vmem:[#allocation2 + $0x120] ss:$16 sps:$4 sm:$0xff]  }
  0x39   :  { %1695 = vmatpush1.bf16.msra.mxu0 %v3096_v19  ;;  %1655 = vmatprep.subr.bf16.mxu1 %v3097_v20  ;;  %v3123_v37 = vld [vmem:[#allocation2 + $0x324] ss:$16 sps:$4 sm:$0xff]   ;;  %v3126_v39 = vld [vmem:[#allocation2 + $0x320] ss:$16 sps:$4 sm:$0xff]   ;;  %v3190_v19 = vld [vmem:[#allocation2 + $0x6c] ss:$16 sps:$4 sm:$0xff]  }
  0x3a   :  { %1696 = vmatprep.subr.bf16.mxu0 %v3099_v21  ;;  %v3127_v40 = vld [vmem:[#allocation2 + $0x144] ss:$16 sps:$4 sm:$0xff]   ;;  %v3131_v42 = vld [vmem:[#allocation2 + $0x140] ss:$16 sps:$4 sm:$0xff]   ;;  %v3188_v21 = vld [vmem:[#allocation2 + $0x68] ss:$16 sps:$4 sm:$0xff]  }
  0x3b   :  { %v3129_v41 = vld [vmem:[#allocation2 + $0x344] ss:$16 sps:$4 sm:$0xff]   ;;  %v3132_v43 = vld [vmem:[#allocation2 + $0x340] ss:$16 sps:$4 sm:$0xff]  }
  0x3c   :  { %1656 = vmatpush1.bf16.msra.mxu1 %v3101_v22  ;;  %v3133_v44 = vld [vmem:[#allocation2 + $0x164] ss:$16 sps:$4 sm:$0xff]   ;;  %v3137_v49 = vld [vmem:[#allocation2 + $0x160] ss:$16 sps:$4 sm:$0xff]  }
  0x3d   :  { %1697 = vmatpush1.bf16.msra.mxu0 %v3102_v23  ;;  %1657 = vmatprep.subr.bf16.mxu1 %v3103_v24  ;;  %v3135_v45 = vld [vmem:[#allocation2 + $0x364] ss:$16 sps:$4 sm:$0xff]   ;;  %v3138_v50 = vld [vmem:[#allocation2 + $0x360] ss:$16 sps:$4 sm:$0xff]   ;;  %v3196_v23 = vld [vmem:[#allocation2 + $0x8c] ss:$16 sps:$4 sm:$0xff]  }
  0x3e   :  { %1698 = vmatprep.subr.bf16.mxu0 %v3105_v25  ;;  %v55_v46 = vld [vmem:[%s3829_s0] sm:$0xff]  ;;  %v3194_v25 = vld [vmem:[#allocation2 + $0x88] ss:$16 sps:$4 sm:$0xff]  }
  0x3f   :  { %v3696_v47 = vcombine.high %v55_v46, %v55_v46  ;;  %v3139_v52 = vld [vmem:[#allocation2 + $0x184] ss:$16 sps:$4 sm:$0xff]   ;;  %v3143_v54 = vld [vmem:[#allocation2 + $0x180] ss:$16 sps:$4 sm:$0xff]   ;;  %v3705_v6 = vcombine.low %v55_v46, %v55_v46 }
  0x40   :  { %1658 = vmatpush1.bf16.msra.mxu1 %v3107_v26  ;;  %v3141_v53 = vld [vmem:[#allocation2 + $0x384] ss:$16 sps:$4 sm:$0xff]   ;;  %v3144_v55 = vld [vmem:[#allocation2 + $0x380] ss:$16 sps:$4 sm:$0xff]  }
  0x41   :  { %1699 = vmatpush1.bf16.msra.mxu0 %v3108_v27  ;;  %1659 = vmatprep.subr.bf16.mxu1 %v3109_v28  ;;  %v3145_v56 = vld [vmem:[#allocation2 + $0x1a4] ss:$16 sps:$4 sm:$0xff]   ;;  %v3149_v58 = vld [vmem:[#allocation2 + $0x1a0] ss:$16 sps:$4 sm:$0xff]   ;;  %v3202_v27 = vld [vmem:[#allocation2 + $0xac] ss:$16 sps:$4 sm:$0xff]  }
  0x42   :  { %1700 = vmatprep.subr.bf16.mxu0 %v3111_v29  ;;  %1677 = vmatprep.mubr.bf16.mxu1 %v3696_v47  ;;  %v3147_v57 = vld [vmem:[#allocation2 + $0x3a4] ss:$16 sps:$4 sm:$0xff]   ;;  %v3150_v59 = vld [vmem:[#allocation2 + $0x3a0] ss:$16 sps:$4 sm:$0xff]   ;;  %v3200_v29 = vld [vmem:[#allocation2 + $0xa8] ss:$16 sps:$4 sm:$0xff]  }
  0x43   :  { %v3151_v60 = vld [vmem:[#allocation2 + $0x1c4] ss:$16 sps:$4 sm:$0xff]   ;;  %v3155_v62 = vld [vmem:[#allocation2 + $0x1c0] ss:$16 sps:$4 sm:$0xff]  }
  0x44   :  { %1660 = vmatpush1.bf16.msra.mxu1 %v3113_v30  ;;  %v3153_v61 = vld [vmem:[#allocation2 + $0x3c4] ss:$16 sps:$4 sm:$0xff]   ;;  %v3156_v63 = vld [vmem:[#allocation2 + $0x3c0] ss:$16 sps:$4 sm:$0xff]  }
  0x45   :  { %1701 = vmatpush1.bf16.msra.mxu0 %v3114_v31  ;;  %1661 = vmatprep.subr.bf16.mxu1 %v3115_v32  ;;  %v3157_v0 = vld [vmem:[#allocation2 + $0x1e4] ss:$16 sps:$4 sm:$0xff]   ;;  %v3161_v2 = vld [vmem:[#allocation2 + $0x1e0] ss:$16 sps:$4 sm:$0xff]   ;;  %v3208_v31 = vld [vmem:[#allocation2 + $0xcc] ss:$16 sps:$4 sm:$0xff]  }
  0x46   :  { %1702 = vmatprep.subr.bf16.mxu0 %v3117_v33  ;;  %v3159_v1 = vld [vmem:[#allocation2 + $0x3e4] ss:$16 sps:$4 sm:$0xff]   ;;  %v3162_v3 = vld [vmem:[#allocation2 + $0x3e0] ss:$16 sps:$4 sm:$0xff]  }
  0x47   :  { %v3169_v4 = vld [vmem:[#allocation2 + $0x404] ss:$16 sps:$4 sm:$0xff]   ;;  %v3167_v8 = vld [vmem:[#allocation2 + $0x400] ss:$16 sps:$4 sm:$0xff]  }
  0x48   :  { %1662 = vmatpush1.bf16.msra.mxu1 %v3119_v34  ;;  %v3175_v10 = vld [vmem:[#allocation2 + $0x424] ss:$16 sps:$4 sm:$0xff]   ;;  %v3173_v12 = vld [vmem:[#allocation2 + $0x420] ss:$16 sps:$4 sm:$0xff]  }
  0x49   :  { %1703 = vmatpush1.bf16.msra.mxu0 %v3120_v35  ;;  %1663 = vmatprep.subr.bf16.mxu1 %v3121_v36  ;;  %v3181_v14 = vld [vmem:[#allocation2 + $0x444] ss:$16 sps:$4 sm:$0xff]   ;;  %v3179_v16 = vld [vmem:[#allocation2 + $0x440] ss:$16 sps:$4 sm:$0xff]   ;;  %v3206_v35 = vld [vmem:[#allocation2 + $0xc8] ss:$16 sps:$4 sm:$0xff]  }
  0x4a   :  { %1704 = vmatprep.subr.bf16.mxu0 %v3123_v37  ;;  %v3187_v18 = vld [vmem:[#allocation2 + $0x464] ss:$16 sps:$4 sm:$0xff]   ;;  %v3185_v20 = vld [vmem:[#allocation2 + $0x460] ss:$16 sps:$4 sm:$0xff]   ;;  %v3214_v37 = vld [vmem:[#allocation2 + $0xec] ss:$16 sps:$4 sm:$0xff]  }
  0x4b   :  { %v3193_v22 = vld [vmem:[#allocation2 + $0x484] ss:$16 sps:$4 sm:$0xff]   ;;  %v3191_v24 = vld [vmem:[#allocation2 + $0x480] ss:$16 sps:$4 sm:$0xff]  }
  0x4c   :  { %1664 = vmatpush1.bf16.msra.mxu1 %v3125_v38  ;;  %v3199_v26 = vld [vmem:[#allocation2 + $0x4a4] ss:$16 sps:$4 sm:$0xff]   ;;  %v3197_v28 = vld [vmem:[#allocation2 + $0x4a0] ss:$16 sps:$4 sm:$0xff]  }
  0x4d   :  { %1705 = vmatpush1.bf16.msra.mxu0 %v3126_v39  ;;  %1665 = vmatprep.subr.bf16.mxu1 %v3127_v40  ;;  %v3205_v30 = vld [vmem:[#allocation2 + $0x4c4] ss:$16 sps:$4 sm:$0xff]   ;;  %v3203_v33 = vld [vmem:[#allocation2 + $0x4c0] ss:$16 sps:$4 sm:$0xff]   ;;  %v3212_v39 = vld [vmem:[#allocation2 + $0xe8] ss:$16 sps:$4 sm:$0xff]  }
  0x4e   :  { %1706 = vmatprep.subr.bf16.mxu0 %v3129_v41  ;;  %v3715_v32 = vld [vmem:[%s3829_s0 + $0x10] sm:$0xff]  ;;  %v3220_v41 = vld [vmem:[#allocation2 + $0x10c] ss:$16 sps:$4 sm:$0xff]  }
  0x4f   :  { %v3719_v34 = vcombine.high %v3715_v32, %v3715_v32  ;;  %v3211_v36 = vld [vmem:[#allocation2 + $0x4e4] ss:$16 sps:$4 sm:$0xff]   ;;  %v3209_v38 = vld [vmem:[#allocation2 + $0x4e0] ss:$16 sps:$4 sm:$0xff]  }
  0x50   :  { %1666 = vmatpush1.bf16.msra.mxu1 %v3131_v42  ;;  %v3217_v40 = vld [vmem:[#allocation2 + $0x504] ss:$16 sps:$4 sm:$0xff]   ;;  %v3215_v42 = vld [vmem:[#allocation2 + $0x500] ss:$16 sps:$4 sm:$0xff]  }
  0x51   :  { %1707 = vmatpush1.bf16.msra.mxu0 %v3132_v43  ;;  %1667 = vmatprep.subr.bf16.mxu1 %v3133_v44  ;;  %v3218_v43 = vld [vmem:[#allocation2 + $0x108] ss:$16 sps:$4 sm:$0xff]   ;;  %v3223_v44 = vld [vmem:[#allocation2 + $0x524] ss:$16 sps:$4 sm:$0xff]   ;;  %v3221_v46 = vld [vmem:[#allocation2 + $0x520] ss:$16 sps:$4 sm:$0xff]  }
  0x52   :  { %1708 = vmatprep.subr.bf16.mxu0 %v3135_v45  ;;  %v3226_v45 = vld [vmem:[#allocation2 + $0x12c] ss:$16 sps:$4 sm:$0xff]   ;;  %v3229_v48 = vld [vmem:[#allocation2 + $0x544] ss:$16 sps:$4 sm:$0xff]  }
  0x54   :  { %1668 = vmatpush1.bf16.msra.mxu1 %v3137_v49  ;;  %v3232_v49 = vld [vmem:[#allocation2 + $0x14c] ss:$16 sps:$4 sm:$0xff]  }
  0x55   :  { %1709 = vmatpush1.bf16.msra.mxu0 %v3138_v50  ;;  %1669 = vmatprep.subr.bf16.mxu1 %v3139_v52  ;;  %v3227_v50 = vld [vmem:[#allocation2 + $0x540] ss:$16 sps:$4 sm:$0xff]   ;;  %v3230_v52 = vld [vmem:[#allocation2 + $0x148] ss:$16 sps:$4 sm:$0xff]  }
  0x56   :  { %1710 = vmatprep.subr.bf16.mxu0 %v3141_v53  ;;  %v3235_v53 = vld [vmem:[#allocation2 + $0x564] ss:$16 sps:$4 sm:$0xff]  }
  0x58   :  { %1670 = vmatpush1.bf16.msra.mxu1 %v3143_v54  ;;  %v3238_v54 = vld [vmem:[#allocation2 + $0x16c] ss:$16 sps:$4 sm:$0xff]  }
  0x59   :  { %1711 = vmatpush1.bf16.msra.mxu0 %v3144_v55  ;;  %1671 = vmatprep.subr.bf16.mxu1 %v3145_v56  ;;  %v3233_v55 = vld [vmem:[#allocation2 + $0x560] ss:$16 sps:$4 sm:$0xff]   ;;  %v3236_v56 = vld [vmem:[#allocation2 + $0x168] ss:$16 sps:$4 sm:$0xff]  }
  0x5a   :  { %1712 = vmatprep.subr.bf16.mxu0 %v3147_v57  ;;  %v3241_v57 = vld [vmem:[#allocation2 + $0x584] ss:$16 sps:$4 sm:$0xff]  }
  0x5c   :  { %1672 = vmatpush1.bf16.msra.mxu1 %v3149_v58  ;;  %v3244_v58 = vld [vmem:[#allocation2 + $0x18c] ss:$16 sps:$4 sm:$0xff]  }
  0x5d   :  { %1713 = vmatpush1.bf16.msra.mxu0 %v3150_v59  ;;  %1673 = vmatprep.subr.bf16.mxu1 %v3151_v60  ;;  %v3239_v59 = vld [vmem:[#allocation2 + $0x580] ss:$16 sps:$4 sm:$0xff]   ;;  %v3242_v60 = vld [vmem:[#allocation2 + $0x188] ss:$16 sps:$4 sm:$0xff]  }
  0x5e   :  { %1714 = vmatprep.subr.bf16.mxu0 %v3153_v61  ;;  %v3247_v61 = vld [vmem:[#allocation2 + $0x5a4] ss:$16 sps:$4 sm:$0xff]  }
  0x60   :  { %1674 = vmatpush1.bf16.msra.mxu1 %v3155_v62  ;;  %v3250_v62 = vld [vmem:[#allocation2 + $0x1ac] ss:$16 sps:$4 sm:$0xff]  }
  0x61   :  { %1715 = vmatpush1.bf16.msra.mxu0 %v3156_v63  ;;  %1675 = vmatprep.subr.bf16.mxu1 %v3157_v0  ;;  %v3245_v63 = vld [vmem:[#allocation2 + $0x5a0] ss:$16 sps:$4 sm:$0xff]   ;;  %v3248_v0 = vld [vmem:[#allocation2 + $0x1a8] ss:$16 sps:$4 sm:$0xff]  }
  0x62   :  { %1716 = vmatprep.subr.bf16.mxu0 %v3159_v1  ;;  %v3253_v1 = vld [vmem:[#allocation2 + $0x5c4] ss:$16 sps:$4 sm:$0xff]  }
  0x64   :  { %1676 = vmatpush1.bf16.msra.mxu1 %v3161_v2  ;;  %v3256_v2 = vld [vmem:[#allocation2 + $0x1cc] ss:$16 sps:$4 sm:$0xff]  }
  0x65   :  { %1717 = vmatpush1.bf16.msra.mxu0 %v3162_v3  ;;  %1809 = vmatprep.subr.bf16.mxu1 %v3172_v5  ;;  %v3251_v3 = vld [vmem:[#allocation2 + $0x5c0] ss:$16 sps:$4 sm:$0xff]   ;;  %v3259_v5 = vld [vmem:[#allocation2 + $0x5e4] ss:$16 sps:$4 sm:$0xff]  }
  0x66   :  { %1727 = vmatprep.subr.bf16.mxu0 %v3169_v4  ;;  %v3254_v4 = vld [vmem:[#allocation2 + $0x1c8] ss:$16 sps:$4 sm:$0xff]  }
  0x67   :  { %1678 = vmatmul.mubr.bf16.vlgmr.msra.gmra.mrb[0].mxu1 %v3705_v6 }
  0x68   :  { %1719 = vmatmul.mubr.bf16.vlgmr.msra.gmra.mrb[0].mxu0 %v3707_v7  ;;  %1810 = vmatpush1.bf16.msra.mxu1 %v3170_v9  ;;  %v3257_v9 = vld [vmem:[#allocation2 + $0x5e0] ss:$16 sps:$4 sm:$0xff]  }
  0x69   :  { %1728 = vmatpush1.bf16.msra.mxu0 %v3167_v8  ;;  %1811 = vmatprep.subr.bf16.mxu1 %v3178_v11  ;;  %v3262_v8 = vld [vmem:[#allocation2 + $0x1ec] ss:$16 sps:$4 sm:$0xff]   ;;  %v3267_v11 = vld [vmem:[#allocation2 + $0x604] ss:$16 sps:$4 sm:$0xff]  }
  0x6a   :  { %1729 = vmatprep.subr.bf16.mxu0 %v3175_v10  ;;  %1841 = vmatprep.mubr.bf16.mxu1 %v3696_v47  ;;  %v3224_v47 = vld [vmem:[#allocation2 + $0x128] ss:$16 sps:$4 sm:$0xff]  }
  0x6b   :  { %1759 = vmatprep.mubr.bf16.mxu0 %v3719_v34  ;;  %v3260_v10 = vld [vmem:[#allocation2 + $0x1e8] ss:$16 sps:$4 sm:$0xff]  }
  0x6c   :  { %1812 = vmatpush1.bf16.msra.mxu1 %v3176_v13  ;;  %v3724_v13 = vcombine.low %v3715_v32, %v3715_v32  ;;  %v3292_v32 = vld [vmem:[#allocation2 + $0x288] ss:$16 sps:$4 sm:$0xff]  }
  0x6d   :  { %1730 = vmatpush1.bf16.msra.mxu0 %v3173_v12  ;;  %1813 = vmatprep.subr.bf16.mxu1 %v3184_v15  ;;  %v3270_v12 = vld [vmem:[#allocation2 + $0x20c] ss:$16 sps:$4 sm:$0xff]   ;;  %v3268_v15 = vld [vmem:[#allocation2 + $0x208] ss:$16 sps:$4 sm:$0xff]  }
  0x6e   :  { %1731 = vmatprep.subr.bf16.mxu0 %v3181_v14  ;;  %v3265_v14 = vld [vmem:[#allocation2 + $0x600] ss:$16 sps:$4 sm:$0xff]  }
  0x70   :  { %1814 = vmatpush1.bf16.msra.mxu1 %v3182_v17  ;;  %v3276_v17 = vld [vmem:[#allocation2 + $0x22c] ss:$16 sps:$4 sm:$0xff]  }
  0x71   :  { %1732 = vmatpush1.bf16.msra.mxu0 %v3179_v16  ;;  %1815 = vmatprep.subr.bf16.mxu1 %v3190_v19  ;;  %v3273_v16 = vld [vmem:[#allocation2 + $0x624] ss:$16 sps:$4 sm:$0xff]  }
  0x72   :  { %1733 = vmatprep.subr.bf16.mxu0 %v3187_v18  ;;  %v3729_v18 = vld [vmem:[%s3829_s0 + $0x18] sm:$0xff] }
  0x73   :  { %v3733_v19 = vcombine.high %v3729_v18, %v3729_v18 }
  0x74   :  { %1816 = vmatpush1.bf16.msra.mxu1 %v3188_v21  ;;  %v3274_v21 = vld [vmem:[#allocation2 + $0x228] ss:$16 sps:$4 sm:$0xff]  }
  0x75   :  { %1734 = vmatpush1.bf16.msra.mxu0 %v3185_v20  ;;  %1817 = vmatprep.subr.bf16.mxu1 %v3196_v23  ;;  %v3271_v20 = vld [vmem:[#allocation2 + $0x620] ss:$16 sps:$4 sm:$0xff]   ;;  %v3282_v23 = vld [vmem:[#allocation2 + $0x24c] ss:$16 sps:$4 sm:$0xff]  }
  0x76   :  { %1735 = vmatprep.subr.bf16.mxu0 %v3193_v22  ;;  %v3279_v22 = vld [vmem:[#allocation2 + $0x644] ss:$16 sps:$4 sm:$0xff]  }
  0x78   :  { %1818 = vmatpush1.bf16.msra.mxu1 %v3194_v25  ;;  %v3280_v25 = vld [vmem:[#allocation2 + $0x248] ss:$16 sps:$4 sm:$0xff]  }
  0x79   :  { %1736 = vmatpush1.bf16.msra.mxu0 %v3191_v24  ;;  %1819 = vmatprep.subr.bf16.mxu1 %v3202_v27  ;;  %v3277_v24 = vld [vmem:[#allocation2 + $0x640] ss:$16 sps:$4 sm:$0xff]  }
  0x7a   :  { %1737 = vmatprep.subr.bf16.mxu0 %v3199_v26  ;;  %v3285_v26 = vld [vmem:[#allocation2 + $0x664] ss:$16 sps:$4 sm:$0xff]   ;;  %v3283_v27 = vld [vmem:[#allocation2 + $0x660] ss:$16 sps:$4 sm:$0xff]  }
  0x7c   :  { %1820 = vmatpush1.bf16.msra.mxu1 %v3200_v29  ;;  %v3291_v29 = vld [vmem:[#allocation2 + $0x684] ss:$16 sps:$4 sm:$0xff]  }
  0x7d   :  { %1738 = vmatpush1.bf16.msra.mxu0 %v3197_v28  ;;  %1821 = vmatprep.subr.bf16.mxu1 %v3208_v31  ;;  %v3286_v28 = vld [vmem:[#allocation2 + $0x268] ss:$16 sps:$4 sm:$0xff]   ;;  %v3289_v31 = vld [vmem:[#allocation2 + $0x680] ss:$16 sps:$4 sm:$0xff]  }
  0x7e   :  { %1739 = vmatprep.subr.bf16.mxu0 %v3205_v30  ;;  %v3294_v30 = vld [vmem:[#allocation2 + $0x28c] ss:$16 sps:$4 sm:$0xff]  }
  0x80   :  { %1822 = vmatpush1.bf16.msra.mxu1 %v3206_v35  ;;  %v3295_v35 = vld [vmem:[#allocation2 + $0x6a0] ss:$16 sps:$4 sm:$0xff]  }
  0x81   :  { %1740 = vmatpush1.bf16.msra.mxu0 %v3203_v33  ;;  %1823 = vmatprep.subr.bf16.mxu1 %v3214_v37  ;;  %v3300_v33 = vld [vmem:[#allocation2 + $0x2ac] ss:$16 sps:$4 sm:$0xff]   ;;  %v3303_v37 = vld [vmem:[#allocation2 + $0x6c4] ss:$16 sps:$4 sm:$0xff]  }
  0x82   :  { %1741 = vmatprep.subr.bf16.mxu0 %v3211_v36  ;;  %v3298_v36 = vld [vmem:[#allocation2 + $0x2a8] ss:$16 sps:$4 sm:$0xff]  }
  0x84   :  { %1824 = vmatpush1.bf16.msra.mxu1 %v3212_v39  ;;  %v3301_v39 = vld [vmem:[#allocation2 + $0x6c0] ss:$16 sps:$4 sm:$0xff]  }
  0x85   :  { %1742 = vmatpush1.bf16.msra.mxu0 %v3209_v38  ;;  %1825 = vmatprep.subr.bf16.mxu1 %v3220_v41  ;;  %v3306_v38 = vld [vmem:[#allocation2 + $0x2cc] ss:$16 sps:$4 sm:$0xff]   ;;  %v3309_v41 = vld [vmem:[#allocation2 + $0x6e4] ss:$16 sps:$4 sm:$0xff]  }
  0x86   :  { %1743 = vmatprep.subr.bf16.mxu0 %v3217_v40  ;;  %v3304_v40 = vld [vmem:[#allocation2 + $0x2c8] ss:$16 sps:$4 sm:$0xff]  }
  0x88   :  { %1826 = vmatpush1.bf16.msra.mxu1 %v3218_v43  ;;  %v3307_v43 = vld [vmem:[#allocation2 + $0x6e0] ss:$16 sps:$4 sm:$0xff]  }
  0x89   :  { %1744 = vmatpush1.bf16.msra.mxu0 %v3215_v42  ;;  %1827 = vmatprep.subr.bf16.mxu1 %v3226_v45  ;;  %v3312_v42 = vld [vmem:[#allocation2 + $0x2ec] ss:$16 sps:$4 sm:$0xff]   ;;  %v3315_v45 = vld [vmem:[#allocation2 + $0x704] ss:$16 sps:$4 sm:$0xff]  }
  0x8a   :  { %1745 = vmatprep.subr.bf16.mxu0 %v3223_v44  ;;  %v3310_v44 = vld [vmem:[#allocation2 + $0x2e8] ss:$16 sps:$4 sm:$0xff]  }
  0x8c   :  { %1828 = vmatpush1.bf16.msra.mxu1 %v3224_v47  ;;  %v3313_v47 = vld [vmem:[#allocation2 + $0x700] ss:$16 sps:$4 sm:$0xff]  }
  0x8d   :  { %1746 = vmatpush1.bf16.msra.mxu0 %v3221_v46  ;;  %1829 = vmatprep.subr.bf16.mxu1 %v3232_v49  ;;  %v3318_v46 = vld [vmem:[#allocation2 + $0x30c] ss:$16 sps:$4 sm:$0xff]   ;;  %v3321_v49 = vld [vmem:[#allocation2 + $0x724] ss:$16 sps:$4 sm:$0xff]  }
  0x8e   :  { %1747 = vmatprep.subr.bf16.mxu0 %v3229_v48  ;;  %v3316_v48 = vld [vmem:[#allocation2 + $0x308] ss:$16 sps:$4 sm:$0xff]  }
  0x90   :  { %1830 = vmatpush1.bf16.msra.mxu1 %v3230_v52  ;;  %v3319_v52 = vld [vmem:[#allocation2 + $0x720] ss:$16 sps:$4 sm:$0xff]  }
  0x91   :  { %1748 = vmatpush1.bf16.msra.mxu0 %v3227_v50  ;;  %1831 = vmatprep.subr.bf16.mxu1 %v3238_v54  ;;  %v3324_v50 = vld [vmem:[#allocation2 + $0x32c] ss:$16 sps:$4 sm:$0xff]   ;;  %v3327_v54 = vld [vmem:[#allocation2 + $0x744] ss:$16 sps:$4 sm:$0xff]  }
  0x92   :  { %1749 = vmatprep.subr.bf16.mxu0 %v3235_v53  ;;  %v3322_v53 = vld [vmem:[#allocation2 + $0x328] ss:$16 sps:$4 sm:$0xff]  }
  0x94   :  { %1832 = vmatpush1.bf16.msra.mxu1 %v3236_v56  ;;  %v3325_v56 = vld [vmem:[#allocation2 + $0x740] ss:$16 sps:$4 sm:$0xff]  }
  0x95   :  { %1750 = vmatpush1.bf16.msra.mxu0 %v3233_v55  ;;  %1833 = vmatprep.subr.bf16.mxu1 %v3244_v58  ;;  %v3330_v55 = vld [vmem:[#allocation2 + $0x34c] ss:$16 sps:$4 sm:$0xff]   ;;  %v3333_v58 = vld [vmem:[#allocation2 + $0x764] ss:$16 sps:$4 sm:$0xff]  }
  0x96   :  { %1751 = vmatprep.subr.bf16.mxu0 %v3241_v57  ;;  %v3328_v57 = vld [vmem:[#allocation2 + $0x348] ss:$16 sps:$4 sm:$0xff]  }
  0x98   :  { %1834 = vmatpush1.bf16.msra.mxu1 %v3242_v60  ;;  %v3331_v60 = vld [vmem:[#allocation2 + $0x760] ss:$16 sps:$4 sm:$0xff]  }
  0x99   :  { %1752 = vmatpush1.bf16.msra.mxu0 %v3239_v59  ;;  %1835 = vmatprep.subr.bf16.mxu1 %v3250_v62  ;;  %v3336_v59 = vld [vmem:[#allocation2 + $0x36c] ss:$16 sps:$4 sm:$0xff]   ;;  %v3339_v62 = vld [vmem:[#allocation2 + $0x784] ss:$16 sps:$4 sm:$0xff]  }
  0x9a   :  { %1753 = vmatprep.subr.bf16.mxu0 %v3247_v61  ;;  %v3334_v61 = vld [vmem:[#allocation2 + $0x368] ss:$16 sps:$4 sm:$0xff]  }
  0x9c   :  { %1836 = vmatpush1.bf16.msra.mxu1 %v3248_v0  ;;  %v3337_v0 = vld [vmem:[#allocation2 + $0x780] ss:$16 sps:$4 sm:$0xff]  }
  0x9d   :  { %1754 = vmatpush1.bf16.msra.mxu0 %v3245_v63  ;;  %1837 = vmatprep.subr.bf16.mxu1 %v3256_v2  ;;  %v3342_v63 = vld [vmem:[#allocation2 + $0x38c] ss:$16 sps:$4 sm:$0xff]   ;;  %v3345_v2 = vld [vmem:[#allocation2 + $0x7a4] ss:$16 sps:$4 sm:$0xff]  }
  0x9e   :  { %1755 = vmatprep.subr.bf16.mxu0 %v3253_v1  ;;  %v3340_v1 = vld [vmem:[#allocation2 + $0x388] ss:$16 sps:$4 sm:$0xff]  }
  0xa0   :  { %1838 = vmatpush1.bf16.msra.mxu1 %v3254_v4  ;;  %v3343_v4 = vld [vmem:[#allocation2 + $0x7a0] ss:$16 sps:$4 sm:$0xff]  }
  0xa1   :  { %1756 = vmatpush1.bf16.msra.mxu0 %v3251_v3  ;;  %1839 = vmatprep.subr.bf16.mxu1 %v3262_v8  ;;  %v3348_v3 = vld [vmem:[#allocation2 + $0x3ac] ss:$16 sps:$4 sm:$0xff]   ;;  %v3351_v8 = vld [vmem:[#allocation2 + $0x7c4] ss:$16 sps:$4 sm:$0xff]  }
  0xa2   :  { %1757 = vmatprep.subr.bf16.mxu0 %v3259_v5  ;;  %v3346_v5 = vld [vmem:[#allocation2 + $0x3a8] ss:$16 sps:$4 sm:$0xff]  }
  0xa4   :  { %1840 = vmatpush1.bf16.msra.mxu1 %v3260_v10  ;;  %v3349_v10 = vld [vmem:[#allocation2 + $0x7c0] ss:$16 sps:$4 sm:$0xff]  }
  0xa5   :  { %1758 = vmatpush1.bf16.msra.mxu0 %v3257_v9  ;;  %1850 = vmatprep.subr.bf16.mxu1 %v3270_v12  ;;  %v3354_v9 = vld [vmem:[#allocation2 + $0x3cc] ss:$16 sps:$4 sm:$0xff]   ;;  %v3357_v12 = vld [vmem:[#allocation2 + $0x7e4] ss:$16 sps:$4 sm:$0xff]  }
  0xa6   :  { %1768 = vmatprep.subr.bf16.mxu0 %v3267_v11  ;;  %v3352_v11 = vld [vmem:[#allocation2 + $0x3c8] ss:$16 sps:$4 sm:$0xff]  }
  0xa7   :  { %1842 = vmatmul.mubr.bf16.vlgmr.msra.gmra.mrb[4].mxu1 %v3705_v6  ;;  %v3288_v6 = vld [vmem:[#allocation2 + $0x26c] ss:$16 sps:$4 sm:$0xff]  }
  0xa8   :  { %1760 = vmatmul.mubr.bf16.vlgmr.msra.gmra.mrb[0].mxu0 %v3724_v13  ;;  %1851 = vmatpush1.bf16.msra.mxu1 %v3268_v15  ;;  %v3355_v15 = vld [vmem:[#allocation2 + $0x7e0] ss:$16 sps:$4 sm:$0xff]  }
  0xa9   :  { %1769 = vmatpush1.bf16.msra.mxu0 %v3265_v14  ;;  %1852 = vmatprep.subr.bf16.mxu1 %v3276_v17  ;;  %v3360_v14 = vld [vmem:[#allocation2 + $0x3ec] ss:$16 sps:$4 sm:$0xff]  }
  0xaa   :  { %1770 = vmatprep.subr.bf16.mxu0 %v3273_v16  ;;  %1800 = vmatprep.mubr.bf16.mxu0 %v3733_v19  ;;  %v3358_v16 = vld [vmem:[#allocation2 + $0x3e8] ss:$16 sps:$4 sm:$0xff]   ;;  %v3365_v17 = vld [vmem:[#allocation2 + $0x40c] ss:$16 sps:$4 sm:$0xff]  }
  0xab   :  { %1882 = vmatprep.mubr.bf16.mxu1 %v3701_v51  ;;  %v3297_v51 = vld [vmem:[#allocation2 + $0x6a4] ss:$16 sps:$4 sm:$0xff]  }
  0xac   :  { %1853 = vmatpush1.bf16.msra.mxu1 %v3274_v21  ;;  %v3741_v21 = vcombine.low %v3729_v18, %v3729_v18  ;;  %v3462_v18 = vld [vmem:[#allocation4 + $0x10] ss:$8 sps:$4 sm:$0xff]  }
  0xad   :  { %1771 = vmatpush1.bf16.msra.mxu0 %v3271_v20  ;;  %1854 = vmatprep.subr.bf16.mxu1 %v3282_v23  ;;  %v3363_v20 = vld [vmem:[#allocation2 + $0x408] ss:$16 sps:$4 sm:$0xff]  }
  0xae   :  { %1772 = vmatprep.subr.bf16.mxu0 %v3279_v22  ;;  %v3368_v22 = vld [vmem:[#allocation2 + $0x42c] ss:$16 sps:$4 sm:$0xff]   ;;  %v3459_v23 = vld [vmem:[#allocation4] ss:$8 sps:$4 sm:$0xff]  }
  0xb0   :  { %1855 = vmatpush1.bf16.msra.mxu1 %v3280_v25  ;;  %v3366_v25 = vld [vmem:[#allocation2 + $0x428] ss:$16 sps:$4 sm:$0xff]  }
  0xb1   :  { %1773 = vmatpush1.bf16.msra.mxu0 %v3277_v24  ;;  %1856 = vmatprep.subr.bf16.mxu1 %v3288_v6  ;;  %v3461_v24 = vld [vmem:[#allocation4 + $0x4] ss:$8 sps:$4 sm:$0xff]  }
  0xb2   :  { %1774 = vmatprep.subr.bf16.mxu0 %v3285_v26  ;;  %v3464_v26 = vld [vmem:[#allocation4 + $0x14] ss:$8 sps:$4 sm:$0xff]  }
  0xb3   :  { %v3371_v6 = vld [vmem:[#allocation2 + $0x44c] ss:$16 sps:$4 sm:$0xff]  }
  0xb4   :  { %1857 = vmatpush1.bf16.msra.mxu1 %v3286_v28  ;;  %v3369_v28 = vld [vmem:[#allocation2 + $0x448] ss:$16 sps:$4 sm:$0xff]  }
  0xb5   :  { %1775 = vmatpush1.bf16.msra.mxu0 %v3283_v27  ;;  %1858 = vmatprep.subr.bf16.mxu1 %v3294_v30  ;;  %v3467_v27 = vld [vmem:[#allocation4 + $0x24] ss:$8 sps:$4 sm:$0xff]   ;;  %v3372_v30 = vld [vmem:[#allocation2 + $0x468] ss:$16 sps:$4 sm:$0xff]  }
  0xb6   :  { %1776 = vmatprep.subr.bf16.mxu0 %v3291_v29  ;;  %v3374_v29 = vld [vmem:[#allocation2 + $0x46c] ss:$16 sps:$4 sm:$0xff]  }
  0xb8   :  { %1859 = vmatpush1.bf16.msra.mxu1 %v3292_v32  ;;  %v3470_v32 = vld [vmem:[#allocation4 + $0x34] ss:$8 sps:$4 sm:$0xff]  }
  0xb9   :  { %1777 = vmatpush1.bf16.msra.mxu0 %v3289_v31  ;;  %1860 = vmatprep.subr.bf16.mxu1 %v3300_v33  ;;  %v3377_v31 = vld [vmem:[#allocation2 + $0x48c] ss:$16 sps:$4 sm:$0xff]   ;;  %v3375_v33 = vld [vmem:[#allocation2 + $0x488] ss:$16 sps:$4 sm:$0xff]  }
  0xba   :  { %1778 = vmatprep.subr.bf16.mxu0 %v3297_v51  ;;  %v3473_v51 = vld [vmem:[#allocation4 + $0x44] ss:$8 sps:$4 sm:$0xff]  }
  0xbc   :  { %1861 = vmatpush1.bf16.msra.mxu1 %v3298_v36  ;;  %v3471_v36 = vld [vmem:[#allocation4 + $0x40] ss:$8 sps:$4 sm:$0xff]  }
  0xbd   :  { %1779 = vmatpush1.bf16.msra.mxu0 %v3295_v35  ;;  %1862 = vmatprep.subr.bf16.mxu1 %v3306_v38  ;;  %v3380_v35 = vld [vmem:[#allocation2 + $0x4ac] ss:$16 sps:$4 sm:$0xff]   ;;  %v3378_v38 = vld [vmem:[#allocation2 + $0x4a8] ss:$16 sps:$4 sm:$0xff]  }
  0xbe   :  { %1780 = vmatprep.subr.bf16.mxu0 %v3303_v37  ;;  %v3476_v37 = vld [vmem:[#allocation4 + $0x54] ss:$8 sps:$4 sm:$0xff]  }
  0xc0   :  { %1863 = vmatpush1.bf16.msra.mxu1 %v3304_v40  ;;  %v3474_v40 = vld [vmem:[#allocation4 + $0x50] ss:$8 sps:$4 sm:$0xff]  }
  0xc1   :  { %1781 = vmatpush1.bf16.msra.mxu0 %v3301_v39  ;;  %1864 = vmatprep.subr.bf16.mxu1 %v3312_v42  ;;  %v3383_v39 = vld [vmem:[#allocation2 + $0x4cc] ss:$16 sps:$4 sm:$0xff]   ;;  %v3381_v42 = vld [vmem:[#allocation2 + $0x4c8] ss:$16 sps:$4 sm:$0xff]  }
  0xc2   :  { %1782 = vmatprep.subr.bf16.mxu0 %v3309_v41  ;;  %v3479_v41 = vld [vmem:[#allocation4 + $0x64] ss:$8 sps:$4 sm:$0xff]  }
  0xc4   :  { %1865 = vmatpush1.bf16.msra.mxu1 %v3310_v44  ;;  %v3477_v44 = vld [vmem:[#allocation4 + $0x60] ss:$8 sps:$4 sm:$0xff]  }
  0xc5   :  { %1783 = vmatpush1.bf16.msra.mxu0 %v3307_v43  ;;  %1866 = vmatprep.subr.bf16.mxu1 %v3318_v46  ;;  %v3386_v43 = vld [vmem:[#allocation2 + $0x4ec] ss:$16 sps:$4 sm:$0xff]   ;;  %v3384_v46 = vld [vmem:[#allocation2 + $0x4e8] ss:$16 sps:$4 sm:$0xff]  }
  0xc6   :  { %1784 = vmatprep.subr.bf16.mxu0 %v3315_v45  ;;  %v3482_v45 = vld [vmem:[#allocation4 + $0x74] ss:$8 sps:$4 sm:$0xff]  }
  0xc8   :  { %1867 = vmatpush1.bf16.msra.mxu1 %v3316_v48  ;;  %v3480_v48 = vld [vmem:[#allocation4 + $0x70] ss:$8 sps:$4 sm:$0xff]  }
  0xc9   :  { %1785 = vmatpush1.bf16.msra.mxu0 %v3313_v47  ;;  %1868 = vmatprep.subr.bf16.mxu1 %v3324_v50  ;;  %v3389_v47 = vld [vmem:[#allocation2 + $0x50c] ss:$16 sps:$4 sm:$0xff]   ;;  %v3387_v50 = vld [vmem:[#allocation2 + $0x508] ss:$16 sps:$4 sm:$0xff]  }
  0xca   :  { %1786 = vmatprep.subr.bf16.mxu0 %v3321_v49  ;;  %v3485_v49 = vld [vmem:[#allocation4 + $0x84] ss:$8 sps:$4 sm:$0xff]  }
  0xcc   :  { %1869 = vmatpush1.bf16.msra.mxu1 %v3322_v53  ;;  %v3483_v53 = vld [vmem:[#allocation4 + $0x80] ss:$8 sps:$4 sm:$0xff]  }
  0xcd   :  { %1787 = vmatpush1.bf16.msra.mxu0 %v3319_v52  ;;  %1870 = vmatprep.subr.bf16.mxu1 %v3330_v55  ;;  %v3392_v52 = vld [vmem:[#allocation2 + $0x52c] ss:$16 sps:$4 sm:$0xff]   ;;  %v3390_v55 = vld [vmem:[#allocation2 + $0x528] ss:$16 sps:$4 sm:$0xff]  }
  0xce   :  { %1788 = vmatprep.subr.bf16.mxu0 %v3327_v54  ;;  %v3488_v54 = vld [vmem:[#allocation4 + $0x94] ss:$8 sps:$4 sm:$0xff]  }
  0xd0   :  { %1871 = vmatpush1.bf16.msra.mxu1 %v3328_v57  ;;  %v3486_v57 = vld [vmem:[#allocation4 + $0x90] ss:$8 sps:$4 sm:$0xff]  }
  0xd1   :  { %1789 = vmatpush1.bf16.msra.mxu0 %v3325_v56  ;;  %1872 = vmatprep.subr.bf16.mxu1 %v3336_v59  ;;  %v3395_v56 = vld [vmem:[#allocation2 + $0x54c] ss:$16 sps:$4 sm:$0xff]   ;;  %v3393_v59 = vld [vmem:[#allocation2 + $0x548] ss:$16 sps:$4 sm:$0xff]  }
  0xd2   :  { %1790 = vmatprep.subr.bf16.mxu0 %v3333_v58  ;;  %v3491_v58 = vld [vmem:[#allocation4 + $0xa4] ss:$8 sps:$4 sm:$0xff]  }
  0xd4   :  { %1873 = vmatpush1.bf16.msra.mxu1 %v3334_v61  ;;  %v3489_v61 = vld [vmem:[#allocation4 + $0xa0] ss:$8 sps:$4 sm:$0xff]  }
  0xd5   :  { %1791 = vmatpush1.bf16.msra.mxu0 %v3331_v60  ;;  %1874 = vmatprep.subr.bf16.mxu1 %v3342_v63  ;;  %v3398_v60 = vld [vmem:[#allocation2 + $0x56c] ss:$16 sps:$4 sm:$0xff]   ;;  %v3396_v63 = vld [vmem:[#allocation2 + $0x568] ss:$16 sps:$4 sm:$0xff]  }
  0xd6   :  { %1792 = vmatprep.subr.bf16.mxu0 %v3339_v62  ;;  %v3494_v62 = vld [vmem:[#allocation4 + $0xb4] ss:$8 sps:$4 sm:$0xff]  }
  0xd8   :  { %1875 = vmatpush1.bf16.msra.mxu1 %v3340_v1  ;;  %v3492_v1 = vld [vmem:[#allocation4 + $0xb0] ss:$8 sps:$4 sm:$0xff]  }
  0xd9   :  { %1793 = vmatpush1.bf16.msra.mxu0 %v3337_v0  ;;  %1876 = vmatprep.subr.bf16.mxu1 %v3348_v3  ;;  %v3401_v0 = vld [vmem:[#allocation2 + $0x58c] ss:$16 sps:$4 sm:$0xff]   ;;  %v3399_v3 = vld [vmem:[#allocation2 + $0x588] ss:$16 sps:$4 sm:$0xff]  }
  0xda   :  { %1794 = vmatprep.subr.bf16.mxu0 %v3345_v2  ;;  %v3497_v2 = vld [vmem:[#allocation4 + $0xc4] ss:$8 sps:$4 sm:$0xff]  }
  0xdc   :  { %1877 = vmatpush1.bf16.msra.mxu1 %v3346_v5  ;;  %v3495_v5 = vld [vmem:[#allocation4 + $0xc0] ss:$8 sps:$4 sm:$0xff]  }
  0xdd   :  { %1795 = vmatpush1.bf16.msra.mxu0 %v3343_v4  ;;  %1878 = vmatprep.subr.bf16.mxu1 %v3354_v9  ;;  %v3404_v4 = vld [vmem:[#allocation2 + $0x5ac] ss:$16 sps:$4 sm:$0xff]   ;;  %v3402_v9 = vld [vmem:[#allocation2 + $0x5a8] ss:$16 sps:$4 sm:$0xff]  }
  0xde   :  { %1796 = vmatprep.subr.bf16.mxu0 %v3351_v8  ;;  %v3500_v8 = vld [vmem:[#allocation4 + $0xd4] ss:$8 sps:$4 sm:$0xff]  }
  0xe0   :  { %1879 = vmatpush1.bf16.msra.mxu1 %v3352_v11  ;;  %v3498_v11 = vld [vmem:[#allocation4 + $0xd0] ss:$8 sps:$4 sm:$0xff]  }
  0xe1   :  { %1797 = vmatpush1.bf16.msra.mxu0 %v3349_v10  ;;  %1880 = vmatprep.subr.bf16.mxu1 %v3360_v14  ;;  %v3407_v10 = vld [vmem:[#allocation2 + $0x5cc] ss:$16 sps:$4 sm:$0xff]  }
  0xe2   :  { %1798 = vmatprep.subr.bf16.mxu0 %v3357_v12  ;;  %v3405_v12 = vld [vmem:[#allocation2 + $0x5c8] ss:$16 sps:$4 sm:$0xff]   ;;  %v3410_v14 = vld [vmem:[#allocation2 + $0x5ec] ss:$16 sps:$4 sm:$0xff]  }
  0xe4   :  { %1881 = vmatpush1.bf16.msra.mxu1 %v3358_v16  ;;  %v3413_v16 = vld [vmem:[#allocation2 + $0x60c] ss:$16 sps:$4 sm:$0xff]  }
  0xe5   :  { %1799 = vmatpush1.bf16.msra.mxu0 %v3355_v15  ;;  %1891 = vmatprep.subr.bf16.mxu1 %v3365_v17  ;;  %v3408_v15 = vld [vmem:[#allocation2 + $0x5e8] ss:$16 sps:$4 sm:$0xff]  }
  0xe6   :  { %2385 = vmatprep.subr.bf16.mxu0 %v3461_v24  ;;  %v3411_v17 = vld [vmem:[#allocation2 + $0x608] ss:$16 sps:$4 sm:$0xff]  }
  0xe7   :  { %1883 = vmatmul.mubr.bf16.vlgmr.msra.gmra.mrb[4].mxu1 %v3707_v7  ;;  %v3465_v7 = vld [vmem:[#allocation4 + $0x20] ss:$8 sps:$4 sm:$0xff]  }
  0xe8   :  { %1801 = vmatmul.mubr.bf16.vlgmr.msra.gmra.mrb[0].mxu0 %v3741_v21  ;;  %1892 = vmatpush1.bf16.msra.mxu1 %v3363_v20  ;;  %v3416_v20 = vld [vmem:[#allocation2 + $0x62c] ss:$16 sps:$4 sm:$0xff]   ;;  %v3417_v24 = vld [vmem:[#allocation2 + $0x648] ss:$16 sps:$4 sm:$0xff]  }
  0xe9   :  { %1923 = vmatprep.mubr.bf16.mxu1 %v3719_v34  ;;  %1893 = vmatprep.subr.bf16.mxu1 %v3368_v22  ;;  %v3468_v34 = vld [vmem:[#allocation4 + $0x30] ss:$8 sps:$4 sm:$0xff]  }
  0xea   :  { %2386 = vmatpush1.bf16.msra.mxu0 %v3459_v23  ;;  %v3414_v22 = vld [vmem:[#allocation2 + $0x628] ss:$16 sps:$4 sm:$0xff]   ;;  %v3419_v23 = vld [vmem:[#allocation2 + $0x64c] ss:$16 sps:$4 sm:$0xff]  }
  0xeb   :  { %2387 = vmatprep.subr.bf16.mxu0 %v3464_v26  ;;  %v3420_v26 = vld [vmem:[#allocation2 + $0x668] ss:$16 sps:$4 sm:$0xff]  }
  0xec   :  { %1894 = vmatpush1.bf16.msra.mxu1 %v3366_v25  ;;  %v3422_v25 = vld [vmem:[#allocation2 + $0x66c] ss:$16 sps:$4 sm:$0xff]  }
  0xed   :  { %1895 = vmatprep.subr.bf16.mxu1 %v3371_v6  ;;  %v3425_v6 = vld [vmem:[#allocation2 + $0x68c] ss:$16 sps:$4 sm:$0xff]  }
  0xee   :  { %2388 = vmatpush1.bf16.msra.mxu0 %v3462_v18  ;;  %v3423_v18 = vld [vmem:[#allocation2 + $0x688] ss:$16 sps:$4 sm:$0xff]  }
  0xef   :  { %2389 = vmatprep.subr.bf16.mxu0 %v3467_v27  ;;  %v3428_v27 = vld [vmem:[#allocation2 + $0x6ac] ss:$16 sps:$4 sm:$0xff]  }
  0xf0   :  { %1896 = vmatpush1.bf16.msra.mxu1 %v3369_v28  ;;  %v3431_v28 = vld [vmem:[#allocation2 + $0x6cc] ss:$16 sps:$4 sm:$0xff]  }
  0xf1   :  { %1897 = vmatprep.subr.bf16.mxu1 %v3374_v29 }
  0xf2   :  { %2390 = vmatpush1.bf16.msra.mxu0 %v3465_v7 }
  0xf3   :  { %2391 = vmatprep.subr.bf16.mxu0 %v3470_v32  ;;  %v3429_v32 = vld [vmem:[#allocation2 + $0x6c8] ss:$16 sps:$4 sm:$0xff]  }
  0xf4   :  { %1898 = vmatpush1.bf16.msra.mxu1 %v3372_v30  ;;  %v3501_v30 = vld [vmem:[#allocation4 + $0xe0] ss:$8 sps:$4 sm:$0xff]  }
  0xf5   :  { %1899 = vmatprep.subr.bf16.mxu1 %v3377_v31 }
  0xf6   :  { %2392 = vmatpush1.bf16.msra.mxu0 %v3468_v34 }
  0xf7   :  { %2393 = vmatprep.subr.bf16.mxu0 %v3473_v51  ;;  %v3434_v51 = vld [vmem:[#allocation2 + $0x6ec] ss:$16 sps:$4 sm:$0xff]  }
  0xf8   :  { %1900 = vmatpush1.bf16.msra.mxu1 %v3375_v33  ;;  %v3506_v33 = vld [vmem:[#allocation4 + $0xf4] ss:$8 sps:$4 sm:$0xff]  }
  0xf9   :  { %1901 = vmatprep.subr.bf16.mxu1 %v3380_v35  ;;  %v3504_v35 = vld [vmem:[#allocation4 + $0xf0] ss:$8 sps:$4 sm:$0xff]  }
  0xfa   :  { %2394 = vmatpush1.bf16.msra.mxu0 %v3471_v36  ;;  %v3432_v36 = vld [vmem:[#allocation2 + $0x6e8] ss:$16 sps:$4 sm:$0xff]  }
  0xfb   :  { %2395 = vmatprep.subr.bf16.mxu0 %v3476_v37  ;;  %v3437_v37 = vld [vmem:[#allocation2 + $0x70c] ss:$16 sps:$4 sm:$0xff]  }
  0xfc   :  { %1902 = vmatpush1.bf16.msra.mxu1 %v3378_v38  ;;  %v3435_v38 = vld [vmem:[#allocation2 + $0x708] ss:$16 sps:$4 sm:$0xff]  }
  0xfd   :  { %1903 = vmatprep.subr.bf16.mxu1 %v3383_v39  ;;  %v3509_v39 = vld [vmem:[#allocation4 + $0x104] ss:$8 sps:$4 sm:$0xff]  }
  0xfe   :  { %2396 = vmatpush1.bf16.msra.mxu0 %v3474_v40  ;;  %v3440_v40 = vld [vmem:[#allocation2 + $0x72c] ss:$16 sps:$4 sm:$0xff]  }
  0xff   :  { %2397 = vmatprep.subr.bf16.mxu0 %v3479_v41  ;;  %v3438_v41 = vld [vmem:[#allocation2 + $0x728] ss:$16 sps:$4 sm:$0xff]  }
 0x100   :  { %1904 = vmatpush1.bf16.msra.mxu1 %v3381_v42  ;;  %v3443_v42 = vld [vmem:[#allocation2 + $0x74c] ss:$16 sps:$4 sm:$0xff]  }
 0x101   :  { %1905 = vmatprep.subr.bf16.mxu1 %v3386_v43  ;;  %v3441_v43 = vld [vmem:[#allocation2 + $0x748] ss:$16 sps:$4 sm:$0xff]  }
 0x102   :  { %2398 = vmatpush1.bf16.msra.mxu0 %v3477_v44  ;;  %v3446_v44 = vld [vmem:[#allocation2 + $0x76c] ss:$16 sps:$4 sm:$0xff]  }
 0x103   :  { %2399 = vmatprep.subr.bf16.mxu0 %v3482_v45  ;;  %v3444_v45 = vld [vmem:[#allocation2 + $0x768] ss:$16 sps:$4 sm:$0xff]  }
 0x104   :  { %1906 = vmatpush1.bf16.msra.mxu1 %v3384_v46  ;;  %v3449_v46 = vld [vmem:[#allocation2 + $0x78c] ss:$16 sps:$4 sm:$0xff]  }
 0x105   :  { %1907 = vmatprep.subr.bf16.mxu1 %v3389_v47  ;;  %v3447_v47 = vld [vmem:[#allocation2 + $0x788] ss:$16 sps:$4 sm:$0xff]  }
 0x106   :  { %2400 = vmatpush1.bf16.msra.mxu0 %v3480_v48  ;;  %v3452_v48 = vld [vmem:[#allocation2 + $0x7ac] ss:$16 sps:$4 sm:$0xff]  }
 0x107   :  { %2401 = vmatprep.subr.bf16.mxu0 %v3485_v49  ;;  %v3450_v49 = vld [vmem:[#allocation2 + $0x7a8] ss:$16 sps:$4 sm:$0xff]  }
 0x108   :  { %1908 = vmatpush1.bf16.msra.mxu1 %v3387_v50  ;;  %v3455_v50 = vld [vmem:[#allocation2 + $0x7cc] ss:$16 sps:$4 sm:$0xff]  }
 0x109   :  { %1909 = vmatprep.subr.bf16.mxu1 %v3392_v52  ;;  %v3453_v52 = vld [vmem:[#allocation2 + $0x7c8] ss:$16 sps:$4 sm:$0xff]  }
 0x10a   :  { %2402 = vmatpush1.bf16.msra.mxu0 %v3483_v53  ;;  %v3458_v53 = vld [vmem:[#allocation2 + $0x7ec] ss:$16 sps:$4 sm:$0xff]  }
 0x10b   :  { %2403 = vmatprep.subr.bf16.mxu0 %v3488_v54  ;;  %v3456_v54 = vld [vmem:[#allocation2 + $0x7e8] ss:$16 sps:$4 sm:$0xff]  }
 0x10c   :  { %1910 = vmatpush1.bf16.msra.mxu1 %v3390_v55  ;;  %v317_v55 = vlaneseq }
 0x10d   :  { %1911 = vmatprep.subr.bf16.mxu1 %v3395_v56 }
 0x10e   :  { %2404 = vmatpush1.bf16.msra.mxu0 %v3486_v57  ;;  %v3749_v56 = vshrl.u32 %v317_v55, 7 }
 0x10f   :  { %2405 = vmatprep.subr.bf16.mxu0 %v3491_v58  ;;  %v3755_v58 = vld [vmem:[%s3831_s2] sm:$0xf] }
 0x110   :  { %1912 = vmatpush1.bf16.msra.mxu1 %v3393_v59  ;;  %v319_v57 = vsub.s32 0, %v3749_v56  ;;  %v323_v59 = vsub.s32 1, %v3749_v56  ;;  %v327_v55 = vsub.s32 2, %v3749_v56 }
 0x111   :  { %1913 = vmatprep.subr.bf16.mxu1 %v3398_v60 }
 0x112   :  { %2406 = vmatpush1.bf16.msra.mxu0 %v3489_v61  ;;  %v320_v60 = vrot.slane %v3755_v58, %v319_v57 }
 0x113   :  { %2407 = vmatprep.subr.bf16.mxu0 %v3494_v62 }
 0x114   :  { %1914 = vmatpush1.bf16.msra.mxu1 %v3396_v63 }
 0x115   :  { %1915 = vmatprep.subr.bf16.mxu1 %v3401_v0 }
 0x116   :  { %2408 = vmatpush1.bf16.msra.mxu0 %v3492_v1 }
 0x117   :  { %2409 = vmatprep.subr.bf16.mxu0 %v3497_v2 }
 0x118   :  { %1916 = vmatpush1.bf16.msra.mxu1 %v3399_v3 }
 0x119   :  { %1917 = vmatprep.subr.bf16.mxu1 %v3404_v4 }
 0x11a   :  { %2410 = vmatpush1.bf16.msra.mxu0 %v3495_v5 }
 0x11b   :  { %2411 = vmatprep.subr.bf16.mxu0 %v3500_v8 }
 0x11c   :  { %1918 = vmatpush1.bf16.msra.mxu1 %v3402_v9 }
 0x11d   :  { %1919 = vmatprep.subr.bf16.mxu1 %v3407_v10 }
 0x11e   :  { %2412 = vmatpush1.bf16.msra.mxu0 %v3498_v11 }
 0x120   :  { %1920 = vmatpush1.bf16.msra.mxu1 %v3405_v12  ;;  %v3507_v12 = vld [vmem:[#allocation4 + $0x100] ss:$8 sps:$4 sm:$0xff]  }
 0x121   :  { %1921 = vmatprep.subr.bf16.mxu1 %v3410_v14 }
 0x124   :  { %1922 = vmatpush1.bf16.msra.mxu1 %v3408_v15  ;;  %v3512_v15 = vld [vmem:[#allocation4 + $0x114] ss:$8 sps:$4 sm:$0xff]  }
 0x125   :  { %1932 = vmatprep.subr.bf16.mxu1 %v3413_v16  ;;  %v3555_v16 = vld [vmem:[%s3834_s5 + $0x40] sm:$0xff]  }
 0x127   :  { %1924 = vmatmul.mubr.bf16.vlgmr.msra.gmra.mrb[4].mxu1 %v3724_v13  ;;  %v3426_v13 = vld [vmem:[#allocation2 + $0x6a8] ss:$16 sps:$4 sm:$0xff]  }
 0x128   :  { %1933 = vmatpush1.bf16.msra.mxu1 %v3411_v17  ;;  %1964 = vmatprep.mubr.bf16.mxu1 %v3733_v19  ;;  %v3503_v19 = vld [vmem:[#allocation4 + $0xe4] ss:$8 sps:$4 sm:$0xff]  }
 0x129   :  { %1934 = vmatprep.subr.bf16.mxu1 %v3416_v20  ;;  %2413 = vmatprep.subr.bf16.mxu0 %v3503_v19  ;;  %v3556_v17 = vld [vmem:[%s3834_s5] sm:$0xff]   ;;  %v3557_v20 = vld [vmem:[%s3834_s5 + $0x48] sm:$0xff]  }
 0x12a   :  { %2414 = vmatpush1.bf16.msra.mxu0 %v3501_v30  ;;  %v3563_v19 = vld [vmem:[%s3834_s5 + $0x60] sm:$0xff]   ;;  %v3524_v30 = vld [vmem:[#allocation4 + $0x154] ss:$8 sps:$4 sm:$0xff]  }
 0x12b   :  { %2415 = vmatprep.subr.bf16.mxu0 %v3506_v33  ;;  %v3566_v33 = vld [vmem:[%s3834_s5 + $0x28] sm:$0xff]  }
 0x12c   :  { %1935 = vmatpush1.bf16.msra.mxu1 %v3414_v22  ;;  %v3510_v22 = vld [vmem:[#allocation4 + $0x110] ss:$8 sps:$4 sm:$0xff]  }
 0x12d   :  { %1936 = vmatprep.subr.bf16.mxu1 %v3419_v23  ;;  %v3515_v23 = vld [vmem:[#allocation4 + $0x124] ss:$8 sps:$4 sm:$0xff]  }
 0x12e   :  { %2416 = vmatpush1.bf16.msra.mxu0 %v3504_v35  ;;  %v3525_v35 = vld [vmem:[#allocation4 + $0x160] ss:$8 sps:$4 sm:$0xff]  }
 0x12f   :  { %2426 = vmatprep.subr.bf16.mxu0 %v3509_v39  ;;  %v3531_v39 = vld [vmem:[#allocation4 + $0x180] ss:$8 sps:$4 sm:$0xff]  }
 0x130   :  { %1937 = vmatpush1.bf16.msra.mxu1 %v3417_v24  ;;  %v3558_v24 = vld [vmem:[%s3834_s5 + $0x8] sm:$0xff]  }
 0x131   :  { %1938 = vmatprep.subr.bf16.mxu1 %v3422_v25  ;;  %v3559_v25 = vld [vmem:[%s3834_s5 + $0x50] sm:$0xff]  }
 0x134   :  { %1939 = vmatpush1.bf16.msra.mxu1 %v3420_v26  ;;  %v3513_v26 = vld [vmem:[#allocation4 + $0x120] ss:$8 sps:$4 sm:$0xff]  }
 0x135   :  { %1940 = vmatprep.subr.bf16.mxu1 %v3425_v6  ;;  %v3518_v6 = vld [vmem:[#allocation4 + $0x134] ss:$8 sps:$4 sm:$0xff]  }
 0x138   :  { %1941 = vmatpush1.bf16.msra.mxu1 %v3423_v18  ;;  %v3560_v18 = vld [vmem:[%s3834_s5 + $0x10] sm:$0xff]  }
 0x139   :  { %1942 = vmatprep.subr.bf16.mxu1 %v3428_v27  ;;  %v3561_v27 = vld [vmem:[%s3834_s5 + $0x58] sm:$0xff]  }
 0x13a   :  { %v1679_v29 = vpop.f32.mrb[0].mxu1 }
 0x13b   :  { %v1681_v7 = vpop.f32.mrb[1].mxu1  ;;  %v1680_v61 = vadd.f32 %v1679_v29, %v320_v60  ;;  %v3562_v29 = vld [vmem:[%s3834_s5 + $0x18] sm:$0xff]   ;;  %v331_v60 = vsub.s32 3, %v3749_v56  ;;  %v2990_v56 = vld [vmem:[%s3835_s6] ss:$0 sm:$0xff] }
 0x13c   :  { %v1683_v31 = vpop.f32.mrb[2].mxu1  ;;  %1943 = vmatpush1.bf16.msra.mxu1 %v3426_v13  ;;  %v3516_v13 = vld [vmem:[#allocation4 + $0x130] ss:$8 sps:$4 sm:$0xff]  }
 0x13d   :  { %v1684_v34 = vpop.f32.mrb[3].mxu1  ;;  %1944 = vmatprep.subr.bf16.mxu1 %v3431_v28  ;;  %v3521_v28 = vld [vmem:[#allocation4 + $0x144] ss:$8 sps:$4 sm:$0xff]  }
 0x13e   :  { %v3564_v31 = vld [vmem:[%s3834_s5 + $0x20] sm:$0xff]   ;;  %v3522_v34 = vld [vmem:[#allocation4 + $0x150] ss:$8 sps:$4 sm:$0xff]  }
 0x140   :  { %1945 = vmatpush1.bf16.msra.mxu1 %v3429_v32  ;;  %v3565_v32 = vld [vmem:[%s3834_s5 + $0x68] sm:$0xff]  }
 0x141   :  { %1946 = vmatprep.subr.bf16.mxu1 %v3434_v51  ;;  %v3527_v51 = vld [vmem:[#allocation4 + $0x164] ss:$8 sps:$4 sm:$0xff]  }
 0x144   :  { %1947 = vmatpush1.bf16.msra.mxu1 %v3432_v36  ;;  %v3530_v36 = vld [vmem:[#allocation4 + $0x174] ss:$8 sps:$4 sm:$0xff]  }
 0x145   :  { %1948 = vmatprep.subr.bf16.mxu1 %v3437_v37  ;;  %v3528_v37 = vld [vmem:[#allocation4 + $0x170] ss:$8 sps:$4 sm:$0xff]  }
 0x148   :  { %1949 = vmatpush1.bf16.msra.mxu1 %v3435_v38  ;;  %v3533_v38 = vld [vmem:[#allocation4 + $0x184] ss:$8 sps:$4 sm:$0xff]  }
 0x149   :  { %1950 = vmatprep.subr.bf16.mxu1 %v3440_v40  ;;  %v3536_v40 = vld [vmem:[#allocation4 + $0x194] ss:$8 sps:$4 sm:$0xff]  }
 0x14c   :  { %1951 = vmatpush1.bf16.msra.mxu1 %v3438_v41  ;;  %v3534_v41 = vld [vmem:[#allocation4 + $0x190] ss:$8 sps:$4 sm:$0xff]  }
 0x14d   :  { %1952 = vmatprep.subr.bf16.mxu1 %v3443_v42  ;;  %v3539_v42 = vld [vmem:[#allocation4 + $0x1a4] ss:$8 sps:$4 sm:$0xff]  }
 0x150   :  { %1953 = vmatpush1.bf16.msra.mxu1 %v3441_v43  ;;  %v3537_v43 = vld [vmem:[#allocation4 + $0x1a0] ss:$8 sps:$4 sm:$0xff]  }
 0x151   :  { %1954 = vmatprep.subr.bf16.mxu1 %v3446_v44  ;;  %v3542_v44 = vld [vmem:[#allocation4 + $0x1b4] ss:$8 sps:$4 sm:$0xff]  }
 0x154   :  { %1955 = vmatpush1.bf16.msra.mxu1 %v3444_v45  ;;  %v3540_v45 = vld [vmem:[#allocation4 + $0x1b0] ss:$8 sps:$4 sm:$0xff]  }
 0x155   :  { %1956 = vmatprep.subr.bf16.mxu1 %v3449_v46  ;;  %v3545_v46 = vld [vmem:[#allocation4 + $0x1c4] ss:$8 sps:$4 sm:$0xff]  }
 0x158   :  { %1957 = vmatpush1.bf16.msra.mxu1 %v3447_v47  ;;  %v3543_v47 = vld [vmem:[#allocation4 + $0x1c0] ss:$8 sps:$4 sm:$0xff]  }
 0x159   :  { %1958 = vmatprep.subr.bf16.mxu1 %v3452_v48  ;;  %v3548_v48 = vld [vmem:[#allocation4 + $0x1d4] ss:$8 sps:$4 sm:$0xff]  }
 0x15c   :  { %1959 = vmatpush1.bf16.msra.mxu1 %v3450_v49  ;;  %v3546_v49 = vld [vmem:[#allocation4 + $0x1d0] ss:$8 sps:$4 sm:$0xff]  }
 0x15d   :  { %1960 = vmatprep.subr.bf16.mxu1 %v3455_v50  ;;  %v3551_v50 = vld [vmem:[#allocation4 + $0x1e4] ss:$8 sps:$4 sm:$0xff]  }
 0x160   :  { %1961 = vmatpush1.bf16.msra.mxu1 %v3453_v52  ;;  %v3549_v52 = vld [vmem:[#allocation4 + $0x1e0] ss:$8 sps:$4 sm:$0xff]  }
 0x161   :  { %1962 = vmatprep.subr.bf16.mxu1 %v3458_v53  ;;  %v3554_v53 = vld [vmem:[#allocation4 + $0x1f4] ss:$8 sps:$4 sm:$0xff]  }
 0x164   :  { %1963 = vmatpush1.bf16.msra.mxu1 %v3456_v54  ;;  %v3552_v54 = vld [vmem:[#allocation4 + $0x1f0] ss:$8 sps:$4 sm:$0xff]  }
 0x165   :  { %3007 = vmatprep.subr.bf16.mxu1 %v3555_v16  ;;  %v2053_v16 = vld [vmem:[%s3833_s4] sm:$0x3] }
 0x167   :  { %1965 = vmatmul.mubr.bf16.vlgmr.msra.gmra.mrb[4].mxu1 %v3741_v21  ;;  %v324_v21 = vrot.slane %v3755_v58, %v323_v59 }
 0x168   :  { %3008 = vmatpush3.bf16.msra.mxu1 %v3556_v17  ;;  %v2058_v17 = vrot.slane %v2053_v16, %v319_v57 }
 0x169   :  { %v1682_v62 = vadd.f32 %v1681_v7, %v324_v21  ;;  %3009 = vmatprep.subr.bf16.mxu1 %v3557_v20  ;;  %v3519_v7 = vld [vmem:[#allocation4 + $0x140] ss:$8 sps:$4 sm:$0xff]   ;;  %v328_v21 = vrot.slane %v3755_v58, %v327_v55  ;;  %v2062_v20 = vrot.slane %v2053_v16, %v323_v59 }
 0x16c   :  { %3010 = vmatpush3.bf16.msra.mxu1 %v3558_v24 }
 0x16d   :  { %3011 = vmatprep.subr.bf16.mxu1 %v3559_v25 }
 0x170   :  { %3012 = vmatpush3.bf16.msra.mxu1 %v3560_v18 }
 0x171   :  { %3013 = vmatprep.subr.bf16.mxu1 %v3561_v27 }
 0x174   :  { %3014 = vmatpush3.bf16.msra.mxu1 %v3562_v29 }
 0x175   :  { %3015 = vmatprep.subr.bf16.mxu1 %v3563_v19 }
 0x178   :  { %3016 = vmatpush3.bf16.msra.mxu1 %v3564_v31 }
 0x179   :  { %3017 = vmatprep.subr.bf16.mxu1 %v3565_v32 }
 0x17c   :  { %3018 = vmatpush3.bf16.msra.mxu1 %v3566_v33 }
 0x1bb   :  { %v1802_v63 = vpop.f32.mrb[0].mxu0 }
 0x1bc   :  { %v3030_v0 = vadd.f32 %v1802_v63, %v1680_v61  ;;  %v1804_v1 = vpop.f32.mrb[1].mxu0  ;;  %v332_v61 = vrot.slane %v3755_v58, %v331_v60  ;;  %v3567_v58 = vld [vmem:[%s3834_s5 + $0x70] sm:$0xff]  }
 0x1bd   :  { %v3032_v2 = vadd.f32 %v1804_v1, %v1682_v62  ;;  %v1806_v3 = vpop.f32.mrb[2].mxu0  ;;  %3019 = vmatprep.subr.bf16.mxu1 %v3567_v58 }
 0x1be   :  { %vm1973_vm0 = vcmp.gt.f32.partialorder %v3030_v0, 0.0  ;;  %v1977_v4 = vmul.f32 0.2, %v3030_v0  ;;  %v1807_v5 = vpop.f32.mrb[3].mxu0 }
 0x1bf   :  { %vm1974_vm1 = vcmp.gt.f32.partialorder %v3032_v2, 0.0  ;;  %v1978_v8 = vmul.f32 0.2, %v3032_v2 }
 0x1c0   :  { %v1981_v9 = vsel %vm1973_vm0, %v3030_v0, %v1977_v4 }
 0x1c1   :  { %v1982_v10 = vsel %vm1974_vm1, %v3032_v2, %v1978_v8  ;;  %v1985_v14 = vpack.c.bf16 %v1981_v9, %v1981_v9 }
 0x1c2   :  { %v1986_v11 = vpack.c.bf16 %v1982_v10, %v1982_v10 }
 0x1c4   :  { %2417 = vmatprep.mubr.bf16.mxu0 %v1986_v11 }
 0x1c5   :  { %2418 = vmatmul.mubr.bf16.vlgmr.msra.gmra.mrb[4].mxu0 %v1985_v14  ;;  %v3569_v14 = vld [vmem:[%s3834_s5 + $0x78] sm:$0xff]  }
 0x1c6   :  { %2427 = vmatpush1.bf16.msra.mxu0 %v3507_v12  ;;  %v3568_v12 = vld [vmem:[%s3834_s5 + $0x30] sm:$0xff]  }
 0x1c7   :  { %2428 = vmatprep.subr.bf16.mxu0 %v3512_v15  ;;  %3020 = vmatpush3.bf16.msra.mxu1 %v3568_v12  ;;  %v3570_v15 = vld [vmem:[%s3834_s5 + $0x38] sm:$0xff]  }
 0x1c8   :  { %3021 = vmatprep.subr.bf16.mxu1 %v3569_v14 }
 0x1ca   :  { %2429 = vmatpush1.bf16.msra.mxu0 %v3510_v22 }
 0x1cb   :  { %2430 = vmatprep.subr.bf16.mxu0 %v3515_v23  ;;  %3022 = vmatpush3.bf16.msra.mxu1 %v3570_v15 }
 0x1ce   :  { %2431 = vmatpush1.bf16.msra.mxu0 %v3513_v26 }
 0x1cf   :  { %2432 = vmatprep.subr.bf16.mxu0 %v3518_v6 }
 0x1d2   :  { %2433 = vmatpush1.bf16.msra.mxu0 %v3516_v13 }
 0x1d3   :  { %2434 = vmatprep.subr.bf16.mxu0 %v3521_v28 }
 0x1d6   :  { %2435 = vmatpush1.bf16.msra.mxu0 %v3519_v7 }
 0x1d7   :  { %2436 = vmatprep.subr.bf16.mxu0 %v3524_v30 }
 0x1da   :  { %2437 = vmatpush1.bf16.msra.mxu0 %v3522_v34 }
 0x1db   :  { %2438 = vmatprep.subr.bf16.mxu0 %v3527_v51 }
 0x1de   :  { %2439 = vmatpush1.bf16.msra.mxu0 %v3525_v35 }
 0x1df   :  { %2440 = vmatprep.subr.bf16.mxu0 %v3530_v36 }
 0x1e2   :  { %2441 = vmatpush1.bf16.msra.mxu0 %v3528_v37 }
 0x1e3   :  { %2442 = vmatprep.subr.bf16.mxu0 %v3533_v38 }
 0x1e6   :  { %2443 = vmatpush1.bf16.msra.mxu0 %v3531_v39 }
 0x1e7   :  { %2444 = vmatprep.subr.bf16.mxu0 %v3536_v40 }
 0x1ea   :  { %2445 = vmatpush1.bf16.msra.mxu0 %v3534_v41 }
 0x1eb   :  { %2446 = vmatprep.subr.bf16.mxu0 %v3539_v42 }
 0x1ee   :  { %2447 = vmatpush1.bf16.msra.mxu0 %v3537_v43 }
 0x1ef   :  { %2448 = vmatprep.subr.bf16.mxu0 %v3542_v44 }
 0x1f2   :  { %2449 = vmatpush1.bf16.msra.mxu0 %v3540_v45 }
 0x1f3   :  { %2450 = vmatprep.subr.bf16.mxu0 %v3545_v46 }
 0x1f6   :  { %2451 = vmatpush1.bf16.msra.mxu0 %v3543_v47 }
 0x1f7   :  { %2452 = vmatprep.subr.bf16.mxu0 %v3548_v48 }
 0x1fa   :  { %2453 = vmatpush1.bf16.msra.mxu0 %v3546_v49 }
 0x1fb   :  { %2454 = vmatprep.subr.bf16.mxu0 %v3551_v50 }
 0x1fe   :  { %2455 = vmatpush1.bf16.msra.mxu0 %v3549_v52 }
 0x1ff   :  { %2456 = vmatprep.subr.bf16.mxu0 %v3554_v53 }
 0x202   :  { %2457 = vmatpush1.bf16.msra.mxu0 %v3552_v54 }
 0x23a   :  { %v1966_v62 = vpop.f32.mrb[4].mxu1 }
 0x23b   :  { %v3033_v63 = vadd.f32 %v1966_v62, %v328_v21  ;;  %v1968_v0 = vpop.f32.mrb[5].mxu1 }
 0x23c   :  { %v3034_v1 = vadd.f32 %v1968_v0, %v332_v61  ;;  %v1970_v2 = vpop.f32.mrb[6].mxu1 }
 0x23d   :  { %vm1975_vm2 = vcmp.gt.f32.partialorder %v3033_v63, 0.0  ;;  %v1979_v3 = vmul.f32 0.2, %v3033_v63  ;;  %v1971_v4 = vpop.f32.mrb[7].mxu1 }
 0x23e   :  { %vm1976_vm3 = vcmp.gt.f32.partialorder %v3034_v1, 0.0  ;;  %v1980_v5 = vmul.f32 0.2, %v3034_v1 }
 0x23f   :  { %v1983_v8 = vsel %vm1975_vm2, %v3033_v63, %v1979_v3 }
 0x240   :  { %v1984_v9 = vsel %vm1976_vm3, %v3034_v1, %v1980_v5  ;;  %v1987_v11 = vpack.c.bf16 %v1983_v8, %v1983_v8 }
 0x241   :  { %v1988_v10 = vpack.c.bf16 %v1984_v9, %v1984_v9 }
 0x243   :  { %2458 = vmatprep.mubr.bf16.mxu0 %v1988_v10 }
 0x244   :  { %2459 = vmatmul.mubr.bf16.vlgmr.msra.gmra.mrb[4].mxu0 %v1987_v11 }
 0x317   :  { %v2460_v22 = vpop.f32.mrb[4].mxu0 }
 0x318   :  { %v3035_v23 = vadd.f32 %v2460_v22, %v2058_v17  ;;  %v2462_v24 = vpop.f32.mrb[5].mxu0 }
 0x319   :  { %v3036_v25 = vadd.f32 %v2462_v24, %v2062_v20  ;;  %v2464_v26 = vpop.f32.mrb[6].mxu0 }
 0x31a   :  { %vm2467_vm4 = vcmp.gt.f32.partialorder %v3035_v23, 0.0  ;;  %v2469_v6 = vmul.f32 0.2, %v3035_v23  ;;  %v2465_v18 = vpop.f32.mrb[7].mxu0 }
 0x31b   :  { %vm2468_vm5 = vcmp.gt.f32.partialorder %v3036_v25, 0.0  ;;  %v2470_v27 = vmul.f32 0.2, %v3036_v25 }
 0x31c   :  { %v2471_v13 = vsel %vm2467_vm4, %v3035_v23, %v2469_v6 }
 0x31d   :  { %v2472_v28 = vsel %vm2468_vm5, %v3036_v25, %v2470_v27  ;;  %v2473_v19 = vpack.c.bf16 %v2471_v13, %v2471_v13 }
 0x31e   :  { %v2474_v29 = vpack.c.bf16 %v2472_v28, %v2472_v28 }
 0x320   :  { %2642 = vmatprep.mubr.bf16.mxu1 %v2474_v29 }
 0x321   :  { %2643 = vmatmul.mubr.bf16.vlgmr.msra.gmra.mrb[8].mxu1 %v2473_v19 }
 0x3f4   :  { %v3023_v57 = vpop.f32.mrb[8].mxu1 }
 0x3f5   :  { %v3024_v59 = vpop.f32.mrb[9].mxu1 }
 0x3f6   :  { %v3025_v7 = vadd.f32 %v3024_v59, %v3023_v57  ;;  %v3026_v30 = vpop.f32.mrb[10].mxu1 }
 0x3f7   :  { %v3027_v31 = vpop.f32.mrb[11].mxu1 }
 0x3f8   :  { %v2645_v32 = vadd.f32 %v3025_v7, %v2990_v56 }
 0x3fa   :  { %v2650_v34 = vsub.f32 0.0, %v2645_v32 }
 0x3fc   :  { %v2651_v51 = vmul.f32 1.442695, %v2650_v34 }
 0x3fe   :  { %3571 = vpow2.f32 %v2651_v51 }
 0x408   :  { %v3572_v33 = vpop.eup %3571 }
 0x409   :  { %v2653_v35 = vadd.f32 1.0, %v3572_v33 }
 0x40b   :  { %3573 = vrcp.f32 %v2653_v35 }
 0x415   :  { %v3574_v36 = vpop.eup %3573 }
 0x416   :  { %2655 = vst [vmem:[%s3836_s7] sm:$0xff] %v3574_v36 }
 0x417   :  { %2660 = vsyncpa [#allocation3], 1 }
 0x418   :  { %2661 = vsyncpa [#allocation5], 1 }

</bundles_post_ra>
